<compile_context>
chip_gen: v7x
topology: tpu7x:2x2x1
jax: 0.10.0
libtpu: 0.0.40
codegen_flags: <defaults>
</compile_context>

<pallas_src>
import jax
import jax.numpy as jnp
from jax.experimental import pallas as pl
from jax.experimental.pallas import tpu as pltpu


_VMEM_LIMIT = 32 * 1024 * 1024


# -----------------------------------------------------------------------------
# Fused conv3x3 (pad=1) + ReLU + MaxPool2d(2,2) kernel
# -----------------------------------------------------------------------------
def _conv_relu_pool_kernel(a0_ref, a1_ref, a2_ref, a3_ref, w_ref, b_ref, o_ref):
    # a*_ref: (TM, 9*Cin) bf16 im2col rows, one per position of the 2x2 pooling
    # window.  w_ref: (9*Cin, Cout) bf16.  b_ref: (1, Cout) f32.
    w = w_ref[...]

    def phase_dot(a_ref):
        return jnp.dot(a_ref[...], w, preferred_element_type=jnp.float32)

    z = jnp.maximum(jnp.maximum(phase_dot(a0_ref), phase_dot(a1_ref)),
                    jnp.maximum(phase_dot(a2_ref), phase_dot(a3_ref)))
    z = z + b_ref[...]                                   # bias in f32
    # relu(max(.)) == max(relu(.)) so pooling before ReLU is exact.
    o_ref[...] = jnp.maximum(z, 0.0).astype(o_ref.dtype)


def conv3x3_relu_pool(x_nhwc, w, b, *, tm_max=512):
    """relu(conv3x3(x, padding=1)) followed by MaxPool2d(2,2), fused.

    x_nhwc: (N,H,W,Cin); w: (3,3,Cin,Cout); b: (Cout,).
    Returns (N, H//2, W//2, Cout) in bf16.
    """
    n, h, wd, cin = x_nhwc.shape
    cout = w.shape[-1]
    ho, wo = h // 2, wd // 2          # MaxPool2d(2,2) floor-truncates odd edges
    k = 9 * cin
    m = n * ho * wo

    xp = jnp.pad(x_nhwc, ((0, 0), (1, 1), (1, 1), (0, 0)))

    def phase(i, j):
        # im2col rows for conv-output positions (2*ho+i, 2*wo+j).  XLA glue is
        # only strided slicing + concat; the expanded matrix is read exactly
        # once by the kernel and the full-res conv output never exists in HBM.
        cols = [xp[:, i + dy:i + dy + 2 * ho:2, j + dx:j + dx + 2 * wo:2, :]
                for dy in range(3) for dx in range(3)]
        return jnp.concatenate(cols, axis=-1).reshape(m, k).astype(jnp.bfloat16)

    a00, a01, a10, a11 = phase(0, 0), phase(0, 1), phase(1, 0), phase(1, 1)
    w2 = w.reshape(k, cout).astype(jnp.bfloat16)
    b2 = b.reshape(1, cout).astype(jnp.float32)

    tm = m if m <= tm_max else tm_max
    grid = (pl.cdiv(m, tm),)
    a_spec = pl.BlockSpec((tm, k), lambda i: (i, 0))
    w_spec = pl.BlockSpec((k, cout), lambda i: (0, 0))
    b_spec = pl.BlockSpec((1, cout), lambda i: (0, 0))

    out = pl.pallas_call(
        _conv_relu_pool_kernel,
        out_shape=jax.ShapeDtypeStruct((m, cout), jnp.bfloat16),
        grid=grid,
        in_specs=[a_spec, a_spec, a_spec, a_spec, w_spec, b_spec],
        out_specs=pl.BlockSpec((tm, cout), lambda i: (i, 0)),
        compiler_params=pltpu.CompilerParams(
            dimension_semantics=("parallel",),
            vmem_limit_bytes=_VMEM_LIMIT),
        cost_estimate=pl.CostEstimate(
            flops=2 * 4 * m * k * cout,
            transcendentals=0,
            bytes_accessed=4 * m * k * 2 + m * cout * 2 + k * cout * 2 + cout * 4),
    )(a00, a01, a10, a11, w2, b2)
    return out.reshape(n, ho, wo, cout)


# -----------------------------------------------------------------------------
# Fused FC head: fc_features + ReLU + projection head + L2 norm (both outputs)
# -----------------------------------------------------------------------------
def _head_kernel(x_ref, wf_ref, bf_ref, wp1_ref, bp1_ref, wp2_ref, bp2_ref,
                 feat_ref, proj_ref):
    feat = jnp.dot(x_ref[...], wf_ref[...],
                   preferred_element_type=jnp.float32) + bf_ref[...]
    feat = jnp.maximum(feat, 0.0)
    # TODO(synk): nn.Dropout is identity in eval mode; training-mode random
    # masking/scaling is not implemented here.
    h1 = jnp.dot(feat.astype(jnp.bfloat16), wp1_ref[...],
                 preferred_element_type=jnp.float32) + bp1_ref[...]
    h1 = jnp.maximum(h1, 0.0)
    proj = jnp.dot(h1.astype(jnp.bfloat16), wp2_ref[...],
                   preferred_element_type=jnp.float32) + bp2_ref[...]

    # F.normalize(x, p=2, dim=1) = x / max(||x||, 1e-12) == x * rsqrt(max(ss, 1e-24))
    feat_ss = jnp.maximum(jnp.sum(feat * feat, axis=1, keepdims=True), 1e-24)
    proj_ss = jnp.maximum(jnp.sum(proj * proj, axis=1, keepdims=True), 1e-24)
    feat_ref[...] = (feat * jax.lax.rsqrt(feat_ss)).astype(feat_ref.dtype)
    proj_ref[...] = (proj * jax.lax.rsqrt(proj_ss)).astype(proj_ref.dtype)


def fused_head(x_flat, wf, bf, wp1, bp1, wp2, bp2, *, tn_max=256):
    """x_flat: (N, 576) in HWC-flatten order.  Returns (feat_l2, proj_l2) in f32."""
    n, kf = x_flat.shape
    e = wf.shape[1]
    p = wp2.shape[1]

    tn = n if n <= tn_max else tn_max
    grid = (pl.cdiv(n, tn),)
    full = lambda shape: pl.BlockSpec(shape, lambda i: (0, 0))

    return pl.pallas_call(
        _head_kernel,
        out_shape=(jax.ShapeDtypeStruct((n, e), jnp.float32),
                   jax.ShapeDtypeStruct((n, p), jnp.float32)),
        grid=grid,
        in_specs=[pl.BlockSpec((tn, kf), lambda i: (i, 0)),
                  full((kf, e)), full((1, e)),
                  full((e, e)), full((1, e)),
                  full((e, p)), full((1, p))],
        out_specs=(pl.BlockSpec((tn, e), lambda i: (i, 0)),
                   pl.BlockSpec((tn, p), lambda i: (i, 0))),
        compiler_params=pltpu.CompilerParams(
            dimension_semantics=("parallel",),
            vmem_limit_bytes=_VMEM_LIMIT),
        cost_estimate=pl.CostEstimate(
            flops=2 * n * (kf * e + e * e + e * p),
            transcendentals=2 * n,
            bytes_accessed=n * kf * 2 + (kf * e + e * e + e * p) * 2
                           + n * (e + p) * 4),
    )(x_flat.astype(jnp.bfloat16),
      wf.astype(jnp.bfloat16), bf.reshape(1, e).astype(jnp.float32),
      wp1.astype(jnp.bfloat16), bp1.reshape(1, e).astype(jnp.float32),
      wp2.astype(jnp.bfloat16), bp2.reshape(1, p).astype(jnp.float32))


# -----------------------------------------------------------------------------
# Parameters + forward
# -----------------------------------------------------------------------------
def init_params(key, embedding_dim=64, projection_dim=32):
    ks = jax.random.split(key, 12)
    s = 0.05

    def rnd(k, shape):
        return (s * jax.random.normal(k, shape)).astype(jnp.float32)

    return {
        # conv weights: (kh, kw, Cin, Cout); biases: (Cout,)
        "w1": rnd(ks[0], (3, 3, 1, 8)),    "b1": rnd(ks[1], (8,)),
        "w2": rnd(ks[2], (3, 3, 8, 16)),   "b2": rnd(ks[3], (16,)),
        "w3": rnd(ks[4], (3, 3, 16, 64)),  "b3": rnd(ks[5], (64,)),
        # fc_features weight in torch's row order: rows indexed by (c*9 + h*3 + w)
        "wf": rnd(ks[6], (64 * 3 * 3, embedding_dim)), "bf": rnd(ks[7], (embedding_dim,)),
        "wp1": rnd(ks[8], (embedding_dim, embedding_dim)), "bp1": rnd(ks[9], (embedding_dim,)),
        "wp2": rnd(ks[10], (embedding_dim, projection_dim)), "bp2": rnd(ks[11], (projection_dim,)),
    }


def simclr_forward(x_nchw, params, return_features=False):
    # NCHW (torch layout) -> NHWC (kernel layout)
    x = jnp.transpose(x_nchw, (0, 2, 3, 1)).astype(jnp.float32)       # (N,28,28,1)

    x = conv3x3_relu_pool(x, params["w1"], params["b1"])              # (N,14,14,8)
    x = conv3x3_relu_pool(x, params["w2"], params["b2"])              # (N,7,7,16)
    x = conv3x3_relu_pool(x, params["w3"], params["b3"])              # (N,3,3,64)

    n = x.shape[0]
    e = params["wf"].shape[1]
    # torch flattens the NCHW tensor channel-major (c,h,w); we flatten the NHWC
    # activation row-major (h,w,c) and permute the fc weight rows to match.
    x_flat = x.reshape(n, 3 * 3 * 64)
    wf_hwc = jnp.transpose(params["wf"].reshape(64, 3, 3, e),
                           (1, 2, 0, 3)).reshape(3 * 3 * 64, e)

    feat_l2, proj_l2 = fused_head(
        x_flat, wf_hwc, params["bf"],
        params["wp1"], params["bp1"], params["wp2"], params["bp2"])

    return feat_l2 if return_features else proj_l2


# -----------------------------------------------------------------------------
if __name__ == "__main__":
    key = jax.random.PRNGKey(0)
    kx, kp = jax.random.split(key)

    # MNIST-like input implied by fc_features = Linear(64*3*3, ...): 28x28, 1 ch.
    x = jax.random.normal(kx, (2, 1, 28, 28), dtype=jnp.float32)
    params = init_params(kp, embedding_dim=64, projection_dim=32)

    fwd = jax.jit(simclr_forward, static_argnames=("return_features",))
    proj = fwd(x, params, return_features=False)
    feats = fwd(x, params, return_features=True)
    jax.block_until_ready((proj, feats))

    assert proj.shape == (2, 32) and feats.shape == (2, 64)
    print("KERNEL_OK")
</pallas_src>

<mosaic_0001>
module attributes {stable_mosaic.version = 11 : i64} {
  func.func @_conv_relu_pool_kernel(%arg0: i32, %arg1: memref<392x9xbf16, #tpu.memory_space<vmem>>, %arg2: memref<392x9xbf16, #tpu.memory_space<vmem>>, %arg3: memref<392x9xbf16, #tpu.memory_space<vmem>>, %arg4: memref<392x9xbf16, #tpu.memory_space<vmem>>, %arg5: memref<9x8xbf16, #tpu.memory_space<vmem>>, %arg6: memref<1x8xf32, #tpu.memory_space<vmem>>, %arg7: memref<392x8xbf16, #tpu.memory_space<vmem>>) attributes {dimension_semantics = [#tpu.dimension_semantics<parallel>], iteration_bounds = array<i64: 1>, scalar_prefetch = 0 : i64, scratch_operands = 0 : i64, tpu.core_type = #tpu.core_type<tc>, window_params = [{transform_indices = @transform_0, window_bounds = array<i64: 392, 9>}, {transform_indices = @transform_1, window_bounds = array<i64: 392, 9>}, {transform_indices = @transform_2, window_bounds = array<i64: 392, 9>}, {transform_indices = @transform_3, window_bounds = array<i64: 392, 9>}, {pipeline_mode = #tpu.pipeline_mode<synchronous>, transform_indices = @transform_4, window_bounds = array<i64: 9, 8>}, {pipeline_mode = #tpu.pipeline_mode<synchronous>, transform_indices = @transform_5, window_bounds = array<i64: 1, 8>}, {transform_indices = @transform_6, window_bounds = array<i64: 392, 8>}]} {
    %c0 = arith.constant 0 : index
    %c0_0 = arith.constant 0 : index
    %0 = vector.load %arg5[%c0, %c0_0] : memref<9x8xbf16, #tpu.memory_space<vmem>>, vector<9x8xbf16>
    %c0_1 = arith.constant 0 : index
    %c0_2 = arith.constant 0 : index
    %1 = vector.load %arg1[%c0_1, %c0_2] : memref<392x9xbf16, #tpu.memory_space<vmem>>, vector<392x9xbf16>
    %cst = arith.constant dense<0.000000e+00> : vector<392x8xf32>
    %2 = tpu.matmul %1, %0, %cst {dimension_numbers = #tpu.dot_dimension_numbers<[1], [0], [0], [1], [0, 0, 1, 1], [], []>} : vector<392x9xbf16>, vector<9x8xbf16>, vector<392x8xf32> -> vector<392x8xf32>
    %c0_3 = arith.constant 0 : index
    %c0_4 = arith.constant 0 : index
    %3 = vector.load %arg2[%c0_3, %c0_4] : memref<392x9xbf16, #tpu.memory_space<vmem>>, vector<392x9xbf16>
    %cst_5 = arith.constant dense<0.000000e+00> : vector<392x8xf32>
    %4 = tpu.matmul %3, %0, %cst_5 {dimension_numbers = #tpu.dot_dimension_numbers<[1], [0], [0], [1], [0, 0, 1, 1], [], []>} : vector<392x9xbf16>, vector<9x8xbf16>, vector<392x8xf32> -> vector<392x8xf32>
    %5 = arith.maximumf %2, %4 : vector<392x8xf32>
    %c0_6 = arith.constant 0 : index
    %c0_7 = arith.constant 0 : index
    %6 = vector.load %arg3[%c0_6, %c0_7] : memref<392x9xbf16, #tpu.memory_space<vmem>>, vector<392x9xbf16>
    %cst_8 = arith.constant dense<0.000000e+00> : vector<392x8xf32>
    %7 = tpu.matmul %6, %0, %cst_8 {dimension_numbers = #tpu.dot_dimension_numbers<[1], [0], [0], [1], [0, 0, 1, 1], [], []>} : vector<392x9xbf16>, vector<9x8xbf16>, vector<392x8xf32> -> vector<392x8xf32>
    %c0_9 = arith.constant 0 : index
    %c0_10 = arith.constant 0 : index
    %8 = vector.load %arg4[%c0_9, %c0_10] : memref<392x9xbf16, #tpu.memory_space<vmem>>, vector<392x9xbf16>
    %cst_11 = arith.constant dense<0.000000e+00> : vector<392x8xf32>
    %9 = tpu.matmul %8, %0, %cst_11 {dimension_numbers = #tpu.dot_dimension_numbers<[1], [0], [0], [1], [0, 0, 1, 1], [], []>} : vector<392x9xbf16>, vector<9x8xbf16>, vector<392x8xf32> -> vector<392x8xf32>
    %10 = arith.maximumf %7, %9 : vector<392x8xf32>
    %11 = arith.maximumf %5, %10 : vector<392x8xf32>
    %c0_12 = arith.constant 0 : index
    %c0_13 = arith.constant 0 : index
    %12 = vector.load %arg6[%c0_12, %c0_13] : memref<1x8xf32, #tpu.memory_space<vmem>>, vector<1x8xf32>
    %13 = vector.broadcast %12 : vector<1x8xf32> to vector<392x8xf32>
    %14 = arith.addf %11, %13 : vector<392x8xf32>
    %cst_14 = arith.constant 0.000000e+00 : f32
    %15 = vector.broadcast %cst_14 : f32 to vector<392x8xf32>
    %16 = arith.maximumf %14, %15 : vector<392x8xf32>
    %17 = arith.truncf %16 : vector<392x8xf32> to vector<392x8xbf16>
    %c0_15 = arith.constant 0 : index
    %c0_16 = arith.constant 0 : index
    %18 = vector.load %arg7[%c0_15, %c0_16] : memref<392x8xbf16, #tpu.memory_space<vmem>>, vector<392x8xbf16>
    tpu.vector_store %arg7[%c0_15, %c0_16], %17 {strides = array<i32>} : memref<392x8xbf16, #tpu.memory_space<vmem>>, vector<392x8xbf16>,
    return
  }
  func.func @transform_0(%arg0: i32) -> (i32, i32) {
    %c0_i32 = arith.constant 0 : i32
    %c0_i32_0 = arith.constant 0 : i32
    return %arg0, %c0_i32 : i32, i32
  }
  func.func @transform_1(%arg0: i32) -> (i32, i32) {
    %c0_i32 = arith.constant 0 : i32
    %c0_i32_0 = arith.constant 0 : i32
    return %arg0, %c0_i32 : i32, i32
  }
  func.func @transform_2(%arg0: i32) -> (i32, i32) {
    %c0_i32 = arith.constant 0 : i32
    %c0_i32_0 = arith.constant 0 : i32
    return %arg0, %c0_i32 : i32, i32
  }
  func.func @transform_3(%arg0: i32) -> (i32, i32) {
    %c0_i32 = arith.constant 0 : i32
    %c0_i32_0 = arith.constant 0 : i32
    return %arg0, %c0_i32 : i32, i32
  }
  func.func @transform_4(%arg0: i32) -> (i32, i32) {
    %c0_i32 = arith.constant 0 : i32
    %c0_i32_0 = arith.constant 0 : i32
    %c0_i32_1 = arith.constant 0 : i32
    return %c0_i32, %c0_i32_0 : i32, i32
  }
  func.func @transform_5(%arg0: i32) -> (i32, i32) {
    %c0_i32 = arith.constant 0 : i32
    %c0_i32_0 = arith.constant 0 : i32
    %c0_i32_1 = arith.constant 0 : i32
    return %c0_i32, %c0_i32_0 : i32, i32
  }
  func.func @transform_6(%arg0: i32) -> (i32, i32) {
    %c0_i32 = arith.constant 0 : i32
    %c0_i32_0 = arith.constant 0 : i32
    return %arg0, %c0_i32 : i32, i32
  }
}

module attributes {stable_mosaic.version = 11 : i64} {
  func.func @_conv_relu_pool_kernel(%arg0: i32, %arg1: memref<98x72xbf16, #tpu.memory_space<vmem>>, %arg2: memref<98x72xbf16, #tpu.memory_space<vmem>>, %arg3: memref<98x72xbf16, #tpu.memory_space<vmem>>, %arg4: memref<98x72xbf16, #tpu.memory_space<vmem>>, %arg5: memref<72x16xbf16, #tpu.memory_space<vmem>>, %arg6: memref<1x16xf32, #tpu.memory_space<vmem>>, %arg7: memref<98x16xbf16, #tpu.memory_space<vmem>>) attributes {dimension_semantics = [#tpu.dimension_semantics<parallel>], iteration_bounds = array<i64: 1>, scalar_prefetch = 0 : i64, scratch_operands = 0 : i64, tpu.core_type = #tpu.core_type<tc>, window_params = [{transform_indices = @transform_0, window_bounds = array<i64: 98, 72>}, {transform_indices = @transform_1, window_bounds = array<i64: 98, 72>}, {transform_indices = @transform_2, window_bounds = array<i64: 98, 72>}, {transform_indices = @transform_3, window_bounds = array<i64: 98, 72>}, {pipeline_mode = #tpu.pipeline_mode<synchronous>, transform_indices = @transform_4, window_bounds = array<i64: 72, 16>}, {pipeline_mode = #tpu.pipeline_mode<synchronous>, transform_indices = @transform_5, window_bounds = array<i64: 1, 16>}, {transform_indices = @transform_6, window_bounds = array<i64: 98, 16>}]} {
    %c0 = arith.constant 0 : index
    %c0_0 = arith.constant 0 : index
    %0 = vector.load %arg5[%c0, %c0_0] : memref<72x16xbf16, #tpu.memory_space<vmem>>, vector<72x16xbf16>
    %c0_1 = arith.constant 0 : index
    %c0_2 = arith.constant 0 : index
    %1 = vector.load %arg1[%c0_1, %c0_2] : memref<98x72xbf16, #tpu.memory_space<vmem>>, vector<98x72xbf16>
    %cst = arith.constant dense<0.000000e+00> : vector<98x16xf32>
    %2 = tpu.matmul %1, %0, %cst {dimension_numbers = #tpu.dot_dimension_numbers<[1], [0], [0], [1], [0, 0, 1, 1], [], []>} : vector<98x72xbf16>, vector<72x16xbf16>, vector<98x16xf32> -> vector<98x16xf32>
    %c0_3 = arith.constant 0 : index
    %c0_4 = arith.constant 0 : index
    %3 = vector.load %arg2[%c0_3, %c0_4] : memref<98x72xbf16, #tpu.memory_space<vmem>>, vector<98x72xbf16>
    %cst_5 = arith.constant dense<0.000000e+00> : vector<98x16xf32>
    %4 = tpu.matmul %3, %0, %cst_5 {dimension_numbers = #tpu.dot_dimension_numbers<[1], [0], [0], [1], [0, 0, 1, 1], [], []>} : vector<98x72xbf16>, vector<72x16xbf16>, vector<98x16xf32> -> vector<98x16xf32>
    %5 = arith.maximumf %2, %4 : vector<98x16xf32>
    %c0_6 = arith.constant 0 : index
    %c0_7 = arith.constant 0 : index
    %6 = vector.load %arg3[%c0_6, %c0_7] : memref<98x72xbf16, #tpu.memory_space<vmem>>, vector<98x72xbf16>
    %cst_8 = arith.constant dense<0.000000e+00> : vector<98x16xf32>
    %7 = tpu.matmul %6, %0, %cst_8 {dimension_numbers = #tpu.dot_dimension_numbers<[1], [0], [0], [1], [0, 0, 1, 1], [], []>} : vector<98x72xbf16>, vector<72x16xbf16>, vector<98x16xf32> -> vector<98x16xf32>
    %c0_9 = arith.constant 0 : index
    %c0_10 = arith.constant 0 : index
    %8 = vector.load %arg4[%c0_9, %c0_10] : memref<98x72xbf16, #tpu.memory_space<vmem>>, vector<98x72xbf16>
    %cst_11 = arith.constant dense<0.000000e+00> : vector<98x16xf32>
    %9 = tpu.matmul %8, %0, %cst_11 {dimension_numbers = #tpu.dot_dimension_numbers<[1], [0], [0], [1], [0, 0, 1, 1], [], []>} : vector<98x72xbf16>, vector<72x16xbf16>, vector<98x16xf32> -> vector<98x16xf32>
    %10 = arith.maximumf %7, %9 : vector<98x16xf32>
    %11 = arith.maximumf %5, %10 : vector<98x16xf32>
    %c0_12 = arith.constant 0 : index
    %c0_13 = arith.constant 0 : index
    %12 = vector.load %arg6[%c0_12, %c0_13] : memref<1x16xf32, #tpu.memory_space<vmem>>, vector<1x16xf32>
    %13 = vector.broadcast %12 : vector<1x16xf32> to vector<98x16xf32>
    %14 = arith.addf %11, %13 : vector<98x16xf32>
    %cst_14 = arith.constant 0.000000e+00 : f32
    %15 = vector.broadcast %cst_14 : f32 to vector<98x16xf32>
    %16 = arith.maximumf %14, %15 : vector<98x16xf32>
    %17 = arith.truncf %16 : vector<98x16xf32> to vector<98x16xbf16>
    %c0_15 = arith.constant 0 : index
    %c0_16 = arith.constant 0 : index
    %18 = vector.load %arg7[%c0_15, %c0_16] : memref<98x16xbf16, #tpu.memory_space<vmem>>, vector<98x16xbf16>
    tpu.vector_store %arg7[%c0_15, %c0_16], %17 {strides = array<i32>} : memref<98x16xbf16, #tpu.memory_space<vmem>>, vector<98x16xbf16>,
    return
  }
  func.func @transform_0(%arg0: i32) -> (i32, i32) {
    %c0_i32 = arith.constant 0 : i32
    %c0_i32_0 = arith.constant 0 : i32
    return %arg0, %c0_i32 : i32, i32
  }
  func.func @transform_1(%arg0: i32) -> (i32, i32) {
    %c0_i32 = arith.constant 0 : i32
    %c0_i32_0 = arith.constant 0 : i32
    return %arg0, %c0_i32 : i32, i32
  }
  func.func @transform_2(%arg0: i32) -> (i32, i32) {
    %c0_i32 = arith.constant 0 : i32
    %c0_i32_0 = arith.constant 0 : i32
    return %arg0, %c0_i32 : i32, i32
  }
  func.func @transform_3(%arg0: i32) -> (i32, i32) {
    %c0_i32 = arith.constant 0 : i32
    %c0_i32_0 = arith.constant 0 : i32
    return %arg0, %c0_i32 : i32, i32
  }
  func.func @transform_4(%arg0: i32) -> (i32, i32) {
    %c0_i32 = arith.constant 0 : i32
    %c0_i32_0 = arith.constant 0 : i32
    %c0_i32_1 = arith.constant 0 : i32
    return %c0_i32, %c0_i32_0 : i32, i32
  }
  func.func @transform_5(%arg0: i32) -> (i32, i32) {
    %c0_i32 = arith.constant 0 : i32
    %c0_i32_0 = arith.constant 0 : i32
    %c0_i32_1 = arith.constant 0 : i32
    return %c0_i32, %c0_i32_0 : i32, i32
  }
  func.func @transform_6(%arg0: i32) -> (i32, i32) {
    %c0_i32 = arith.constant 0 : i32
    %c0_i32_0 = arith.constant 0 : i32
    return %arg0, %c0_i32 : i32, i32
  }
}

module attributes {stable_mosaic.version = 11 : i64} {
  func.func @_conv_relu_pool_kernel(%arg0: i32, %arg1: memref<18x144xbf16, #tpu.memory_space<vmem>>, %arg2: memref<18x144xbf16, #tpu.memory_space<vmem>>, %arg3: memref<18x144xbf16, #tpu.memory_space<vmem>>, %arg4: memref<18x144xbf16, #tpu.memory_space<vmem>>, %arg5: memref<144x64xbf16, #tpu.memory_space<vmem>>, %arg6: memref<1x64xf32, #tpu.memory_space<vmem>>, %arg7: memref<18x64xbf16, #tpu.memory_space<vmem>>) attributes {dimension_semantics = [#tpu.dimension_semantics<parallel>], iteration_bounds = array<i64: 1>, scalar_prefetch = 0 : i64, scratch_operands = 0 : i64, tpu.core_type = #tpu.core_type<tc>, window_params = [{transform_indices = @transform_0, window_bounds = array<i64: 18, 144>}, {transform_indices = @transform_1, window_bounds = array<i64: 18, 144>}, {transform_indices = @transform_2, window_bounds = array<i64: 18, 144>}, {transform_indices = @transform_3, window_bounds = array<i64: 18, 144>}, {pipeline_mode = #tpu.pipeline_mode<synchronous>, transform_indices = @transform_4, window_bounds = array<i64: 144, 64>}, {pipeline_mode = #tpu.pipeline_mode<synchronous>, transform_indices = @transform_5, window_bounds = array<i64: 1, 64>}, {transform_indices = @transform_6, window_bounds = array<i64: 18, 64>}]} {
    %c0 = arith.constant 0 : index
    %c0_0 = arith.constant 0 : index
    %0 = vector.load %arg5[%c0, %c0_0] : memref<144x64xbf16, #tpu.memory_space<vmem>>, vector<144x64xbf16>
    %c0_1 = arith.constant 0 : index
    %c0_2 = arith.constant 0 : index
    %1 = vector.load %arg1[%c0_1, %c0_2] : memref<18x144xbf16, #tpu.memory_space<vmem>>, vector<18x144xbf16>
    %cst = arith.constant dense<0.000000e+00> : vector<18x64xf32>
    %2 = tpu.matmul %1, %0, %cst {dimension_numbers = #tpu.dot_dimension_numbers<[1], [0], [0], [1], [0, 0, 1, 1], [], []>} : vector<18x144xbf16>, vector<144x64xbf16>, vector<18x64xf32> -> vector<18x64xf32>
    %c0_3 = arith.constant 0 : index
    %c0_4 = arith.constant 0 : index
    %3 = vector.load %arg2[%c0_3, %c0_4] : memref<18x144xbf16, #tpu.memory_space<vmem>>, vector<18x144xbf16>
    %cst_5 = arith.constant dense<0.000000e+00> : vector<18x64xf32>
    %4 = tpu.matmul %3, %0, %cst_5 {dimension_numbers = #tpu.dot_dimension_numbers<[1], [0], [0], [1], [0, 0, 1, 1], [], []>} : vector<18x144xbf16>, vector<144x64xbf16>, vector<18x64xf32> -> vector<18x64xf32>
    %5 = arith.maximumf %2, %4 : vector<18x64xf32>
    %c0_6 = arith.constant 0 : index
    %c0_7 = arith.constant 0 : index
    %6 = vector.load %arg3[%c0_6, %c0_7] : memref<18x144xbf16, #tpu.memory_space<vmem>>, vector<18x144xbf16>
    %cst_8 = arith.constant dense<0.000000e+00> : vector<18x64xf32>
    %7 = tpu.matmul %6, %0, %cst_8 {dimension_numbers = #tpu.dot_dimension_numbers<[1], [0], [0], [1], [0, 0, 1, 1], [], []>} : vector<18x144xbf16>, vector<144x64xbf16>, vector<18x64xf32> -> vector<18x64xf32>
    %c0_9 = arith.constant 0 : index
    %c0_10 = arith.constant 0 : index
    %8 = vector.load %arg4[%c0_9, %c0_10] : memref<18x144xbf16, #tpu.memory_space<vmem>>, vector<18x144xbf16>
    %cst_11 = arith.constant dense<0.000000e+00> : vector<18x64xf32>
    %9 = tpu.matmul %8, %0, %cst_11 {dimension_numbers = #tpu.dot_dimension_numbers<[1], [0], [0], [1], [0, 0, 1, 1], [], []>} : vector<18x144xbf16>, vector<144x64xbf16>, vector<18x64xf32> -> vector<18x64xf32>
    %10 = arith.maximumf %7, %9 : vector<18x64xf32>
    %11 = arith.maximumf %5, %10 : vector<18x64xf32>
    %c0_12 = arith.constant 0 : index
    %c0_13 = arith.constant 0 : index
    %12 = vector.load %arg6[%c0_12, %c0_13] : memref<1x64xf32, #tpu.memory_space<vmem>>, vector<1x64xf32>
    %13 = vector.broadcast %12 : vector<1x64xf32> to vector<18x64xf32>
    %14 = arith.addf %11, %13 : vector<18x64xf32>
    %cst_14 = arith.constant 0.000000e+00 : f32
    %15 = vector.broadcast %cst_14 : f32 to vector<18x64xf32>
    %16 = arith.maximumf %14, %15 : vector<18x64xf32>
    %17 = arith.truncf %16 : vector<18x64xf32> to vector<18x64xbf16>
    %c0_15 = arith.constant 0 : index
    %c0_16 = arith.constant 0 : index
    %18 = vector.load %arg7[%c0_15, %c0_16] : memref<18x64xbf16, #tpu.memory_space<vmem>>, vector<18x64xbf16>
    tpu.vector_store %arg7[%c0_15, %c0_16], %17 {strides = array<i32>} : memref<18x64xbf16, #tpu.memory_space<vmem>>, vector<18x64xbf16>,
    return
  }
  func.func @transform_0(%arg0: i32) -> (i32, i32) {
    %c0_i32 = arith.constant 0 : i32
    %c0_i32_0 = arith.constant 0 : i32
    return %arg0, %c0_i32 : i32, i32
  }
  func.func @transform_1(%arg0: i32) -> (i32, i32) {
    %c0_i32 = arith.constant 0 : i32
    %c0_i32_0 = arith.constant 0 : i32
    return %arg0, %c0_i32 : i32, i32
  }
  func.func @transform_2(%arg0: i32) -> (i32, i32) {
    %c0_i32 = arith.constant 0 : i32
    %c0_i32_0 = arith.constant 0 : i32
    return %arg0, %c0_i32 : i32, i32
  }
  func.func @transform_3(%arg0: i32) -> (i32, i32) {
    %c0_i32 = arith.constant 0 : i32
    %c0_i32_0 = arith.constant 0 : i32
    return %arg0, %c0_i32 : i32, i32
  }
  func.func @transform_4(%arg0: i32) -> (i32, i32) {
    %c0_i32 = arith.constant 0 : i32
    %c0_i32_0 = arith.constant 0 : i32
    %c0_i32_1 = arith.constant 0 : i32
    return %c0_i32, %c0_i32_0 : i32, i32
  }
  func.func @transform_5(%arg0: i32) -> (i32, i32) {
    %c0_i32 = arith.constant 0 : i32
    %c0_i32_0 = arith.constant 0 : i32
    %c0_i32_1 = arith.constant 0 : i32
    return %c0_i32, %c0_i32_0 : i32, i32
  }
  func.func @transform_6(%arg0: i32) -> (i32, i32) {
    %c0_i32 = arith.constant 0 : i32
    %c0_i32_0 = arith.constant 0 : i32
    return %arg0, %c0_i32 : i32, i32
  }
}

module attributes {stable_mosaic.version = 11 : i64} {
  func.func @_head_kernel(%arg0: i32, %arg1: memref<2x576xbf16, #tpu.memory_space<vmem>>, %arg2: memref<576x64xbf16, #tpu.memory_space<vmem>>, %arg3: memref<1x64xf32, #tpu.memory_space<vmem>>, %arg4: memref<64x64xbf16, #tpu.memory_space<vmem>>, %arg5: memref<1x64xf32, #tpu.memory_space<vmem>>, %arg6: memref<64x32xbf16, #tpu.memory_space<vmem>>, %arg7: memref<1x32xf32, #tpu.memory_space<vmem>>, %arg8: memref<2x64xf32, #tpu.memory_space<vmem>>, %arg9: memref<2x32xf32, #tpu.memory_space<vmem>>) attributes {dimension_semantics = [#tpu.dimension_semantics<parallel>], iteration_bounds = array<i64: 1>, scalar_prefetch = 0 : i64, scratch_operands = 0 : i64, tpu.core_type = #tpu.core_type<tc>, window_params = [{transform_indices = @transform_0, window_bounds = array<i64: 2, 576>}, {pipeline_mode = #tpu.pipeline_mode<synchronous>, transform_indices = @transform_1, window_bounds = array<i64: 576, 64>}, {pipeline_mode = #tpu.pipeline_mode<synchronous>, transform_indices = @transform_2, window_bounds = array<i64: 1, 64>}, {pipeline_mode = #tpu.pipeline_mode<synchronous>, transform_indices = @transform_3, window_bounds = array<i64: 64, 64>}, {pipeline_mode = #tpu.pipeline_mode<synchronous>, transform_indices = @transform_4, window_bounds = array<i64: 1, 64>}, {pipeline_mode = #tpu.pipeline_mode<synchronous>, transform_indices = @transform_5, window_bounds = array<i64: 64, 32>}, {pipeline_mode = #tpu.pipeline_mode<synchronous>, transform_indices = @transform_6, window_bounds = array<i64: 1, 32>}, {transform_indices = @transform_7, window_bounds = array<i64: 2, 64>}, {transform_indices = @transform_8, window_bounds = array<i64: 2, 32>}]} {
    %c0 = arith.constant 0 : index
    %c0_0 = arith.constant 0 : index
    %0 = vector.load %arg1[%c0, %c0_0] : memref<2x576xbf16, #tpu.memory_space<vmem>>, vector<2x576xbf16>
    %c0_1 = arith.constant 0 : index
    %c0_2 = arith.constant 0 : index
    %1 = vector.load %arg2[%c0_1, %c0_2] : memref<576x64xbf16, #tpu.memory_space<vmem>>, vector<576x64xbf16>
    %cst = arith.constant dense<0.000000e+00> : vector<2x64xf32>
    %2 = tpu.matmul %0, %1, %cst {dimension_numbers = #tpu.dot_dimension_numbers<[1], [0], [0], [1], [0, 0, 1, 1], [], []>} : vector<2x576xbf16>, vector<576x64xbf16>, vector<2x64xf32> -> vector<2x64xf32>
    %c0_3 = arith.constant 0 : index
    %c0_4 = arith.constant 0 : index
    %3 = vector.load %arg3[%c0_3, %c0_4] : memref<1x64xf32, #tpu.memory_space<vmem>>, vector<1x64xf32>
    %4 = vector.broadcast %3 : vector<1x64xf32> to vector<2x64xf32>
    %5 = arith.addf %2, %4 : vector<2x64xf32>
    %cst_5 = arith.constant 0.000000e+00 : f32
    %6 = vector.broadcast %cst_5 : f32 to vector<2x64xf32>
    %7 = arith.maximumf %5, %6 : vector<2x64xf32>
    %8 = arith.truncf %7 : vector<2x64xf32> to vector<2x64xbf16>
    %c0_6 = arith.constant 0 : index
    %c0_7 = arith.constant 0 : index
    %9 = vector.load %arg4[%c0_6, %c0_7] : memref<64x64xbf16, #tpu.memory_space<vmem>>, vector<64x64xbf16>
    %cst_8 = arith.constant dense<0.000000e+00> : vector<2x64xf32>
    %10 = tpu.matmul %8, %9, %cst_8 {dimension_numbers = #tpu.dot_dimension_numbers<[1], [0], [0], [1], [0, 0, 1, 1], [], []>} : vector<2x64xbf16>, vector<64x64xbf16>, vector<2x64xf32> -> vector<2x64xf32>
    %c0_9 = arith.constant 0 : index
    %c0_10 = arith.constant 0 : index
    %11 = vector.load %arg5[%c0_9, %c0_10] : memref<1x64xf32, #tpu.memory_space<vmem>>, vector<1x64xf32>
    %12 = vector.broadcast %11 : vector<1x64xf32> to vector<2x64xf32>
    %13 = arith.addf %10, %12 : vector<2x64xf32>
    %cst_11 = arith.constant 0.000000e+00 : f32
    %14 = vector.broadcast %cst_11 : f32 to vector<2x64xf32>
    %15 = arith.maximumf %13, %14 : vector<2x64xf32>
    %16 = arith.truncf %15 : vector<2x64xf32> to vector<2x64xbf16>
    %c0_12 = arith.constant 0 : index
    %c0_13 = arith.constant 0 : index
    %17 = vector.load %arg6[%c0_12, %c0_13] : memref<64x32xbf16, #tpu.memory_space<vmem>>, vector<64x32xbf16>
    %cst_14 = arith.constant dense<0.000000e+00> : vector<2x32xf32>
    %18 = tpu.matmul %16, %17, %cst_14 {dimension_numbers = #tpu.dot_dimension_numbers<[1], [0], [0], [1], [0, 0, 1, 1], [], []>} : vector<2x64xbf16>, vector<64x32xbf16>, vector<2x32xf32> -> vector<2x32xf32>
    %c0_15 = arith.constant 0 : index
    %c0_16 = arith.constant 0 : index
    %19 = vector.load %arg7[%c0_15, %c0_16] : memref<1x32xf32, #tpu.memory_space<vmem>>, vector<1x32xf32>
    %20 = vector.broadcast %19 : vector<1x32xf32> to vector<2x32xf32>
    %21 = arith.addf %18, %20 : vector<2x32xf32>
    %22 = arith.mulf %7, %7 : vector<2x64xf32>
    %cst_17 = arith.constant dense<0.000000e+00> : vector<2xf32>
    %23 = vector.multi_reduction <add>, %22, %cst_17 [1] : vector<2x64xf32> to vector<2xf32>
    %24 = vector.shape_cast %23 : vector<2xf32> to vector<2x1xf32>
    %cst_18 = arith.constant 1.000000e-24 : f32
    %25 = vector.broadcast %cst_18 : f32 to vector<2x1xf32>
    %26 = arith.maximumf %24, %25 : vector<2x1xf32>
    %27 = arith.mulf %21, %21 : vector<2x32xf32>
    %cst_19 = arith.constant dense<0.000000e+00> : vector<2xf32>
    %28 = vector.multi_reduction <add>, %27, %cst_19 [1] : vector<2x32xf32> to vector<2xf32>
    %29 = vector.shape_cast %28 : vector<2xf32> to vector<2x1xf32>
    %cst_20 = arith.constant 1.000000e-24 : f32
    %30 = vector.broadcast %cst_20 : f32 to vector<2x1xf32>
    %31 = arith.maximumf %29, %30 : vector<2x1xf32>
    %32 = math.rsqrt %26 : vector<2x1xf32>
    %33 = vector.broadcast %32 : vector<2x1xf32> to vector<2x64xf32>
    %34 = arith.mulf %7, %33 : vector<2x64xf32>
    %c0_21 = arith.constant 0 : index
    %c0_22 = arith.constant 0 : index
    %35 = vector.load %arg8[%c0_21, %c0_22] : memref<2x64xf32, #tpu.memory_space<vmem>>, vector<2x64xf32>
    tpu.vector_store %arg8[%c0_21, %c0_22], %34 {strides = array<i32>} : memref<2x64xf32, #tpu.memory_space<vmem>>, vector<2x64xf32>,
    %36 = math.rsqrt %31 : vector<2x1xf32>
    %37 = vector.broadcast %36 : vector<2x1xf32> to vector<2x32xf32>
    %38 = arith.mulf %21, %37 : vector<2x32xf32>
    %c0_23 = arith.constant 0 : index
    %c0_24 = arith.constant 0 : index
    %39 = vector.load %arg9[%c0_23, %c0_24] : memref<2x32xf32, #tpu.memory_space<vmem>>, vector<2x32xf32>
    tpu.vector_store %arg9[%c0_23, %c0_24], %38 {strides = array<i32>} : memref<2x32xf32, #tpu.memory_space<vmem>>, vector<2x32xf32>,
    return
  }
  func.func @transform_0(%arg0: i32) -> (i32, i32) {
    %c0_i32 = arith.constant 0 : i32
    %c0_i32_0 = arith.constant 0 : i32
    return %arg0, %c0_i32 : i32, i32
  }
  func.func @transform_1(%arg0: i32) -> (i32, i32) {
    %c0_i32 = arith.constant 0 : i32
    %c0_i32_0 = arith.constant 0 : i32
    %c0_i32_1 = arith.constant 0 : i32
    return %c0_i32, %c0_i32_0 : i32, i32
  }
  func.func @transform_2(%arg0: i32) -> (i32, i32) {
    %c0_i32 = arith.constant 0 : i32
    %c0_i32_0 = arith.constant 0 : i32
    %c0_i32_1 = arith.constant 0 : i32
    return %c0_i32, %c0_i32_0 : i32, i32
  }
  func.func @transform_3(%arg0: i32) -> (i32, i32) {
    %c0_i32 = arith.constant 0 : i32
    %c0_i32_0 = arith.constant 0 : i32
    %c0_i32_1 = arith.constant 0 : i32
    return %c0_i32, %c0_i32_0 : i32, i32
  }
  func.func @transform_4(%arg0: i32) -> (i32, i32) {
    %c0_i32 = arith.constant 0 : i32
    %c0_i32_0 = arith.constant 0 : i32
    %c0_i32_1 = arith.constant 0 : i32
    return %c0_i32, %c0_i32_0 : i32, i32
  }
  func.func @transform_5(%arg0: i32) -> (i32, i32) {
    %c0_i32 = arith.constant 0 : i32
    %c0_i32_0 = arith.constant 0 : i32
    %c0_i32_1 = arith.constant 0 : i32
    return %c0_i32, %c0_i32_0 : i32, i32
  }
  func.func @transform_6(%arg0: i32) -> (i32, i32) {
    %c0_i32 = arith.constant 0 : i32
    %c0_i32_0 = arith.constant 0 : i32
    %c0_i32_1 = arith.constant 0 : i32
    return %c0_i32, %c0_i32_0 : i32, i32
  }
  func.func @transform_7(%arg0: i32) -> (i32, i32) {
    %c0_i32 = arith.constant 0 : i32
    %c0_i32_0 = arith.constant 0 : i32
    return %arg0, %c0_i32 : i32, i32
  }
  func.func @transform_8(%arg0: i32) -> (i32, i32) {
    %c0_i32 = arith.constant 0 : i32
    %c0_i32_0 = arith.constant 0 : i32
    return %arg0, %c0_i32 : i32, i32
  }
}

</mosaic_0001>

<bundles_post_ra>
// kernel: simclr_forward.4
= control target key start
LH: loop header
LB: loop body
LE: loop exit
PB: predicated region body
PF: predicated region fallthrough
CT: control target
= control target key end

     0   :  { %vm279_vm0 = vcmask 1043456   ;;  %vm280_vm1 = vcmask 1044480   ;;  %v4717_v0 = vmov 0.0   ;;  %v3375_v2 = vmov 65535   ;;  %s4710_s4 = inlined_call_operand.vmem [shape: bf16[9,8], index: 4, kind: input, shape index: {}]   ;;  %s4711_s0 = inlined_call_operand.vmem [shape: bf16[392,9], index: 0, kind: input, shape index: {}]   ;;  %s4712_s1 = inlined_call_operand.vmem [shape: bf16[392,9], index: 1, kind: input, shape index: {}]   ;;  %s4713_s2 = inlined_call_operand.vmem [shape: bf16[392,9], index: 2, kind: input, shape index: {}]   ;;  %s4714_s3 = inlined_call_operand.vmem [shape: bf16[392,9], index: 3, kind: input, shape index: {}]   ;;  %s4715_s5 = inlined_call_operand.vmem [shape: f32[1,8], index: 5, kind: input, shape index: {}]   ;;  %s4716_s6 = inlined_call_operand.vmem [shape: bf16[392,8], index: 6, kind: output, shape index: {}]  }
   0x1   :  { %2862 = vmatprep.subr.bf16.mxu0 %v4717_v0  ;;  %2964 = vmatprep.subr.bf16.mxu1 %v4717_v0  ;;  %v3273_v1 = vld [vmem:[%s4710_s4] sm:$0x1f]   ;;  %v281_v3 = vsel %vm279_vm0, 4294967295, %v3375_v2  ;;  %vm3376_vm2 = vmmov 0   ;;  %vm203_vm3 = vcmask 72704   ;;  %v3276_v8 = vld [vmem:[%s4711_s0 + $0x8] sm:$0xff]  }
   0x2   :  { %v282_v4 = vsel %vm280_vm1, %v281_v3, 0  ;;  %2864 = vmatprep.mubr.msk.bf16.mxu0 %vm3376_vm2, %v4717_v0  ;;  %2966 = vmatprep.mubr.msk.bf16.mxu1 %vm3376_vm2, %v4717_v0  ;;  %v3274_v5 = vld [vmem:[%s4711_s0] sm:$0xff]   ;;  %v3277_v9 = vld [vmem:[%s4712_s1 + $0x8] sm:$0xff]   ;;  %v3278_v10 = vld [vmem:[%s4711_s0 + $0x10] sm:$0xff]   ;;  %vm2404_vm4 = vcmask 60416  }
   0x3   :  { %v284_v6 = vand.u32 %v3273_v1, %v282_v4  ;;  %v3275_v7 = vld [vmem:[%s4712_s1] sm:$0xff]   ;;  %v3279_v11 = vld [vmem:[%s4712_s1 + $0x10] sm:$0xff]   ;;  %v3280_v12 = vld [vmem:[%s4711_s0 + $0x18] sm:$0xff]  }
   0x4   :  { %v3281_v13 = vld [vmem:[%s4712_s1 + $0x18] sm:$0xff]   ;;  %v3282_v14 = vld [vmem:[%s4711_s0 + $0x20] sm:$0xff]   ;;  %v3284_v16 = vld [vmem:[%s4711_s0 + $0x28] sm:$0xff]  }
   0x5   :  { %2863 = vmatpush3.bf16.msra.mxu0 %v284_v6  ;;  %2965 = vmatpush3.bf16.msra.mxu1 %v284_v6  ;;  %v3283_v15 = vld [vmem:[%s4712_s1 + $0x20] sm:$0xff]   ;;  %v3285_v17 = vld [vmem:[%s4712_s1 + $0x28] sm:$0xff]   ;;  %v3286_v18 = vld [vmem:[%s4711_s0 + $0x30] sm:$0xff]  }
   0x6   :  { %3066 = vmatprep.subr.bf16.mxu0 %v4717_v0  ;;  %3168 = vmatprep.subr.bf16.mxu1 %v4717_v0  ;;  %v3287_v19 = vld [vmem:[%s4712_s1 + $0x30] sm:$0xff]   ;;  %v3288_v20 = vld [vmem:[%s4711_s0 + $0x38] sm:$0xff]   ;;  %v3290_v22 = vld [vmem:[%s4711_s0 + $0x40] sm:$0xff]  }
   0x7   :  { %v3289_v21 = vld [vmem:[%s4712_s1 + $0x38] sm:$0xff]   ;;  %v3291_v23 = vld [vmem:[%s4712_s1 + $0x40] sm:$0xff]   ;;  %v3292_v24 = vld [vmem:[%s4711_s0 + $0x48] sm:$0xff]  }
   0x8   :  { %2865 = vmatmul.mubr.msk.bf16.vlgmr.msra.gmra.mrb[0].mxu0 %vm203_vm3, %v3274_v5  ;;  %2967 = vmatmul.mubr.msk.bf16.vlgmr.msra.gmra.mrb[0].mxu1 %vm203_vm3, %v3275_v7  ;;  %v3293_v25 = vld [vmem:[%s4712_s1 + $0x48] sm:$0xff]   ;;  %v3294_v26 = vld [vmem:[%s4711_s0 + $0x50] sm:$0xff]   ;;  %v3296_v28 = vld [vmem:[%s4711_s0 + $0x58] sm:$0xff]  }
   0x9   :  { %3067 = vmatpush3.bf16.msra.mxu0 %v284_v6  ;;  %3169 = vmatpush3.bf16.msra.mxu1 %v284_v6  ;;  %v3295_v27 = vld [vmem:[%s4712_s1 + $0x50] sm:$0xff]   ;;  %v3297_v29 = vld [vmem:[%s4712_s1 + $0x58] sm:$0xff]   ;;  %v3298_v30 = vld [vmem:[%s4711_s0 + $0x60] sm:$0xff]  }
   0xa   :  { %2868 = vmatprep.mubr.msk.bf16.mxu0 %vm3376_vm2, %v4717_v0  ;;  %2970 = vmatprep.mubr.msk.bf16.mxu1 %vm3376_vm2, %v4717_v0  ;;  %v3299_v31 = vld [vmem:[%s4712_s1 + $0x60] sm:$0xff]   ;;  %v3300_v32 = vld [vmem:[%s4711_s0 + $0x68] sm:$0xff]   ;;  %v3302_v34 = vld [vmem:[%s4711_s0 + $0x70] sm:$0xff]  }
   0xb   :  { %v3301_v33 = vld [vmem:[%s4712_s1 + $0x68] sm:$0xff]   ;;  %v3303_v35 = vld [vmem:[%s4712_s1 + $0x70] sm:$0xff]   ;;  %v3304_v36 = vld [vmem:[%s4711_s0 + $0x78] sm:$0xff]  }
   0xc   :  { %v3305_v37 = vld [vmem:[%s4712_s1 + $0x78] sm:$0xff]   ;;  %v3306_v38 = vld [vmem:[%s4711_s0 + $0x80] sm:$0xff]   ;;  %v3308_v40 = vld [vmem:[%s4711_s0 + $0x88] sm:$0xff]  }
   0xd   :  { %v3307_v39 = vld [vmem:[%s4712_s1 + $0x80] sm:$0xff]   ;;  %v3309_v41 = vld [vmem:[%s4712_s1 + $0x88] sm:$0xff]   ;;  %v3310_v42 = vld [vmem:[%s4711_s0 + $0x90] sm:$0xff]  }
   0xe   :  { %v3311_v43 = vld [vmem:[%s4712_s1 + $0x90] sm:$0xff]   ;;  %v3312_v44 = vld [vmem:[%s4711_s0 + $0x98] sm:$0xff]   ;;  %v3314_v46 = vld [vmem:[%s4711_s0 + $0xa0] sm:$0xff]  }
   0xf   :  { %v3313_v45 = vld [vmem:[%s4712_s1 + $0x98] sm:$0xff]   ;;  %v3315_v47 = vld [vmem:[%s4712_s1 + $0xa0] sm:$0xff]   ;;  %v3316_v48 = vld [vmem:[%s4711_s0 + $0xa8] sm:$0xff]  }
  0x10   :  { %2869 = vmatmul.mubr.msk.bf16.gmra.mrb[4].mxu0 %vm203_vm3, %v3276_v8  ;;  %2971 = vmatmul.mubr.msk.bf16.gmra.mrb[4].mxu1 %vm203_vm3, %v3277_v9  ;;  %v3317_v49 = vld [vmem:[%s4712_s1 + $0xa8] sm:$0xff]   ;;  %v3318_v50 = vld [vmem:[%s4711_s0 + $0xb0] sm:$0xff]   ;;  %v3320_v52 = vld [vmem:[%s4711_s0 + $0xb8] sm:$0xff]  }
  0x11   :  { %2872 = vmatprep.mubr.msk.bf16.mxu0 %vm3376_vm2, %v4717_v0  ;;  %2974 = vmatprep.mubr.msk.bf16.mxu1 %vm3376_vm2, %v4717_v0  ;;  %v3319_v51 = vld [vmem:[%s4712_s1 + $0xb0] sm:$0xff]   ;;  %v3321_v53 = vld [vmem:[%s4712_s1 + $0xb8] sm:$0xff]   ;;  %v3322_v54 = vld [vmem:[%s4711_s0 + $0xc0] ss:$0 sps:$4 sm:$0xff]  }
  0x12   :  { %v3323_v55 = vld [vmem:[%s4712_s1 + $0xc0] ss:$0 sps:$4 sm:$0xff]   ;;  %v3326_v58 = vld [vmem:[%s4713_s2 + $0x8] sm:$0xff]   ;;  %v3328_v2 = vld [vmem:[%s4713_s2 + $0x10] sm:$0xff]  }
  0x13   :  { %v3324_v56 = vld [vmem:[%s4713_s2] sm:$0xff]   ;;  %v3327_v59 = vld [vmem:[%s4714_s3 + $0x8] sm:$0xff]   ;;  %v3329_v3 = vld [vmem:[%s4714_s3 + $0x10] sm:$0xff]  }
  0x14   :  { %v3325_v57 = vld [vmem:[%s4714_s3] sm:$0xff]  }
  0x18   :  { %2873 = vmatmul.mubr.msk.bf16.gmra.mrb[8].mxu0 %vm203_vm3, %v3278_v10  ;;  %2975 = vmatmul.mubr.msk.bf16.gmra.mrb[8].mxu1 %vm203_vm3, %v3279_v11 }
  0x19   :  { %2876 = vmatprep.mubr.msk.bf16.mxu0 %vm3376_vm2, %v4717_v0  ;;  %2978 = vmatprep.mubr.msk.bf16.mxu1 %vm3376_vm2, %v4717_v0 }
  0x20   :  { %2877 = vmatmul.mubr.msk.bf16.gmra.mrb[12].mxu0 %vm203_vm3, %v3280_v12  ;;  %2979 = vmatmul.mubr.msk.bf16.gmra.mrb[12].mxu1 %vm203_vm3, %v3281_v13 }
  0x21   :  { %2880 = vmatprep.mubr.msk.bf16.mxu0 %vm3376_vm2, %v4717_v0  ;;  %2982 = vmatprep.mubr.msk.bf16.mxu1 %vm3376_vm2, %v4717_v0 }
  0x28   :  { %2881 = vmatmul.mubr.msk.bf16.gmra.mrb[16].mxu0 %vm203_vm3, %v3282_v14  ;;  %2983 = vmatmul.mubr.msk.bf16.gmra.mrb[16].mxu1 %vm203_vm3, %v3283_v15  ;;  %v3330_v14 = vld [vmem:[%s4713_s2 + $0x18] sm:$0xff]  }
  0x29   :  { %2884 = vmatprep.mubr.msk.bf16.mxu0 %vm3376_vm2, %v4717_v0  ;;  %2986 = vmatprep.mubr.msk.bf16.mxu1 %vm3376_vm2, %v4717_v0  ;;  %v3331_v15 = vld [vmem:[%s4714_s3 + $0x18] sm:$0xff]  }
  0x30   :  { %2885 = vmatmul.mubr.msk.bf16.gmra.mrb[20].mxu0 %vm203_vm3, %v3284_v16  ;;  %2987 = vmatmul.mubr.msk.bf16.gmra.mrb[20].mxu1 %vm203_vm3, %v3285_v17 }
  0x31   :  { %2888 = vmatprep.mubr.msk.bf16.mxu0 %vm3376_vm2, %v4717_v0  ;;  %2990 = vmatprep.mubr.msk.bf16.mxu1 %vm3376_vm2, %v4717_v0 }
  0x38   :  { %2889 = vmatmul.mubr.msk.bf16.gmra.mrb[24].mxu0 %vm203_vm3, %v3286_v18  ;;  %2991 = vmatmul.mubr.msk.bf16.gmra.mrb[24].mxu1 %vm203_vm3, %v3287_v19 }
  0x39   :  { %2892 = vmatprep.mubr.msk.bf16.mxu0 %vm3376_vm2, %v4717_v0  ;;  %2994 = vmatprep.mubr.msk.bf16.mxu1 %vm3376_vm2, %v4717_v0 }
  0x40   :  { %2893 = vmatmul.mubr.msk.bf16.gmra.mrb[28].mxu0 %vm203_vm3, %v3288_v20  ;;  %2995 = vmatmul.mubr.msk.bf16.gmra.mrb[28].mxu1 %vm203_vm3, %v3289_v21 }
  0x41   :  { %2896 = vmatprep.mubr.msk.bf16.mxu0 %vm3376_vm2, %v4717_v0  ;;  %2998 = vmatprep.mubr.msk.bf16.mxu1 %vm3376_vm2, %v4717_v0 }
  0x48   :  { %2897 = vmatmul.mubr.msk.bf16.gmra.mrb[32].mxu0 %vm203_vm3, %v3290_v22  ;;  %2999 = vmatmul.mubr.msk.bf16.gmra.mrb[32].mxu1 %vm203_vm3, %v3291_v23 }
  0x49   :  { %2900 = vmatprep.mubr.msk.bf16.mxu0 %vm3376_vm2, %v4717_v0  ;;  %3002 = vmatprep.mubr.msk.bf16.mxu1 %vm3376_vm2, %v4717_v0 }
  0x50   :  { %2901 = vmatmul.mubr.msk.bf16.gmra.mrb[36].mxu0 %vm203_vm3, %v3292_v24  ;;  %3003 = vmatmul.mubr.msk.bf16.gmra.mrb[36].mxu1 %vm203_vm3, %v3293_v25 }
  0x51   :  { %2904 = vmatprep.mubr.msk.bf16.mxu0 %vm3376_vm2, %v4717_v0  ;;  %3006 = vmatprep.mubr.msk.bf16.mxu1 %vm3376_vm2, %v4717_v0 }
  0x58   :  { %2905 = vmatmul.mubr.msk.bf16.gmra.mrb[40].mxu0 %vm203_vm3, %v3294_v26  ;;  %3007 = vmatmul.mubr.msk.bf16.gmra.mrb[40].mxu1 %vm203_vm3, %v3295_v27  ;;  %v3332_v26 = vld [vmem:[%s4713_s2 + $0x20] sm:$0xff]  }
  0x59   :  { %2908 = vmatprep.mubr.msk.bf16.mxu0 %vm3376_vm2, %v4717_v0  ;;  %3010 = vmatprep.mubr.msk.bf16.mxu1 %vm3376_vm2, %v4717_v0  ;;  %v3333_v27 = vld [vmem:[%s4714_s3 + $0x20] sm:$0xff]  }
  0x60   :  { %2909 = vmatmul.mubr.msk.bf16.gmra.mrb[44].mxu0 %vm203_vm3, %v3296_v28  ;;  %3011 = vmatmul.mubr.msk.bf16.gmra.mrb[44].mxu1 %vm203_vm3, %v3297_v29 }
  0x61   :  { %2912 = vmatprep.mubr.msk.bf16.mxu0 %vm3376_vm2, %v4717_v0  ;;  %3014 = vmatprep.mubr.msk.bf16.mxu1 %vm3376_vm2, %v4717_v0 }
  0x68   :  { %2913 = vmatmul.mubr.msk.bf16.gmra.mrb[48].mxu0 %vm203_vm3, %v3298_v30  ;;  %3015 = vmatmul.mubr.msk.bf16.gmra.mrb[48].mxu1 %vm203_vm3, %v3299_v31 }
  0x69   :  { %2916 = vmatprep.mubr.msk.bf16.mxu0 %vm3376_vm2, %v4717_v0  ;;  %3018 = vmatprep.mubr.msk.bf16.mxu1 %vm3376_vm2, %v4717_v0 }
  0x70   :  { %2917 = vmatmul.mubr.msk.bf16.gmra.mrb[52].mxu0 %vm203_vm3, %v3300_v32  ;;  %3019 = vmatmul.mubr.msk.bf16.gmra.mrb[52].mxu1 %vm203_vm3, %v3301_v33 }
  0x71   :  { %2920 = vmatprep.mubr.msk.bf16.mxu0 %vm3376_vm2, %v4717_v0  ;;  %3022 = vmatprep.mubr.msk.bf16.mxu1 %vm3376_vm2, %v4717_v0 }
  0x78   :  { %2921 = vmatmul.mubr.msk.bf16.gmra.mrb[56].mxu0 %vm203_vm3, %v3302_v34  ;;  %3023 = vmatmul.mubr.msk.bf16.gmra.mrb[56].mxu1 %vm203_vm3, %v3303_v35 }
  0x79   :  { %2924 = vmatprep.mubr.msk.bf16.mxu0 %vm3376_vm2, %v4717_v0  ;;  %3026 = vmatprep.mubr.msk.bf16.mxu1 %vm3376_vm2, %v4717_v0 }
  0x80   :  { %2925 = vmatmul.mubr.msk.bf16.gmra.mrb[60].mxu0 %vm203_vm3, %v3304_v36  ;;  %3027 = vmatmul.mubr.msk.bf16.gmra.mrb[60].mxu1 %vm203_vm3, %v3305_v37 }
  0x81   :  { %2928 = vmatprep.mubr.msk.bf16.mxu0 %vm3376_vm2, %v4717_v0  ;;  %3030 = vmatprep.mubr.msk.bf16.mxu1 %vm3376_vm2, %v4717_v0 }
  0x88   :  { %2929 = vmatmul.mubr.msk.bf16.gmra.mrb[64].mxu0 %vm203_vm3, %v3306_v38  ;;  %3031 = vmatmul.mubr.msk.bf16.gmra.mrb[64].mxu1 %vm203_vm3, %v3307_v39  ;;  %v3334_v38 = vld [vmem:[%s4713_s2 + $0x28] sm:$0xff]  }
  0x89   :  { %2932 = vmatprep.mubr.msk.bf16.mxu0 %vm3376_vm2, %v4717_v0  ;;  %3034 = vmatprep.mubr.msk.bf16.mxu1 %vm3376_vm2, %v4717_v0  ;;  %v3335_v39 = vld [vmem:[%s4714_s3 + $0x28] sm:$0xff]  }
  0x90   :  { %2933 = vmatmul.mubr.msk.bf16.gmra.mrb[68].mxu0 %vm203_vm3, %v3308_v40  ;;  %3035 = vmatmul.mubr.msk.bf16.gmra.mrb[68].mxu1 %vm203_vm3, %v3309_v41 }
  0x91   :  { %2936 = vmatprep.mubr.msk.bf16.mxu0 %vm3376_vm2, %v4717_v0  ;;  %3038 = vmatprep.mubr.msk.bf16.mxu1 %vm3376_vm2, %v4717_v0 }
  0x98   :  { %2937 = vmatmul.mubr.msk.bf16.gmra.mrb[72].mxu0 %vm203_vm3, %v3310_v42  ;;  %3039 = vmatmul.mubr.msk.bf16.gmra.mrb[72].mxu1 %vm203_vm3, %v3311_v43 }
  0x99   :  { %2940 = vmatprep.mubr.msk.bf16.mxu0 %vm3376_vm2, %v4717_v0  ;;  %3042 = vmatprep.mubr.msk.bf16.mxu1 %vm3376_vm2, %v4717_v0 }
  0xa0   :  { %2941 = vmatmul.mubr.msk.bf16.gmra.mrb[76].mxu0 %vm203_vm3, %v3312_v44  ;;  %3043 = vmatmul.mubr.msk.bf16.gmra.mrb[76].mxu1 %vm203_vm3, %v3313_v45 }
  0xa1   :  { %2944 = vmatprep.mubr.msk.bf16.mxu0 %vm3376_vm2, %v4717_v0  ;;  %3046 = vmatprep.mubr.msk.bf16.mxu1 %vm3376_vm2, %v4717_v0 }
  0xa8   :  { %2945 = vmatmul.mubr.msk.bf16.gmra.mrb[80].mxu0 %vm203_vm3, %v3314_v46  ;;  %3047 = vmatmul.mubr.msk.bf16.gmra.mrb[80].mxu1 %vm203_vm3, %v3315_v47 }
  0xa9   :  { %2948 = vmatprep.mubr.msk.bf16.mxu0 %vm3376_vm2, %v4717_v0  ;;  %3050 = vmatprep.mubr.msk.bf16.mxu1 %vm3376_vm2, %v4717_v0 }
  0xb0   :  { %2949 = vmatmul.mubr.msk.bf16.gmra.mrb[84].mxu0 %vm203_vm3, %v3316_v48  ;;  %3051 = vmatmul.mubr.msk.bf16.gmra.mrb[84].mxu1 %vm203_vm3, %v3317_v49 }
  0xb1   :  { %2952 = vmatprep.mubr.msk.bf16.mxu0 %vm3376_vm2, %v4717_v0  ;;  %3054 = vmatprep.mubr.msk.bf16.mxu1 %vm3376_vm2, %v4717_v0 }
  0xb8   :  { %2953 = vmatmul.mubr.msk.bf16.gmra.mrb[88].mxu0 %vm203_vm3, %v3318_v50  ;;  %3055 = vmatmul.mubr.msk.bf16.gmra.mrb[88].mxu1 %vm203_vm3, %v3319_v51  ;;  %v3336_v50 = vld [vmem:[%s4713_s2 + $0x30] sm:$0xff]  }
  0xb9   :  { %2956 = vmatprep.mubr.msk.bf16.mxu0 %vm3376_vm2, %v4717_v0  ;;  %3058 = vmatprep.mubr.msk.bf16.mxu1 %vm3376_vm2, %v4717_v0  ;;  %v3337_v51 = vld [vmem:[%s4714_s3 + $0x30] sm:$0xff]  }
  0xc0   :  { %2957 = vmatmul.mubr.msk.bf16.gmra.mrb[92].mxu0 %vm203_vm3, %v3320_v52  ;;  %3059 = vmatmul.mubr.msk.bf16.gmra.mrb[92].mxu1 %vm203_vm3, %v3321_v53 }
  0xc1   :  { %2960 = vmatprep.mubr.msk.bf16.mxu0 %vm3376_vm2, %v4717_v0  ;;  %3062 = vmatprep.mubr.msk.bf16.mxu1 %vm3376_vm2, %v4717_v0 }
  0xc8   :  { %2961 = vmatmul.mubr.msk.bf16.gmra.mrb[96].mxu0 %vm203_vm3, %v3322_v54  ;;  %3063 = vmatmul.mubr.msk.bf16.gmra.mrb[96].mxu1 %vm203_vm3, %v3323_v55 }
  0xc9   :  { %3068 = vmatprep.mubr.msk.bf16.mxu0 %vm3376_vm2, %v4717_v0  ;;  %3170 = vmatprep.mubr.msk.bf16.mxu1 %vm3376_vm2, %v4717_v0 }
  0xd0   :  { %3069 = vmatmul.mubr.msk.bf16.vlgmr.msra.gmra.mrb[100].mxu0 %vm203_vm3, %v3324_v56  ;;  %3171 = vmatmul.mubr.msk.bf16.vlgmr.msra.gmra.mrb[100].mxu1 %vm203_vm3, %v3325_v57 }
  0xd1   :  { %3072 = vmatprep.mubr.msk.bf16.mxu0 %vm3376_vm2, %v4717_v0  ;;  %3174 = vmatprep.mubr.msk.bf16.mxu1 %vm3376_vm2, %v4717_v0 }
  0xd8   :  { %3073 = vmatmul.mubr.msk.bf16.gmra.mrb[104].mxu0 %vm203_vm3, %v3326_v58  ;;  %3175 = vmatmul.mubr.msk.bf16.gmra.mrb[104].mxu1 %vm203_vm3, %v3327_v59 }
  0xd9   :  { %3076 = vmatprep.mubr.msk.bf16.mxu0 %vm3376_vm2, %v4717_v0  ;;  %3178 = vmatprep.mubr.msk.bf16.mxu1 %vm3376_vm2, %v4717_v0 }
  0xdb   :  { %v3747_v60 = vpop.f32.mrb[0].mxu0  ;;  %v3749_v61 = vpop.f32.mrb[0].mxu1 }
  0xdc   :  { %v2866_v63 = vpop.f32.mrb[1].mxu0  ;;  %v2968_v1 = vpop.f32.mrb[1].mxu1 }
  0xdd   :  { %v3759_v4 = vpop.f32.mrb[2].mxu0  ;;  %v3761_v5 = vpop.f32.mrb[2].mxu1 }
  0xde   :  { %v2867_v7 = vpop.f32.mrb[3].mxu0  ;;  %v2969_v8 = vpop.f32.mrb[3].mxu1 }
  0xe0   :  { %3077 = vmatmul.mubr.msk.bf16.gmra.mrb[108].mxu0 %vm203_vm3, %v3328_v2  ;;  %3179 = vmatmul.mubr.msk.bf16.gmra.mrb[108].mxu1 %vm203_vm3, %v3329_v3  ;;  %v3338_v2 = vld [vmem:[%s4713_s2 + $0x38] sm:$0xff]  }
  0xe1   :  { %3080 = vmatprep.mubr.msk.bf16.mxu0 %vm3376_vm2, %v4717_v0  ;;  %3182 = vmatprep.mubr.msk.bf16.mxu1 %vm3376_vm2, %v4717_v0  ;;  %v3339_v3 = vld [vmem:[%s4714_s3 + $0x38] sm:$0xff]  }
  0xe3   :  { %v3771_v9 = vpop.f32.mrb[4].mxu0  ;;  %v3773_v10 = vpop.f32.mrb[4].mxu1 }
  0xe4   :  { %v2870_v12 = vpop.f32.mrb[5].mxu0  ;;  %v2972_v13 = vpop.f32.mrb[5].mxu1 }
  0xe5   :  { %v3783_v16 = vpop.f32.mrb[6].mxu0  ;;  %v3785_v17 = vpop.f32.mrb[6].mxu1 }
  0xe6   :  { %v2871_v19 = vpop.f32.mrb[7].mxu0  ;;  %v2973_v20 = vpop.f32.mrb[7].mxu1 }
  0xe8   :  { %3081 = vmatmul.mubr.msk.bf16.gmra.mrb[112].mxu0 %vm203_vm3, %v3330_v14  ;;  %3183 = vmatmul.mubr.msk.bf16.gmra.mrb[112].mxu1 %vm203_vm3, %v3331_v15 }
  0xe9   :  { %3084 = vmatprep.mubr.msk.bf16.mxu0 %vm3376_vm2, %v4717_v0  ;;  %3186 = vmatprep.mubr.msk.bf16.mxu1 %vm3376_vm2, %v4717_v0 }
  0xeb   :  { %v3795_v21 = vpop.f32.mrb[8].mxu0  ;;  %v3797_v22 = vpop.f32.mrb[8].mxu1 }
  0xec   :  { %v2874_v24 = vpop.f32.mrb[9].mxu0  ;;  %v2976_v25 = vpop.f32.mrb[9].mxu1 }
  0xed   :  { %v3807_v28 = vpop.f32.mrb[10].mxu0  ;;  %v3809_v29 = vpop.f32.mrb[10].mxu1 }
  0xee   :  { %v2875_v31 = vpop.f32.mrb[11].mxu0  ;;  %v2977_v32 = vpop.f32.mrb[11].mxu1 }
  0xf0   :  { %3085 = vmatmul.mubr.msk.bf16.gmra.mrb[116].mxu0 %vm203_vm3, %v3332_v26  ;;  %3187 = vmatmul.mubr.msk.bf16.gmra.mrb[116].mxu1 %vm203_vm3, %v3333_v27  ;;  %v3340_v26 = vld [vmem:[%s4713_s2 + $0x40] sm:$0xff]  }
  0xf1   :  { %3088 = vmatprep.mubr.msk.bf16.mxu0 %vm3376_vm2, %v4717_v0  ;;  %3190 = vmatprep.mubr.msk.bf16.mxu1 %vm3376_vm2, %v4717_v0  ;;  %v3341_v27 = vld [vmem:[%s4714_s3 + $0x40] sm:$0xff]  }
  0xf3   :  { %v3819_v33 = vpop.f32.mrb[12].mxu0  ;;  %v3821_v34 = vpop.f32.mrb[12].mxu1 }
  0xf4   :  { %v2878_v36 = vpop.f32.mrb[13].mxu0  ;;  %v2980_v37 = vpop.f32.mrb[13].mxu1 }
  0xf5   :  { %v3831_v40 = vpop.f32.mrb[14].mxu0  ;;  %v3833_v41 = vpop.f32.mrb[14].mxu1 }
  0xf6   :  { %v2879_v43 = vpop.f32.mrb[15].mxu0  ;;  %v2981_v44 = vpop.f32.mrb[15].mxu1 }
  0xf8   :  { %3089 = vmatmul.mubr.msk.bf16.gmra.mrb[120].mxu0 %vm203_vm3, %v3334_v38  ;;  %3191 = vmatmul.mubr.msk.bf16.gmra.mrb[120].mxu1 %vm203_vm3, %v3335_v39 }
  0xf9   :  { %3092 = vmatprep.mubr.msk.bf16.mxu0 %vm3376_vm2, %v4717_v0  ;;  %3194 = vmatprep.mubr.msk.bf16.mxu1 %vm3376_vm2, %v4717_v0 }
  0xfb   :  { %v3843_v45 = vpop.f32.mrb[16].mxu0  ;;  %v3845_v46 = vpop.f32.mrb[16].mxu1 }
  0xfc   :  { %v2882_v48 = vpop.f32.mrb[17].mxu0  ;;  %v2984_v49 = vpop.f32.mrb[17].mxu1 }
  0xfd   :  { %v3855_v52 = vpop.f32.mrb[18].mxu0  ;;  %v3857_v53 = vpop.f32.mrb[18].mxu1 }
  0xfe   :  { %v2883_v55 = vpop.f32.mrb[19].mxu0  ;;  %v2985_v56 = vpop.f32.mrb[19].mxu1 }
 0x100   :  { %3093 = vmatmul.mubr.msk.bf16.gmra.mrb[124].mxu0 %vm203_vm3, %v3336_v50  ;;  %3195 = vmatmul.mubr.msk.bf16.gmra.mrb[124].mxu1 %vm203_vm3, %v3337_v51  ;;  %v3342_v50 = vld [vmem:[%s4713_s2 + $0x48] sm:$0xff]  }
 0x101   :  { %3096 = vmatprep.mubr.msk.bf16.mxu0 %vm3376_vm2, %v4717_v0  ;;  %3198 = vmatprep.mubr.msk.bf16.mxu1 %vm3376_vm2, %v4717_v0  ;;  %v3343_v51 = vld [vmem:[%s4714_s3 + $0x48] sm:$0xff]  }
 0x103   :  { %v3867_v57 = vpop.f32.mrb[20].mxu0  ;;  %v3869_v58 = vpop.f32.mrb[20].mxu1 }
 0x104   :  { %v2886_v63 = vpop.f32.mrb[21].mxu0  ;;  %v2988_v1 = vpop.f32.mrb[21].mxu1 }
 0x105   :  { %v3879_v7 = vpop.f32.mrb[22].mxu0  ;;  %v3881_v8 = vpop.f32.mrb[22].mxu1 }
 0x106   :  { %v2887_v13 = vpop.f32.mrb[23].mxu0  ;;  %v2989_v14 = vpop.f32.mrb[23].mxu1 }
 0x108   :  { %3097 = vmatmul.mubr.msk.bf16.gmra.mrb[128].mxu0 %vm203_vm3, %v3338_v2  ;;  %3199 = vmatmul.mubr.msk.bf16.gmra.mrb[128].mxu1 %vm203_vm3, %v3339_v3 }
 0x109   :  { %3100 = vmatprep.mubr.msk.bf16.mxu0 %vm3376_vm2, %v4717_v0  ;;  %3202 = vmatprep.mubr.msk.bf16.mxu1 %vm3376_vm2, %v4717_v0 }
 0x10b   :  { %v3891_v15 = vpop.f32.mrb[24].mxu0  ;;  %v3893_v19 = vpop.f32.mrb[24].mxu1 }
 0x10c   :  { %v2890_v24 = vpop.f32.mrb[25].mxu0  ;;  %v2992_v25 = vpop.f32.mrb[25].mxu1 }
 0x10d   :  { %v3903_v31 = vpop.f32.mrb[26].mxu0  ;;  %v3905_v32 = vpop.f32.mrb[26].mxu1 }
 0x10e   :  { %v2891_v37 = vpop.f32.mrb[27].mxu0  ;;  %v2993_v38 = vpop.f32.mrb[27].mxu1 }
 0x110   :  { %3101 = vmatmul.mubr.msk.bf16.gmra.mrb[132].mxu0 %vm203_vm3, %v3340_v26  ;;  %3203 = vmatmul.mubr.msk.bf16.gmra.mrb[132].mxu1 %vm203_vm3, %v3341_v27  ;;  %v3344_v26 = vld [vmem:[%s4713_s2 + $0x50] sm:$0xff]  }
 0x111   :  { %3104 = vmatprep.mubr.msk.bf16.mxu0 %vm3376_vm2, %v4717_v0  ;;  %3206 = vmatprep.mubr.msk.bf16.mxu1 %vm3376_vm2, %v4717_v0  ;;  %v3345_v27 = vld [vmem:[%s4714_s3 + $0x50] sm:$0xff]  }
 0x113   :  { %v3915_v39 = vpop.f32.mrb[28].mxu0  ;;  %v3917_v43 = vpop.f32.mrb[28].mxu1 }
 0x114   :  { %v2894_v48 = vpop.f32.mrb[29].mxu0  ;;  %v2996_v49 = vpop.f32.mrb[29].mxu1 }
 0x115   :  { %v3927_v55 = vpop.f32.mrb[30].mxu0  ;;  %v3929_v56 = vpop.f32.mrb[30].mxu1 }
 0x116   :  { %v2895_v1 = vpop.f32.mrb[31].mxu0  ;;  %v2997_v2 = vpop.f32.mrb[31].mxu1 }
 0x118   :  { %3105 = vmatmul.mubr.msk.bf16.gmra.mrb[136].mxu0 %vm203_vm3, %v3342_v50  ;;  %3207 = vmatmul.mubr.msk.bf16.gmra.mrb[136].mxu1 %vm203_vm3, %v3343_v51 }
 0x119   :  { %3108 = vmatprep.mubr.msk.bf16.mxu0 %vm3376_vm2, %v4717_v0  ;;  %3210 = vmatprep.mubr.msk.bf16.mxu1 %vm3376_vm2, %v4717_v0 }
 0x11b   :  { %v3939_v3 = vpop.f32.mrb[32].mxu0  ;;  %v3941_v13 = vpop.f32.mrb[32].mxu1 }
 0x11c   :  { %v2898_v24 = vpop.f32.mrb[33].mxu0  ;;  %v3000_v25 = vpop.f32.mrb[33].mxu1 }
 0x11d   :  { %v3951_v37 = vpop.f32.mrb[34].mxu0  ;;  %v3953_v38 = vpop.f32.mrb[34].mxu1 }
 0x11e   :  { %v2899_v49 = vpop.f32.mrb[35].mxu0  ;;  %v3001_v50 = vpop.f32.mrb[35].mxu1 }
 0x120   :  { %3109 = vmatmul.mubr.msk.bf16.gmra.mrb[140].mxu0 %vm203_vm3, %v3344_v26  ;;  %3211 = vmatmul.mubr.msk.bf16.gmra.mrb[140].mxu1 %vm203_vm3, %v3345_v27  ;;  %v3346_v26 = vld [vmem:[%s4713_s2 + $0x58] sm:$0xff]  }
 0x121   :  { %3112 = vmatprep.mubr.msk.bf16.mxu0 %vm3376_vm2, %v4717_v0  ;;  %3214 = vmatprep.mubr.msk.bf16.mxu1 %vm3376_vm2, %v4717_v0  ;;  %v3347_v27 = vld [vmem:[%s4714_s3 + $0x58] sm:$0xff]  }
 0x123   :  { %v3963_v51 = vpop.f32.mrb[36].mxu0  ;;  %v3965_v1 = vpop.f32.mrb[36].mxu1 }
 0x124   :  { %v2902_v24 = vpop.f32.mrb[37].mxu0  ;;  %v3004_v25 = vpop.f32.mrb[37].mxu1 }
 0x125   :  { %v3975_v49 = vpop.f32.mrb[38].mxu0  ;;  %v3977_v50 = vpop.f32.mrb[38].mxu1 }
 0x126   :  { %v2903_v14 = vpop.f32.mrb[39].mxu0  ;;  %v3005_v63 = vpop.f32.mrb[39].mxu1 }
 0x127   :  { %v3348_v63 = vld [vmem:[%s4713_s2 + $0x60] sm:$0xff]  }
 0x128   :  { %3113 = vmatmul.mubr.msk.bf16.gmra.mrb[144].mxu0 %vm203_vm3, %v3346_v26  ;;  %3215 = vmatmul.mubr.msk.bf16.gmra.mrb[144].mxu1 %vm203_vm3, %v3347_v27  ;;  %v3349_v26 = vld [vmem:[%s4714_s3 + $0x60] sm:$0xff]  }
 0x129   :  { %3116 = vmatprep.mubr.msk.bf16.mxu0 %vm3376_vm2, %v4717_v0  ;;  %3218 = vmatprep.mubr.msk.bf16.mxu1 %vm3376_vm2, %v4717_v0 }
 0x12b   :  { %v3987_v24 = vpop.f32.mrb[40].mxu0  ;;  %v3989_v25 = vpop.f32.mrb[40].mxu1 }
 0x12c   :  { %v2906_v48 = vpop.f32.mrb[41].mxu0  ;;  %v3008_v14 = vpop.f32.mrb[41].mxu1 }
 0x12d   :  { %v3999_v27 = vpop.f32.mrb[42].mxu0  ;;  %v4001_v44 = vpop.f32.mrb[42].mxu1 }
 0x12e   :  { %v2907_v20 = vpop.f32.mrb[43].mxu0  ;;  %v3009_v12 = vpop.f32.mrb[43].mxu1 }
 0x12f   :  { %v3350_v12 = vld [vmem:[%s4713_s2 + $0x68] sm:$0xff]  }
 0x130   :  { %3117 = vmatmul.mubr.msk.bf16.gmra.mrb[148].mxu0 %vm203_vm3, %v3348_v63  ;;  %3219 = vmatmul.mubr.msk.bf16.gmra.mrb[148].mxu1 %vm203_vm3, %v3349_v26  ;;  %v3351_v63 = vld [vmem:[%s4714_s3 + $0x68] sm:$0xff]  }
 0x131   :  { %3120 = vmatprep.mubr.msk.bf16.mxu0 %vm3376_vm2, %v4717_v0  ;;  %3222 = vmatprep.mubr.msk.bf16.mxu1 %vm3376_vm2, %v4717_v0 }
 0x133   :  { %v4011_v48 = vpop.f32.mrb[44].mxu0  ;;  %v4013_v14 = vpop.f32.mrb[44].mxu1 }
 0x134   :  { %4772 = vst [vmem:[#allocation2_spill] sm:$0xff] %v4013_v14  ;;  %v2910_v36 = vpop.f32.mrb[45].mxu0  ;;  %v3012_v20 = vpop.f32.mrb[45].mxu1 }
 0x135   :  { %v4023_v26 = vpop.f32.mrb[46].mxu0  ;;  %v4025_v59 = vpop.f32.mrb[46].mxu1 }
 0x136   :  { %4773 = vst [vmem:[#allocation3_spill] sm:$0xff] %v4023_v26  ;;  %4774 = vst [vmem:[#allocation4_spill] sm:$0xff] %v4025_v59  ;;  %v2911_v47 = vpop.f32.mrb[47].mxu0  ;;  %v3013_v42 = vpop.f32.mrb[47].mxu1 }
 0x137   :  { %v3352_v42 = vld [vmem:[%s4713_s2 + $0x70] sm:$0xff]  }
 0x138   :  { %3121 = vmatmul.mubr.msk.bf16.gmra.mrb[152].mxu0 %vm203_vm3, %v3350_v12  ;;  %3223 = vmatmul.mubr.msk.bf16.gmra.mrb[152].mxu1 %vm203_vm3, %v3351_v63  ;;  %v3353_v12 = vld [vmem:[%s4714_s3 + $0x70] sm:$0xff]  }
 0x139   :  { %3124 = vmatprep.mubr.msk.bf16.mxu0 %vm3376_vm2, %v4717_v0  ;;  %3226 = vmatprep.mubr.msk.bf16.mxu1 %vm3376_vm2, %v4717_v0 }
 0x13b   :  { %v4035_v36 = vpop.f32.mrb[48].mxu0  ;;  %v4037_v20 = vpop.f32.mrb[48].mxu1 }
 0x13c   :  { %4775 = vst [vmem:[#allocation5_spill] sm:$0xff] %v4035_v36  ;;  %4776 = vst [vmem:[#allocation6_spill] sm:$0xff] %v4037_v20  ;;  %v2914_v54 = vpop.f32.mrb[49].mxu0  ;;  %v3016_v47 = vpop.f32.mrb[49].mxu1 }
 0x13d   :  { %v4047_v63 = vpop.f32.mrb[50].mxu0  ;;  %v4049_v35 = vpop.f32.mrb[50].mxu1 }
 0x13e   :  { %4777 = vst [vmem:[#allocation7_spill] sm:$0xff] %v4047_v63  ;;  %4778 = vst [vmem:[#allocation8_spill] sm:$0xff] %v4049_v35  ;;  %v2915_v23 = vpop.f32.mrb[51].mxu0  ;;  %v3017_v18 = vpop.f32.mrb[51].mxu1 }
 0x13f   :  { %v3354_v18 = vld [vmem:[%s4713_s2 + $0x78] sm:$0xff]  }
 0x140   :  { %3125 = vmatmul.mubr.msk.bf16.gmra.mrb[156].mxu0 %vm203_vm3, %v3352_v42  ;;  %3227 = vmatmul.mubr.msk.bf16.gmra.mrb[156].mxu1 %vm203_vm3, %v3353_v12  ;;  %v3355_v42 = vld [vmem:[%s4714_s3 + $0x78] sm:$0xff]  }
 0x141   :  { %3128 = vmatprep.mubr.msk.bf16.mxu0 %vm3376_vm2, %v4717_v0  ;;  %3230 = vmatprep.mubr.msk.bf16.mxu1 %vm3376_vm2, %v4717_v0 }
 0x143   :  { %v4059_v54 = vpop.f32.mrb[52].mxu0  ;;  %v4061_v47 = vpop.f32.mrb[52].mxu1 }
 0x144   :  { %4779 = vst [vmem:[#allocation9_spill] sm:$0xff] %v4059_v54  ;;  %4780 = vst [vmem:[#allocation10_spill] sm:$0xff] %v4061_v47  ;;  %v2918_v30 = vpop.f32.mrb[53].mxu0  ;;  %v3020_v23 = vpop.f32.mrb[53].mxu1 }
 0x145   :  { %v4071_v12 = vpop.f32.mrb[54].mxu0  ;;  %v4073_v11 = vpop.f32.mrb[54].mxu1  ;;  %v4783_v30 = vmov 0.0  }
 0x146   :  { %4781 = vst [vmem:[#allocation11_spill] sm:$0xff] %v4071_v12  ;;  %4782 = vst [vmem:[#allocation12_spill] sm:$0xff] %v4073_v11  ;;  %v2919_v62 = vpop.f32.mrb[55].mxu0  ;;  %v3021_v0 = vpop.f32.mrb[55].mxu1 }
 0x147   :  { %v3356_v0 = vld [vmem:[%s4713_s2 + $0x80] sm:$0xff]  }
 0x148   :  { %3129 = vmatmul.mubr.msk.bf16.gmra.mrb[160].mxu0 %vm203_vm3, %v3354_v18  ;;  %3231 = vmatmul.mubr.msk.bf16.gmra.mrb[160].mxu1 %vm203_vm3, %v3355_v42  ;;  %v3357_v18 = vld [vmem:[%s4714_s3 + $0x80] sm:$0xff]  }
 0x149   :  { %3132 = vmatprep.mubr.msk.bf16.mxu0 %vm3376_vm2, %v4783_v30  ;;  %3234 = vmatprep.mubr.msk.bf16.mxu1 %vm3376_vm2, %v4783_v30 }
 0x14b   :  { %v4083_v23 = vpop.f32.mrb[56].mxu0  ;;  %v4085_v2 = vpop.f32.mrb[56].mxu1 }
 0x14c   :  { %4784 = vst [vmem:[#allocation13_spill] sm:$0xff] %v4083_v23  ;;  %4785 = vst [vmem:[#allocation14_spill] sm:$0xff] %v4085_v2  ;;  %v2922_v6 = vpop.f32.mrb[57].mxu0  ;;  %v3024_v62 = vpop.f32.mrb[57].mxu1 }
 0x14d   :  { %v4095_v42 = vpop.f32.mrb[58].mxu0  ;;  %v4097_v11 = vpop.f32.mrb[58].mxu1 }
 0x14e   :  { %4786 = vst [vmem:[#allocation15_spill] sm:$0xff] %v4095_v42  ;;  %4787 = vst [vmem:[#allocation16_spill] sm:$0xff] %v4097_v11  ;;  %v2923_v54 = vpop.f32.mrb[59].mxu0  ;;  %v3025_v35 = vpop.f32.mrb[59].mxu1 }
 0x14f   :  { %v3358_v35 = vld [vmem:[%s4713_s2 + $0x88] sm:$0xff]  }
 0x150   :  { %3133 = vmatmul.mubr.msk.bf16.gmra.mrb[164].mxu0 %vm203_vm3, %v3356_v0  ;;  %3235 = vmatmul.mubr.msk.bf16.gmra.mrb[164].mxu1 %vm203_vm3, %v3357_v18  ;;  %v3359_v0 = vld [vmem:[%s4714_s3 + $0x88] sm:$0xff]  }
 0x151   :  { %3136 = vmatprep.mubr.msk.bf16.mxu0 %vm3376_vm2, %v4783_v30  ;;  %3238 = vmatprep.mubr.msk.bf16.mxu1 %vm3376_vm2, %v4783_v30 }
 0x153   :  { %v4107_v6 = vpop.f32.mrb[60].mxu0  ;;  %v4109_v62 = vpop.f32.mrb[60].mxu1 }
 0x154   :  { %4788 = vst [vmem:[#allocation17_spill] sm:$0xff] %v4107_v6  ;;  %4789 = vst [vmem:[#allocation18_spill] sm:$0xff] %v4109_v62  ;;  %v2926_v12 = vpop.f32.mrb[61].mxu0  ;;  %v3028_v54 = vpop.f32.mrb[61].mxu1 }
 0x155   :  { %v4119_v18 = vpop.f32.mrb[62].mxu0  ;;  %v4121_v11 = vpop.f32.mrb[62].mxu1 }
 0x156   :  { %4790 = vst [vmem:[#allocation19_spill] sm:$0xff] %v4119_v18  ;;  %4791 = vst [vmem:[#allocation20_spill] sm:$0xff] %v4121_v11  ;;  %v2927_v2 = vpop.f32.mrb[63].mxu0  ;;  %v3029_v23 = vpop.f32.mrb[63].mxu1 }
 0x157   :  { %v3360_v23 = vld [vmem:[%s4713_s2 + $0x90] sm:$0xff]  }
 0x158   :  { %3137 = vmatmul.mubr.msk.bf16.gmra.mrb[168].mxu0 %vm203_vm3, %v3358_v35  ;;  %3239 = vmatmul.mubr.msk.bf16.gmra.mrb[168].mxu1 %vm203_vm3, %v3359_v0  ;;  %v3361_v35 = vld [vmem:[%s4714_s3 + $0x90] sm:$0xff]  }
 0x159   :  { %3140 = vmatprep.mubr.msk.bf16.mxu0 %vm3376_vm2, %v4783_v30  ;;  %3242 = vmatprep.mubr.msk.bf16.mxu1 %vm3376_vm2, %v4783_v30 }
 0x15b   :  { %v4131_v12 = vpop.f32.mrb[64].mxu0  ;;  %v4133_v54 = vpop.f32.mrb[64].mxu1 }
 0x15c   :  { %4792 = vst [vmem:[#allocation21_spill] sm:$0xff] %v4131_v12  ;;  %4793 = vst [vmem:[#allocation22_spill] sm:$0xff] %v4133_v54  ;;  %v2930_v42 = vpop.f32.mrb[65].mxu0  ;;  %v3032_v2 = vpop.f32.mrb[65].mxu1 }
 0x15d   :  { %v4143_v0 = vpop.f32.mrb[66].mxu0  ;;  %v4145_v11 = vpop.f32.mrb[66].mxu1 }
 0x15e   :  { %4794 = vst [vmem:[#allocation23_spill] sm:$0xff] %v4143_v0  ;;  %4795 = vst [vmem:[#allocation24_spill] sm:$0xff] %v4145_v11  ;;  %v2931_v62 = vpop.f32.mrb[67].mxu0  ;;  %v3033_v6 = vpop.f32.mrb[67].mxu1 }
 0x15f   :  { %v3362_v6 = vld [vmem:[%s4713_s2 + $0x98] sm:$0xff]  }
 0x160   :  { %3141 = vmatmul.mubr.msk.bf16.gmra.mrb[172].mxu0 %vm203_vm3, %v3360_v23  ;;  %3243 = vmatmul.mubr.msk.bf16.gmra.mrb[172].mxu1 %vm203_vm3, %v3361_v35  ;;  %v3363_v23 = vld [vmem:[%s4714_s3 + $0x98] sm:$0xff]  }
 0x161   :  { %3144 = vmatprep.mubr.msk.bf16.mxu0 %vm3376_vm2, %v4783_v30  ;;  %3246 = vmatprep.mubr.msk.bf16.mxu1 %vm3376_vm2, %v4783_v30 }
 0x163   :  { %v4155_v42 = vpop.f32.mrb[68].mxu0  ;;  %v4157_v2 = vpop.f32.mrb[68].mxu1 }
 0x164   :  { %4796 = vst [vmem:[#allocation25_spill] sm:$0xff] %v4155_v42  ;;  %4797 = vst [vmem:[#allocation26_spill] sm:$0xff] %v4157_v2  ;;  %v2934_v18 = vpop.f32.mrb[69].mxu0  ;;  %v3036_v62 = vpop.f32.mrb[69].mxu1 }
 0x165   :  { %v4167_v35 = vpop.f32.mrb[70].mxu0  ;;  %v4169_v11 = vpop.f32.mrb[70].mxu1 }
 0x166   :  { %4798 = vst [vmem:[#allocation27_spill] sm:$0xff] %v4167_v35  ;;  %4799 = vst [vmem:[#allocation28_spill] sm:$0xff] %v4169_v11  ;;  %v2935_v54 = vpop.f32.mrb[71].mxu0  ;;  %v3037_v12 = vpop.f32.mrb[71].mxu1 }
 0x167   :  { %v3364_v12 = vld [vmem:[%s4713_s2 + $0xa0] sm:$0xff]  }
 0x168   :  { %3145 = vmatmul.mubr.msk.bf16.gmra.mrb[176].mxu0 %vm203_vm3, %v3362_v6  ;;  %3247 = vmatmul.mubr.msk.bf16.gmra.mrb[176].mxu1 %vm203_vm3, %v3363_v23  ;;  %v3365_v6 = vld [vmem:[%s4714_s3 + $0xa0] sm:$0xff]  }
 0x169   :  { %3148 = vmatprep.mubr.msk.bf16.mxu0 %vm3376_vm2, %v4783_v30  ;;  %3250 = vmatprep.mubr.msk.bf16.mxu1 %vm3376_vm2, %v4783_v30 }
 0x16b   :  { %v4179_v18 = vpop.f32.mrb[72].mxu0  ;;  %v4181_v62 = vpop.f32.mrb[72].mxu1 }
 0x16c   :  { %4800 = vst [vmem:[#allocation29_spill] sm:$0xff] %v4179_v18  ;;  %4801 = vst [vmem:[#allocation30_spill] sm:$0xff] %v4181_v62  ;;  %v2938_v0 = vpop.f32.mrb[73].mxu0  ;;  %v3040_v54 = vpop.f32.mrb[73].mxu1 }
 0x16d   :  { %v4191_v23 = vpop.f32.mrb[74].mxu0  ;;  %v4193_v11 = vpop.f32.mrb[74].mxu1 }
 0x16e   :  { %4802 = vst [vmem:[#allocation31_spill] sm:$0xff] %v4191_v23  ;;  %4803 = vst [vmem:[#allocation32_spill] sm:$0xff] %v4193_v11  ;;  %v2939_v2 = vpop.f32.mrb[75].mxu0  ;;  %v3041_v42 = vpop.f32.mrb[75].mxu1 }
 0x16f   :  { %v3366_v42 = vld [vmem:[%s4713_s2 + $0xa8] sm:$0xff]  }
 0x170   :  { %3149 = vmatmul.mubr.msk.bf16.gmra.mrb[180].mxu0 %vm203_vm3, %v3364_v12  ;;  %3251 = vmatmul.mubr.msk.bf16.gmra.mrb[180].mxu1 %vm203_vm3, %v3365_v6  ;;  %v3367_v12 = vld [vmem:[%s4714_s3 + $0xa8] sm:$0xff]  }
 0x171   :  { %3152 = vmatprep.mubr.msk.bf16.mxu0 %vm3376_vm2, %v4783_v30  ;;  %3254 = vmatprep.mubr.msk.bf16.mxu1 %vm3376_vm2, %v4783_v30 }
 0x173   :  { %v4203_v0 = vpop.f32.mrb[76].mxu0  ;;  %v4205_v54 = vpop.f32.mrb[76].mxu1 }
 0x174   :  { %4804 = vst [vmem:[#allocation33_spill] sm:$0xff] %v4203_v0  ;;  %4805 = vst [vmem:[#allocation34_spill] sm:$0xff] %v4205_v54  ;;  %v2942_v35 = vpop.f32.mrb[77].mxu0  ;;  %v3044_v2 = vpop.f32.mrb[77].mxu1 }
 0x175   :  { %v4215_v6 = vpop.f32.mrb[78].mxu0  ;;  %v4217_v11 = vpop.f32.mrb[78].mxu1 }
 0x176   :  { %4806 = vst [vmem:[#allocation35_spill] sm:$0xff] %v4215_v6  ;;  %4807 = vst [vmem:[#allocation36_spill] sm:$0xff] %v4217_v11  ;;  %v2943_v62 = vpop.f32.mrb[79].mxu0  ;;  %v3045_v18 = vpop.f32.mrb[79].mxu1 }
 0x177   :  { %v3368_v18 = vld [vmem:[%s4713_s2 + $0xb0] sm:$0xff]  }
 0x178   :  { %3153 = vmatmul.mubr.msk.bf16.gmra.mrb[184].mxu0 %vm203_vm3, %v3366_v42  ;;  %3255 = vmatmul.mubr.msk.bf16.gmra.mrb[184].mxu1 %vm203_vm3, %v3367_v12  ;;  %v3369_v42 = vld [vmem:[%s4714_s3 + $0xb0] sm:$0xff]  }
 0x179   :  { %3156 = vmatprep.mubr.msk.bf16.mxu0 %vm3376_vm2, %v4783_v30  ;;  %3258 = vmatprep.mubr.msk.bf16.mxu1 %vm3376_vm2, %v4783_v30 }
 0x17b   :  { %v4227_v35 = vpop.f32.mrb[80].mxu0  ;;  %v4229_v2 = vpop.f32.mrb[80].mxu1 }
 0x17c   :  { %4808 = vst [vmem:[#allocation37_spill] sm:$0xff] %v4227_v35  ;;  %4809 = vst [vmem:[#allocation38_spill] sm:$0xff] %v4229_v2  ;;  %v2946_v23 = vpop.f32.mrb[81].mxu0  ;;  %v3048_v62 = vpop.f32.mrb[81].mxu1 }
 0x17d   :  { %v4239_v12 = vpop.f32.mrb[82].mxu0  ;;  %v4241_v11 = vpop.f32.mrb[82].mxu1 }
 0x17e   :  { %4810 = vst [vmem:[#allocation39_spill] sm:$0xff] %v4239_v12  ;;  %4811 = vst [vmem:[#allocation40_spill] sm:$0xff] %v4241_v11  ;;  %v2947_v54 = vpop.f32.mrb[83].mxu0  ;;  %v3049_v0 = vpop.f32.mrb[83].mxu1 }
 0x17f   :  { %v3370_v0 = vld [vmem:[%s4713_s2 + $0xb8] sm:$0xff]  }
 0x180   :  { %3157 = vmatmul.mubr.msk.bf16.gmra.mrb[188].mxu0 %vm203_vm3, %v3368_v18  ;;  %3259 = vmatmul.mubr.msk.bf16.gmra.mrb[188].mxu1 %vm203_vm3, %v3369_v42  ;;  %v3371_v18 = vld [vmem:[%s4714_s3 + $0xb8] sm:$0xff]  }
 0x181   :  { %3160 = vmatprep.mubr.msk.bf16.mxu0 %vm3376_vm2, %v4783_v30  ;;  %3262 = vmatprep.mubr.msk.bf16.mxu1 %vm3376_vm2, %v4783_v30 }
 0x183   :  { %v4251_v23 = vpop.f32.mrb[84].mxu0  ;;  %v4253_v62 = vpop.f32.mrb[84].mxu1 }
 0x184   :  { %4812 = vst [vmem:[#allocation41_spill] sm:$0xff] %v4251_v23  ;;  %4813 = vst [vmem:[#allocation42_spill] sm:$0xff] %v4253_v62  ;;  %v2950_v6 = vpop.f32.mrb[85].mxu0  ;;  %v3052_v54 = vpop.f32.mrb[85].mxu1 }
 0x185   :  { %v4263_v42 = vpop.f32.mrb[86].mxu0  ;;  %v4265_v11 = vpop.f32.mrb[86].mxu1 }
 0x186   :  { %4814 = vst [vmem:[#allocation43_spill] sm:$0xff] %v4263_v42  ;;  %4815 = vst [vmem:[#allocation44_spill] sm:$0xff] %v4265_v11  ;;  %v2951_v2 = vpop.f32.mrb[87].mxu0  ;;  %v3053_v35 = vpop.f32.mrb[87].mxu1 }
 0x187   :  { %v3372_v35 = vld [vmem:[%s4713_s2 + $0xc0] ss:$0 sps:$4 sm:$0xff]  }
 0x188   :  { %3161 = vmatmul.mubr.msk.bf16.gmra.mrb[192].mxu0 %vm203_vm3, %v3370_v0  ;;  %3263 = vmatmul.mubr.msk.bf16.gmra.mrb[192].mxu1 %vm203_vm3, %v3371_v18  ;;  %v3373_v0 = vld [vmem:[%s4714_s3 + $0xc0] ss:$0 sps:$4 sm:$0xff]  }
 0x189   :  { %3164 = vmatprep.mubr.msk.bf16.mxu0 %vm3376_vm2, %v4783_v30  ;;  %3266 = vmatprep.mubr.msk.bf16.mxu1 %vm3376_vm2, %v4783_v30 }
 0x18b   :  { %v4275_v6 = vpop.f32.mrb[88].mxu0  ;;  %v4277_v54 = vpop.f32.mrb[88].mxu1 }
 0x18c   :  { %4816 = vst [vmem:[#allocation45_spill] sm:$0xff] %v4275_v6  ;;  %4817 = vst [vmem:[#allocation46_spill] sm:$0xff] %v4277_v54  ;;  %v2954_v12 = vpop.f32.mrb[89].mxu0  ;;  %v3056_v2 = vpop.f32.mrb[89].mxu1 }
 0x18d   :  { %v4287_v18 = vpop.f32.mrb[90].mxu0  ;;  %v4289_v30 = vpop.f32.mrb[90].mxu1 }
 0x18e   :  { %4818 = vst [vmem:[#allocation47_spill] sm:$0xff] %v4287_v18  ;;  %4819 = vst [vmem:[#allocation48_spill] sm:$0xff] %v4289_v30  ;;  %v2955_v42 = vpop.f32.mrb[91].mxu0  ;;  %v3057_v62 = vpop.f32.mrb[91].mxu1 }
 0x190   :  { %3165 = vmatmul.mubr.msk.bf16.gmra.mrb[196].mxu0 %vm203_vm3, %v3372_v35  ;;  %3267 = vmatmul.mubr.msk.bf16.gmra.mrb[196].mxu1 %vm203_vm3, %v3373_v0 }
 0x193   :  { %v4295_v12 = vpop.f32.mrb[92].mxu0  ;;  %v4297_v2 = vpop.f32.mrb[92].mxu1 }
 0x194   :  { %4820 = vst [vmem:[#allocation49_spill] sm:$0xff] %v4295_v12  ;;  %4821 = vst [vmem:[#allocation50_spill] sm:$0xff] %v4297_v2  ;;  %v2958_v54 = vpop.f32.mrb[93].mxu0  ;;  %v3060_v6 = vpop.f32.mrb[93].mxu1 }
 0x195   :  { %v4301_v23 = vpop.f32.mrb[94].mxu0  ;;  %v4303_v63 = vpop.f32.mrb[94].mxu1 }
 0x196   :  { %4822 = vst [vmem:[#allocation51_spill] sm:$0xff] %v4301_v23  ;;  %4823 = vst [vmem:[#allocation52_spill] sm:$0xff] %v4303_v63  ;;  %v2959_v42 = vpop.f32.mrb[95].mxu0  ;;  %v3061_v35 = vpop.f32.mrb[95].mxu1 }
 0x197   :  { %v4316_v42 = vld [vmem:[%s4715_s5] ss:$0 sm:$0xff] }
 0x19b   :  { %v4307_v11 = vpop.f32.mrb[96].mxu0  ;;  %v4309_v0 = vpop.f32.mrb[96].mxu1 }
 0x19c   :  { %4824 = vst [vmem:[#allocation53_spill] sm:$0xff] %v4307_v11  ;;  %4825 = vst [vmem:[#allocation54_spill] sm:$0xff] %v4309_v0  ;;  %v2962_v18 = vpop.f32.mrb[97].mxu0  ;;  %v3064_v47 = vpop.f32.mrb[97].mxu1 }
 0x19d   :  { %v515_v54 = vpop.f32.mrb[98].mxu0  ;;  %v994_v6 = vpop.f32.mrb[98].mxu1  ;;  %v4826_v18 = vmax.f32 %v3747_v60, %v3749_v61 }
 0x19e   :  { %v2963_v2 = vpop.f32.mrb[99].mxu0  ;;  %v3065_v12 = vpop.f32.mrb[99].mxu1 }
 0x1a3   :  { %v1327_v20 = vpop.f32.mrb[100].mxu0  ;;  %v1806_v36 = vpop.f32.mrb[100].mxu1 }
 0x1a4   :  { %v2004_v59 = vmax.f32 %v1327_v20, %v1806_v36  ;;  %v3070_v26 = vpop.f32.mrb[101].mxu0  ;;  %v3172_v62 = vpop.f32.mrb[101].mxu1 }
 0x1a5   :  { %v1330_v35 = vpop.f32.mrb[102].mxu0  ;;  %v1809_v63 = vpop.f32.mrb[102].mxu1  ;;  %v4827_v26 = vmax.f32 %v3759_v4, %v3761_v5  ;;  %v4828_v5 = vmax.f32 %v3771_v9, %v3773_v10 }
 0x1a6   :  { %v2053_v47 = vmax.f32 %v4826_v18, %v2004_v59  ;;  %v2005_v54 = vmax.f32 %v1330_v35, %v1809_v63  ;;  %v3071_v6 = vpop.f32.mrb[103].mxu0  ;;  %v3173_v2 = vpop.f32.mrb[103].mxu1 }
 0x1a8   :  { %v2109_v12 = vadd.f32 %v4316_v42, %v2053_v47  ;;  %v2054_v36 = vmax.f32 %v4827_v26, %v2005_v54 }
 0x1aa   :  { %v2158_v20 = vmax.f32 %v2109_v12, 0.0  ;;  %v2110_v62 = vadd.f32 %v4316_v42, %v2054_v36 }
 0x1ab   :  { %v1335_v30 = vpop.f32.mrb[104].mxu0  ;;  %v1814_v0 = vpop.f32.mrb[104].mxu1 }
 0x1ac   :  { %v2709_v11 = vpack.c.bf16 %v2158_v20, %v2158_v20  ;;  %v2159_v23 = vmax.f32 %v2110_v62, 0.0  ;;  %v2006_v14 = vmax.f32 %v1335_v30, %v1814_v0  ;;  %v3074_v60 = vpop.f32.mrb[105].mxu0  ;;  %v3176_v61 = vpop.f32.mrb[105].mxu1  ;;  %v4829_v0 = vmax.f32 %v3783_v16, %v3785_v17 }
 0x1ad   :  { %v1338_v59 = vpop.f32.mrb[106].mxu0  ;;  %v1817_v63 = vpop.f32.mrb[106].mxu1  ;;  %v4830_v16 = vmax.f32 %v3795_v21, %v3797_v22 }
 0x1ae   :  { %2405 = vst.msk [vmem:[%s4716_s6] sm:$0xf] %vm2404_vm4, %v2709_v11  ;;  %v2710_v4 = vpack.c.bf16 %v2159_v23, %v2159_v23  ;;  %v2055_v35 = vmax.f32 %v4828_v5, %v2006_v14  ;;  %v2007_v18 = vmax.f32 %v1338_v59, %v1817_v63  ;;  %v3075_v47 = vpop.f32.mrb[107].mxu0  ;;  %v3177_v54 = vpop.f32.mrb[107].mxu1  ;;  %v4831_v5 = vmax.f32 %v3807_v28, %v3809_v29 }
 0x1af   :  { %v4832_v28 = vmax.f32 %v3819_v33, %v3821_v34 }
 0x1b0   :  { %2406 = vst.msk [vmem:[%s4716_s6 + $0x4] sm:$0xf] %vm2404_vm4, %v2710_v4  ;;  %v2111_v30 = vadd.f32 %v4316_v42, %v2055_v35  ;;  %v2056_v6 = vmax.f32 %v4829_v0, %v2007_v18 }
 0x1b2   :  { %v2160_v11 = vmax.f32 %v2111_v30, 0.0  ;;  %v2112_v23 = vadd.f32 %v4316_v42, %v2056_v6 }
 0x1b3   :  { %v1343_v2 = vpop.f32.mrb[108].mxu0  ;;  %v1822_v9 = vpop.f32.mrb[108].mxu1 }
 0x1b4   :  { %v2711_v10 = vpack.c.bf16 %v2160_v11, %v2160_v11  ;;  %v2161_v14 = vmax.f32 %v2112_v23, 0.0  ;;  %v2008_v12 = vmax.f32 %v1343_v2, %v1822_v9  ;;  %v3078_v26 = vpop.f32.mrb[109].mxu0  ;;  %v3180_v36 = vpop.f32.mrb[109].mxu1 }
 0x1b5   :  { %v1346_v20 = vpop.f32.mrb[110].mxu0  ;;  %v1825_v62 = vpop.f32.mrb[110].mxu1  ;;  %v4833_v36 = vmax.f32 %v3831_v40, %v3833_v41  ;;  %v4834_v40 = vmax.f32 %v3843_v45, %v3845_v46 }
 0x1b6   :  { %2407 = vst.msk [vmem:[%s4716_s6 + $0x8] sm:$0xf] %vm2404_vm4, %v2711_v10  ;;  %v2712_v60 = vpack.c.bf16 %v2161_v14, %v2161_v14  ;;  %v2057_v17 = vmax.f32 %v4830_v16, %v2008_v12  ;;  %v2009_v61 = vmax.f32 %v1346_v20, %v1825_v62  ;;  %v3079_v59 = vpop.f32.mrb[111].mxu0  ;;  %v3181_v63 = vpop.f32.mrb[111].mxu1 }
 0x1b8   :  { %2408 = vst.msk [vmem:[%s4716_s6 + $0xc] sm:$0xf] %vm2404_vm4, %v2712_v60  ;;  %v2113_v4 = vadd.f32 %v4316_v42, %v2057_v17  ;;  %v2058_v35 = vmax.f32 %v4831_v5, %v2009_v61 }
 0x1ba   :  { %v2162_v18 = vmax.f32 %v2113_v4, 0.0  ;;  %v2114_v47 = vadd.f32 %v4316_v42, %v2058_v35 }
 0x1bb   :  { %v1351_v54 = vpop.f32.mrb[112].mxu0  ;;  %v1830_v21 = vpop.f32.mrb[112].mxu1 }
 0x1bc   :  { %v2713_v22 = vpack.c.bf16 %v2162_v18, %v2162_v18  ;;  %v2163_v30 = vmax.f32 %v2114_v47, 0.0  ;;  %v2010_v0 = vmax.f32 %v1351_v54, %v1830_v21  ;;  %v3082_v6 = vpop.f32.mrb[113].mxu0  ;;  %v3184_v11 = vpop.f32.mrb[113].mxu1 }
 0x1bd   :  { %v1354_v23 = vpop.f32.mrb[114].mxu0  ;;  %v1833_v2 = vpop.f32.mrb[114].mxu1 }
 0x1be   :  { %2409 = vst.msk [vmem:[%s4716_s6 + $0x10] sm:$0xf] %vm2404_vm4, %v2713_v22  ;;  %v2714_v9 = vpack.c.bf16 %v2163_v30, %v2163_v30  ;;  %v2059_v29 = vmax.f32 %v4832_v28, %v2010_v0  ;;  %v2011_v10 = vmax.f32 %v1354_v23, %v1833_v2  ;;  %v3083_v14 = vpop.f32.mrb[115].mxu0  ;;  %v3185_v12 = vpop.f32.mrb[115].mxu1  ;;  %v4835_v22 = vmax.f32 %v3855_v52, %v3857_v53 }
 0x1bf   :  { %v4836_v52 = vmax.f32 %v3867_v57, %v3869_v58 }
 0x1c0   :  { %2410 = vst.msk [vmem:[%s4716_s6 + $0x14] sm:$0xf] %vm2404_vm4, %v2714_v9  ;;  %v2115_v26 = vadd.f32 %v4316_v42, %v2059_v29  ;;  %v2060_v20 = vmax.f32 %v4833_v36, %v2011_v10 }
 0x1c2   :  { %v2164_v62 = vmax.f32 %v2115_v26, 0.0  ;;  %v2116_v60 = vadd.f32 %v4316_v42, %v2060_v20 }
 0x1c3   :  { %v1359_v16 = vpop.f32.mrb[116].mxu0  ;;  %v1838_v33 = vpop.f32.mrb[116].mxu1 }
 0x1c4   :  { %v2715_v34 = vpack.c.bf16 %v2164_v62, %v2164_v62  ;;  %v2165_v17 = vmax.f32 %v2116_v60, 0.0  ;;  %v2012_v61 = vmax.f32 %v1359_v16, %v1838_v33  ;;  %v3086_v59 = vpop.f32.mrb[117].mxu0  ;;  %v3188_v63 = vpop.f32.mrb[117].mxu1  ;;  %v4837_v62 = vmax.f32 %v3879_v7, %v3881_v8 }
 0x1c5   :  { %v1362_v4 = vpop.f32.mrb[118].mxu0  ;;  %v1841_v5 = vpop.f32.mrb[118].mxu1  ;;  %v4838_v7 = vmax.f32 %v3891_v15, %v3893_v19 }
 0x1c6   :  { %2411 = vst.msk [vmem:[%s4716_s6 + $0x18] sm:$0xf] %vm2404_vm4, %v2715_v34  ;;  %v2716_v35 = vpack.c.bf16 %v2165_v17, %v2165_v17  ;;  %v2061_v41 = vmax.f32 %v4834_v40, %v2012_v61  ;;  %v2013_v18 = vmax.f32 %v1362_v4, %v1841_v5  ;;  %v3087_v47 = vpop.f32.mrb[119].mxu0  ;;  %v3189_v54 = vpop.f32.mrb[119].mxu1 }
 0x1c7   :  { %v4839_v54 = vmax.f32 %v3903_v31, %v3905_v32  ;;  %v4840_v31 = vmax.f32 %v3915_v39, %v3917_v43 }
 0x1c8   :  { %2412 = vst.msk [vmem:[%s4716_s6 + $0x1c] sm:$0xf] %vm2404_vm4, %v2716_v35  ;;  %v2117_v21 = vadd.f32 %v4316_v42, %v2061_v41  ;;  %v2062_v30 = vmax.f32 %v4835_v22, %v2013_v18 }
 0x1ca   :  { %v2166_v0 = vmax.f32 %v2117_v21, 0.0  ;;  %v2118_v6 = vadd.f32 %v4316_v42, %v2062_v30 }
 0x1cb   :  { %v1367_v11 = vpop.f32.mrb[120].mxu0  ;;  %v1846_v45 = vpop.f32.mrb[120].mxu1 }
 0x1cc   :  { %v2717_v46 = vpack.c.bf16 %v2166_v0, %v2166_v0  ;;  %v2167_v23 = vmax.f32 %v2118_v6, 0.0  ;;  %v2014_v2 = vmax.f32 %v1367_v11, %v1846_v45  ;;  %v3090_v9 = vpop.f32.mrb[121].mxu0  ;;  %v3192_v28 = vpop.f32.mrb[121].mxu1 }
 0x1cd   :  { %v1370_v29 = vpop.f32.mrb[122].mxu0  ;;  %v1849_v10 = vpop.f32.mrb[122].mxu1 }
 0x1ce   :  { %2413 = vst.msk [vmem:[%s4716_s6 + $0x20] sm:$0xf] %vm2404_vm4, %v2717_v46  ;;  %v2718_v14 = vpack.c.bf16 %v2167_v23, %v2167_v23  ;;  %v2063_v53 = vmax.f32 %v4836_v52, %v2014_v2  ;;  %v2015_v12 = vmax.f32 %v1370_v29, %v1849_v10  ;;  %v3091_v26 = vpop.f32.mrb[123].mxu0  ;;  %v3193_v36 = vpop.f32.mrb[123].mxu1  ;;  %v4841_v52 = vmax.f32 %v3927_v55, %v3929_v56 }
 0x1cf   :  { %v4842_v55 = vmax.f32 %v3939_v3, %v3941_v13 }
 0x1d0   :  { %2414 = vst.msk [vmem:[%s4716_s6 + $0x24] sm:$0xf] %vm2404_vm4, %v2718_v14  ;;  %v2119_v20 = vadd.f32 %v4316_v42, %v2063_v53  ;;  %v2064_v60 = vmax.f32 %v4837_v62, %v2015_v12 }
 0x1d2   :  { %v2168_v16 = vmax.f32 %v2119_v20, 0.0  ;;  %v2120_v33 = vadd.f32 %v4316_v42, %v2064_v60 }
 0x1d3   :  { %v1375_v34 = vpop.f32.mrb[124].mxu0  ;;  %v1854_v57 = vpop.f32.mrb[124].mxu1 }
 0x1d4   :  { %v2719_v58 = vpack.c.bf16 %v2168_v16, %v2168_v16  ;;  %v2169_v17 = vmax.f32 %v2120_v33, 0.0  ;;  %v2016_v61 = vmax.f32 %v1375_v34, %v1854_v57  ;;  %v3094_v59 = vpop.f32.mrb[125].mxu0  ;;  %v3196_v63 = vpop.f32.mrb[125].mxu1 }
 0x1d5   :  { %v1378_v4 = vpop.f32.mrb[126].mxu0  ;;  %v1857_v5 = vpop.f32.mrb[126].mxu1  ;;  %v4843_v63 = vmax.f32 %v3951_v37, %v3953_v38  ;;  %v4844_v37 = vmax.f32 %v3963_v51, %v3965_v1 }
 0x1d6   :  { %2415 = vst.msk [vmem:[%s4716_s6 + $0x28] sm:$0xf] %vm2404_vm4, %v2719_v58  ;;  %v2720_v35 = vpack.c.bf16 %v2169_v17, %v2169_v17  ;;  %v2065_v8 = vmax.f32 %v4838_v7, %v2016_v61  ;;  %v2017_v40 = vmax.f32 %v1378_v4, %v1857_v5  ;;  %v3095_v41 = vpop.f32.mrb[127].mxu0  ;;  %v3197_v18 = vpop.f32.mrb[127].mxu1 }
 0x1d8   :  { %2416 = vst.msk [vmem:[%s4716_s6 + $0x2c] sm:$0xf] %vm2404_vm4, %v2720_v35  ;;  %v2121_v47 = vadd.f32 %v4316_v42, %v2065_v8  ;;  %v2066_v21 = vmax.f32 %v4839_v54, %v2017_v40 }
 0x1da   :  { %v2170_v22 = vmax.f32 %v2121_v47, 0.0  ;;  %v2122_v30 = vadd.f32 %v4316_v42, %v2066_v21 }
 0x1db   :  { %v1383_v0 = vpop.f32.mrb[128].mxu0  ;;  %v1862_v15 = vpop.f32.mrb[128].mxu1 }
 0x1dc   :  { %v2721_v19 = vpack.c.bf16 %v2170_v22, %v2170_v22  ;;  %v2171_v6 = vmax.f32 %v2122_v30, 0.0  ;;  %v2018_v11 = vmax.f32 %v1383_v0, %v1862_v15  ;;  %v3098_v45 = vpop.f32.mrb[129].mxu0  ;;  %v3200_v46 = vpop.f32.mrb[129].mxu1 }
 0x1dd   :  { %v1386_v23 = vpop.f32.mrb[130].mxu0  ;;  %v1865_v2 = vpop.f32.mrb[130].mxu1 }
 0x1de   :  { %2417 = vst.msk [vmem:[%s4716_s6 + $0x30] sm:$0xf] %vm2404_vm4, %v2721_v19  ;;  %v2722_v9 = vpack.c.bf16 %v2171_v6, %v2171_v6  ;;  %v2067_v32 = vmax.f32 %v4840_v31, %v2018_v11  ;;  %v2019_v28 = vmax.f32 %v1386_v23, %v1865_v2  ;;  %v3099_v29 = vpop.f32.mrb[131].mxu0  ;;  %v3201_v10 = vpop.f32.mrb[131].mxu1  ;;  %v4845_v19 = vmax.f32 %v3975_v49, %v3977_v50 }
 0x1df   :  { %v4846_v49 = vmax.f32 %v3987_v24, %v3989_v25 }
 0x1e0   :  { %2418 = vst.msk [vmem:[%s4716_s6 + $0x34] sm:$0xf] %vm2404_vm4, %v2722_v9  ;;  %v2123_v14 = vadd.f32 %v4316_v42, %v2067_v32  ;;  %v2068_v53 = vmax.f32 %v4841_v52, %v2019_v28 }
 0x1e2   :  { %v2172_v12 = vmax.f32 %v2123_v14, 0.0  ;;  %v2124_v26 = vadd.f32 %v4316_v42, %v2068_v53 }
 0x1e3   :  { %v1391_v36 = vpop.f32.mrb[132].mxu0  ;;  %v1870_v39 = vpop.f32.mrb[132].mxu1 }
 0x1e4   :  { %v2723_v43 = vpack.c.bf16 %v2172_v12, %v2172_v12  ;;  %v2173_v20 = vmax.f32 %v2124_v26, 0.0  ;;  %v2020_v62 = vmax.f32 %v1391_v36, %v1870_v39  ;;  %v3102_v60 = vpop.f32.mrb[133].mxu0  ;;  %v3204_v16 = vpop.f32.mrb[133].mxu1  ;;  %v4847_v12 = vmax.f32 %v3999_v27, %v4001_v44  ;;  %v4848_v44 = vld [vmem:[#allocation2_spill] sm:$0xff] }
 0x1e5   :  { %v1394_v33 = vpop.f32.mrb[134].mxu0  ;;  %v1873_v34 = vpop.f32.mrb[134].mxu1  ;;  %v4849_v27 = vmax.f32 %v4011_v48, %v4848_v44 }
 0x1e6   :  { %2419 = vst.msk [vmem:[%s4716_s6 + $0x38] sm:$0xf] %vm2404_vm4, %v2723_v43  ;;  %v2724_v57 = vpack.c.bf16 %v2173_v20, %v2173_v20  ;;  %v2069_v56 = vmax.f32 %v4842_v55, %v2020_v62  ;;  %v2021_v58 = vmax.f32 %v1394_v33, %v1873_v34  ;;  %v3103_v17 = vpop.f32.mrb[135].mxu0  ;;  %v3205_v61 = vpop.f32.mrb[135].mxu1 }
 0x1e8   :  { %2420 = vst.msk [vmem:[%s4716_s6 + $0x3c] sm:$0xf] %vm2404_vm4, %v2724_v57  ;;  %v2125_v59 = vadd.f32 %v4316_v42, %v2069_v56  ;;  %v2070_v4 = vmax.f32 %v4843_v63, %v2021_v58  ;;  %v4851_v63 = vld [vmem:[#allocation4_spill] sm:$0xff] }
 0x1ea   :  { %v2174_v5 = vmax.f32 %v2125_v59, 0.0  ;;  %v2126_v35 = vadd.f32 %v4316_v42, %v2070_v4  ;;  %v4850_v59 = vld [vmem:[#allocation3_spill] sm:$0xff] }
 0x1eb   :  { %v1399_v7 = vpop.f32.mrb[136].mxu0  ;;  %v1878_v3 = vpop.f32.mrb[136].mxu1  ;;  %v4852_v4 = vmax.f32 %v4850_v59, %v4851_v63  ;;  %v4865_v63 = vld [vmem:[#allocation13_spill] sm:$0xff] }
 0x1ec   :  { %v2725_v13 = vpack.c.bf16 %v2174_v5, %v2174_v5  ;;  %v2175_v8 = vmax.f32 %v2126_v35, 0.0  ;;  %v2022_v40 = vmax.f32 %v1399_v7, %v1878_v3  ;;  %v3106_v41 = vpop.f32.mrb[137].mxu0  ;;  %v3208_v18 = vpop.f32.mrb[137].mxu1 }
 0x1ed   :  { %v1402_v47 = vpop.f32.mrb[138].mxu0  ;;  %v1881_v54 = vpop.f32.mrb[138].mxu1 }
 0x1ee   :  { %2421 = vst.msk [vmem:[%s4716_s6 + $0x40] sm:$0xf] %vm2404_vm4, %v2725_v13  ;;  %v2726_v21 = vpack.c.bf16 %v2175_v8, %v2175_v8  ;;  %v2071_v38 = vmax.f32 %v4844_v37, %v2022_v40  ;;  %v2023_v22 = vmax.f32 %v1402_v47, %v1881_v54  ;;  %v3107_v30 = vpop.f32.mrb[139].mxu0  ;;  %v3209_v0 = vpop.f32.mrb[139].mxu1  ;;  %v4853_v37 = vld [vmem:[#allocation5_spill] sm:$0xff] }
 0x1f0   :  { %2422 = vst.msk [vmem:[%s4716_s6 + $0x44] sm:$0xf] %vm2404_vm4, %v2726_v21  ;;  %v2127_v15 = vadd.f32 %v4316_v42, %v2071_v38  ;;  %v2072_v6 = vmax.f32 %v4845_v19, %v2023_v22  ;;  %v4854_v38 = vld [vmem:[#allocation6_spill] sm:$0xff] }
 0x1f1   :  { %v4855_v22 = vmax.f32 %v4853_v37, %v4854_v38 }
 0x1f2   :  { %v2176_v11 = vmax.f32 %v2127_v15, 0.0  ;;  %v2128_v45 = vadd.f32 %v4316_v42, %v2072_v6 }
 0x1f3   :  { %v1407_v46 = vpop.f32.mrb[140].mxu0  ;;  %v1886_v51 = vpop.f32.mrb[140].mxu1 }
 0x1f4   :  { %v2727_v1 = vpack.c.bf16 %v2176_v11, %v2176_v11  ;;  %v2177_v23 = vmax.f32 %v2128_v45, 0.0  ;;  %v2024_v2 = vmax.f32 %v1407_v46, %v1886_v51  ;;  %v3110_v9 = vpop.f32.mrb[141].mxu0  ;;  %v3212_v31 = vpop.f32.mrb[141].mxu1  ;;  %v4856_v11 = vld [vmem:[#allocation7_spill] sm:$0xff]  ;;  %v4857_v45 = vld [vmem:[#allocation8_spill] sm:$0xff] }
 0x1f5   :  { %v1410_v32 = vpop.f32.mrb[142].mxu0  ;;  %v1889_v28 = vpop.f32.mrb[142].mxu1  ;;  %v4858_v46 = vmax.f32 %v4856_v11, %v4857_v45  ;;  %v4871_v45 = vld [vmem:[#allocation17_spill] sm:$0xff] }
 0x1f6   :  { %2423 = vst.msk [vmem:[%s4716_s6 + $0x48] sm:$0xf] %vm2404_vm4, %v2727_v1  ;;  %v2728_v29 = vpack.c.bf16 %v2177_v23, %v2177_v23  ;;  %v2073_v50 = vmax.f32 %v4846_v49, %v2024_v2  ;;  %v2025_v10 = vmax.f32 %v1410_v32, %v1889_v28  ;;  %v3111_v14 = vpop.f32.mrb[143].mxu0  ;;  %v3213_v52 = vpop.f32.mrb[143].mxu1 }
 0x1f7   :  { %v4859_v52 = vld [vmem:[#allocation9_spill] sm:$0xff] }
 0x1f8   :  { %2424 = vst.msk [vmem:[%s4716_s6 + $0x4c] sm:$0xf] %vm2404_vm4, %v2728_v29  ;;  %v2129_v53 = vadd.f32 %v4316_v42, %v2073_v50  ;;  %v2074_v26 = vmax.f32 %v4847_v12, %v2025_v10 }
 0x1fa   :  { %v2178_v36 = vmax.f32 %v2129_v53, 0.0  ;;  %v2130_v39 = vadd.f32 %v4316_v42, %v2074_v26  ;;  %v4860_v53 = vld [vmem:[#allocation10_spill] sm:$0xff] }
 0x1fb   :  { %v1415_v43 = vpop.f32.mrb[144].mxu0  ;;  %v1894_v24 = vpop.f32.mrb[144].mxu1  ;;  %v4861_v12 = vmax.f32 %v4859_v52, %v4860_v53 }
 0x1fc   :  { %v2729_v25 = vpack.c.bf16 %v2178_v36, %v2178_v36  ;;  %v2179_v20 = vmax.f32 %v2130_v39, 0.0  ;;  %v2026_v62 = vmax.f32 %v1415_v43, %v1894_v24  ;;  %v3114_v60 = vpop.f32.mrb[145].mxu0  ;;  %v3216_v16 = vpop.f32.mrb[145].mxu1 }
 0x1fd   :  { %v1418_v33 = vpop.f32.mrb[146].mxu0  ;;  %v1897_v34 = vpop.f32.mrb[146].mxu1 }
 0x1fe   :  { %2425 = vst.msk [vmem:[%s4716_s6 + $0x50] sm:$0xf] %vm2404_vm4, %v2729_v25  ;;  %v2730_v57 = vpack.c.bf16 %v2179_v20, %v2179_v20  ;;  %v2075_v55 = vmax.f32 %v4849_v27, %v2026_v62  ;;  %v2027_v56 = vmax.f32 %v1418_v33, %v1897_v34  ;;  %v3115_v58 = vpop.f32.mrb[147].mxu0  ;;  %v3217_v17 = vpop.f32.mrb[147].mxu1  ;;  %v4862_v25 = vld [vmem:[#allocation11_spill] sm:$0xff]  ;;  %v4863_v20 = vld [vmem:[#allocation12_spill] sm:$0xff] }
 0x1ff   :  { %v4864_v62 = vmax.f32 %v4862_v25, %v4863_v20  ;;  %v4877_v20 = vld [vmem:[#allocation21_spill] sm:$0xff] }
 0x200   :  { %2426 = vst.msk [vmem:[%s4716_s6 + $0x54] sm:$0xf] %vm2404_vm4, %v2730_v57  ;;  %v2131_v61 = vadd.f32 %v4316_v42, %v2075_v55  ;;  %v2076_v5 = vmax.f32 %v4852_v4, %v2027_v56  ;;  %v4866_v4 = vld [vmem:[#allocation14_spill] sm:$0xff] }
 0x202   :  { %v2180_v35 = vmax.f32 %v2131_v61, 0.0  ;;  %v2132_v7 = vadd.f32 %v4316_v42, %v2076_v5  ;;  %v4867_v5 = vmax.f32 %v4865_v63, %v4866_v4 }
 0x203   :  { %v1423_v3 = vpop.f32.mrb[148].mxu0  ;;  %v1902_v48 = vpop.f32.mrb[148].mxu1 }
 0x204   :  { %v2731_v13 = vpack.c.bf16 %v2180_v35, %v2180_v35  ;;  %v2181_v8 = vmax.f32 %v2132_v7, 0.0  ;;  %v2028_v40 = vmax.f32 %v1423_v3, %v1902_v48  ;;  %v3118_v41 = vpop.f32.mrb[149].mxu0  ;;  %v3220_v18 = vpop.f32.mrb[149].mxu1 }
 0x205   :  { %v1426_v47 = vpop.f32.mrb[150].mxu0  ;;  %v1905_v54 = vpop.f32.mrb[150].mxu1 }
 0x206   :  { %2427 = vst.msk [vmem:[%s4716_s6 + $0x58] sm:$0xf] %vm2404_vm4, %v2731_v13  ;;  %v2732_v21 = vpack.c.bf16 %v2181_v8, %v2181_v8  ;;  %v2077_v30 = vmax.f32 %v4855_v22, %v2028_v40  ;;  %v2029_v0 = vmax.f32 %v1426_v47, %v1905_v54  ;;  %v3119_v15 = vpop.f32.mrb[151].mxu0  ;;  %v3221_v19 = vpop.f32.mrb[151].mxu1  ;;  %v4868_v8 = vld [vmem:[#allocation15_spill] sm:$0xff]  ;;  %v4869_v40 = vld [vmem:[#allocation16_spill] sm:$0xff] }
 0x207   :  { %v4870_v41 = vmax.f32 %v4868_v8, %v4869_v40  ;;  %v4883_v40 = vld [vmem:[#allocation25_spill] sm:$0xff] }
 0x208   :  { %2428 = vst.msk [vmem:[%s4716_s6 + $0x5c] sm:$0xf] %vm2404_vm4, %v2732_v21  ;;  %v2133_v6 = vadd.f32 %v4316_v42, %v2077_v30  ;;  %v2078_v51 = vmax.f32 %v4858_v46, %v2029_v0  ;;  %v4872_v46 = vld [vmem:[#allocation18_spill] sm:$0xff] }
 0x20a   :  { %v2182_v1 = vmax.f32 %v2133_v6, 0.0  ;;  %v2134_v23 = vadd.f32 %v4316_v42, %v2078_v51  ;;  %v4873_v51 = vmax.f32 %v4871_v45, %v4872_v46 }
 0x20b   :  { %v1431_v2 = vpop.f32.mrb[152].mxu0  ;;  %v1910_v9 = vpop.f32.mrb[152].mxu1 }
 0x20c   :  { %v2733_v31 = vpack.c.bf16 %v2182_v1, %v2182_v1  ;;  %v2183_v32 = vmax.f32 %v2134_v23, 0.0  ;;  %v2030_v28 = vmax.f32 %v1431_v2, %v1910_v9  ;;  %v3122_v29 = vpop.f32.mrb[153].mxu0  ;;  %v3224_v49 = vpop.f32.mrb[153].mxu1 }
 0x20d   :  { %v1434_v50 = vpop.f32.mrb[154].mxu0  ;;  %v1913_v10 = vpop.f32.mrb[154].mxu1 }
 0x20e   :  { %2429 = vst.msk [vmem:[%s4716_s6 + $0x60] sm:$0xf] %vm2404_vm4, %v2733_v31  ;;  %v2734_v14 = vpack.c.bf16 %v2183_v32, %v2183_v32  ;;  %v2079_v26 = vmax.f32 %v4861_v12, %v2030_v28  ;;  %v2031_v36 = vmax.f32 %v1434_v50, %v1913_v10  ;;  %v3123_v39 = vpop.f32.mrb[155].mxu0  ;;  %v3225_v43 = vpop.f32.mrb[155].mxu1  ;;  %v4874_v32 = vld [vmem:[#allocation19_spill] sm:$0xff]  ;;  %v4875_v28 = vld [vmem:[#allocation20_spill] sm:$0xff] }
 0x20f   :  { %v4876_v29 = vmax.f32 %v4874_v32, %v4875_v28  ;;  %v4889_v28 = vld [vmem:[#allocation29_spill] sm:$0xff] }
 0x210   :  { %2430 = vst.msk [vmem:[%s4716_s6 + $0x64] sm:$0xf] %vm2404_vm4, %v2734_v14  ;;  %v2135_v24 = vadd.f32 %v4316_v42, %v2079_v26  ;;  %v2080_v60 = vmax.f32 %v4864_v62, %v2031_v36  ;;  %v4878_v62 = vld [vmem:[#allocation22_spill] sm:$0xff] }
 0x212   :  { %v2184_v16 = vmax.f32 %v2135_v24, 0.0  ;;  %v2136_v33 = vadd.f32 %v4316_v42, %v2080_v60  ;;  %v4879_v60 = vmax.f32 %v4877_v20, %v4878_v62 }
 0x213   :  { %v1439_v34 = vpop.f32.mrb[156].mxu0  ;;  %v1918_v57 = vpop.f32.mrb[156].mxu1 }
 0x214   :  { %v2735_v44 = vpack.c.bf16 %v2184_v16, %v2184_v16  ;;  %v2185_v27 = vmax.f32 %v2136_v33, 0.0  ;;  %v2032_v55 = vmax.f32 %v1439_v34, %v1918_v57  ;;  %v3126_v56 = vpop.f32.mrb[157].mxu0  ;;  %v3228_v58 = vpop.f32.mrb[157].mxu1 }
 0x215   :  { %v1442_v17 = vpop.f32.mrb[158].mxu0  ;;  %v1921_v61 = vpop.f32.mrb[158].mxu1 }
 0x216   :  { %2431 = vst.msk [vmem:[%s4716_s6 + $0x68] sm:$0xf] %vm2404_vm4, %v2735_v44  ;;  %v2736_v59 = vpack.c.bf16 %v2185_v27, %v2185_v27  ;;  %v2081_v35 = vmax.f32 %v4867_v5, %v2032_v55  ;;  %v2033_v7 = vmax.f32 %v1442_v17, %v1921_v61  ;;  %v3127_v3 = vpop.f32.mrb[159].mxu0  ;;  %v3229_v48 = vpop.f32.mrb[159].mxu1  ;;  %v4880_v27 = vld [vmem:[#allocation23_spill] sm:$0xff]  ;;  %v4881_v55 = vld [vmem:[#allocation24_spill] sm:$0xff] }
 0x217   :  { %v4882_v56 = vmax.f32 %v4880_v27, %v4881_v55  ;;  %v4895_v55 = vld [vmem:[#allocation33_spill] sm:$0xff] }
 0x218   :  { %2432 = vst.msk [vmem:[%s4716_s6 + $0x6c] sm:$0xf] %vm2404_vm4, %v2736_v59  ;;  %v2137_v13 = vadd.f32 %v4316_v42, %v2081_v35  ;;  %v2082_v18 = vmax.f32 %v4870_v41, %v2033_v7  ;;  %v4884_v41 = vld [vmem:[#allocation26_spill] sm:$0xff] }
 0x21a   :  { %v2186_v47 = vmax.f32 %v2137_v13, 0.0  ;;  %v2138_v54 = vadd.f32 %v4316_v42, %v2082_v18  ;;  %v4885_v18 = vmax.f32 %v4883_v40, %v4884_v41 }
 0x21b   :  { %v1447_v21 = vpop.f32.mrb[160].mxu0  ;;  %v1926_v37 = vpop.f32.mrb[160].mxu1 }
 0x21c   :  { %v2737_v38 = vpack.c.bf16 %v2186_v47, %v2186_v47  ;;  %v2187_v22 = vmax.f32 %v2138_v54, 0.0  ;;  %v2034_v30 = vmax.f32 %v1447_v21, %v1926_v37  ;;  %v3130_v0 = vpop.f32.mrb[161].mxu0  ;;  %v3232_v15 = vpop.f32.mrb[161].mxu1 }
 0x21d   :  { %v1450_v19 = vpop.f32.mrb[162].mxu0  ;;  %v1929_v6 = vpop.f32.mrb[162].mxu1 }
 0x21e   :  { %2433 = vst.msk [vmem:[%s4716_s6 + $0x70] sm:$0xf] %vm2404_vm4, %v2737_v38  ;;  %v2738_v11 = vpack.c.bf16 %v2187_v22, %v2187_v22  ;;  %v2083_v1 = vmax.f32 %v4873_v51, %v2034_v30  ;;  %v2035_v23 = vmax.f32 %v1450_v19, %v1929_v6  ;;  %v3131_v2 = vpop.f32.mrb[163].mxu0  ;;  %v3233_v9 = vpop.f32.mrb[163].mxu1  ;;  %v4886_v22 = vld [vmem:[#allocation27_spill] sm:$0xff]  ;;  %v4887_v30 = vld [vmem:[#allocation28_spill] sm:$0xff] }
 0x21f   :  { %v4888_v0 = vmax.f32 %v4886_v22, %v4887_v30  ;;  %v4901_v30 = vld [vmem:[#allocation37_spill] sm:$0xff] }
 0x220   :  { %2434 = vst.msk [vmem:[%s4716_s6 + $0x74] sm:$0xf] %vm2404_vm4, %v2738_v11  ;;  %v2139_v31 = vadd.f32 %v4316_v42, %v2083_v1  ;;  %v2084_v49 = vmax.f32 %v4876_v29, %v2035_v23  ;;  %v4890_v29 = vld [vmem:[#allocation30_spill] sm:$0xff] }
 0x222   :  { %v2188_v50 = vmax.f32 %v2139_v31, 0.0  ;;  %v2140_v10 = vadd.f32 %v4316_v42, %v2084_v49  ;;  %v4891_v49 = vmax.f32 %v4889_v28, %v4890_v29 }
 0x223   :  { %v1455_v14 = vpop.f32.mrb[164].mxu0  ;;  %v1934_v52 = vpop.f32.mrb[164].mxu1 }
 0x224   :  { %v2739_v53 = vpack.c.bf16 %v2188_v50, %v2188_v50  ;;  %v2189_v12 = vmax.f32 %v2140_v10, 0.0  ;;  %v2036_v26 = vmax.f32 %v1455_v14, %v1934_v52  ;;  %v3134_v36 = vpop.f32.mrb[165].mxu0  ;;  %v3236_v39 = vpop.f32.mrb[165].mxu1 }
 0x225   :  { %v1458_v43 = vpop.f32.mrb[166].mxu0  ;;  %v1937_v24 = vpop.f32.mrb[166].mxu1 }
 0x226   :  { %2435 = vst.msk [vmem:[%s4716_s6 + $0x78] sm:$0xf] %vm2404_vm4, %v2739_v53  ;;  %v2740_v25 = vpack.c.bf16 %v2189_v12, %v2189_v12  ;;  %v2085_v16 = vmax.f32 %v4879_v60, %v2036_v26  ;;  %v2037_v33 = vmax.f32 %v1458_v43, %v1937_v24  ;;  %v3135_v34 = vpop.f32.mrb[167].mxu0  ;;  %v3237_v57 = vpop.f32.mrb[167].mxu1  ;;  %v4892_v12 = vld [vmem:[#allocation31_spill] sm:$0xff]  ;;  %v4893_v26 = vld [vmem:[#allocation32_spill] sm:$0xff] }
 0x227   :  { %v4894_v36 = vmax.f32 %v4892_v12, %v4893_v26  ;;  %v4907_v26 = vld [vmem:[#allocation41_spill] sm:$0xff] }
 0x228   :  { %2436 = vst.msk [vmem:[%s4716_s6 + $0x7c] sm:$0xf] %vm2404_vm4, %v2740_v25  ;;  %v2141_v44 = vadd.f32 %v4316_v42, %v2085_v16  ;;  %v2086_v58 = vmax.f32 %v4882_v56, %v2037_v33  ;;  %v4896_v56 = vld [vmem:[#allocation34_spill] sm:$0xff] }
 0x22a   :  { %v2190_v17 = vmax.f32 %v2141_v44, 0.0  ;;  %v2142_v61 = vadd.f32 %v4316_v42, %v2086_v58  ;;  %v4897_v58 = vmax.f32 %v4895_v55, %v4896_v56 }
 0x22b   :  { %v1463_v59 = vpop.f32.mrb[168].mxu0  ;;  %v1942_v63 = vpop.f32.mrb[168].mxu1 }
 0x22c   :  { %v2741_v4 = vpack.c.bf16 %v2190_v17, %v2190_v17  ;;  %v2191_v5 = vmax.f32 %v2142_v61, 0.0  ;;  %v2038_v35 = vmax.f32 %v1463_v59, %v1942_v63  ;;  %v3138_v7 = vpop.f32.mrb[169].mxu0  ;;  %v3240_v3 = vpop.f32.mrb[169].mxu1 }
 0x22d   :  { %v1466_v48 = vpop.f32.mrb[170].mxu0  ;;  %v1945_v13 = vpop.f32.mrb[170].mxu1 }
 0x22e   :  { %2437 = vst.msk [vmem:[%s4716_s6 + $0x80] sm:$0xf] %vm2404_vm4, %v2741_v4  ;;  %v2742_v8 = vpack.c.bf16 %v2191_v5, %v2191_v5  ;;  %v2087_v47 = vmax.f32 %v4885_v18, %v2038_v35  ;;  %v2039_v54 = vmax.f32 %v1466_v48, %v1945_v13  ;;  %v3139_v21 = vpop.f32.mrb[171].mxu0  ;;  %v3241_v37 = vpop.f32.mrb[171].mxu1  ;;  %v4898_v5 = vld [vmem:[#allocation35_spill] sm:$0xff]  ;;  %v4899_v35 = vld [vmem:[#allocation36_spill] sm:$0xff] }
 0x22f   :  { %v4900_v7 = vmax.f32 %v4898_v5, %v4899_v35  ;;  %v4913_v35 = vld [vmem:[#allocation45_spill] sm:$0xff] }
 0x230   :  { %2438 = vst.msk [vmem:[%s4716_s6 + $0x84] sm:$0xf] %vm2404_vm4, %v2742_v8  ;;  %v2143_v38 = vadd.f32 %v4316_v42, %v2087_v47  ;;  %v2088_v15 = vmax.f32 %v4888_v0, %v2039_v54  ;;  %v4902_v0 = vld [vmem:[#allocation38_spill] sm:$0xff] }
 0x232   :  { %v2192_v19 = vmax.f32 %v2143_v38, 0.0  ;;  %v2144_v6 = vadd.f32 %v4316_v42, %v2088_v15  ;;  %v4903_v15 = vmax.f32 %v4901_v30, %v4902_v0 }
 0x233   :  { %v1471_v11 = vpop.f32.mrb[172].mxu0  ;;  %v1950_v45 = vpop.f32.mrb[172].mxu1 }
 0x234   :  { %v2743_v46 = vpack.c.bf16 %v2192_v19, %v2192_v19  ;;  %v2193_v51 = vmax.f32 %v2144_v6, 0.0  ;;  %v2040_v1 = vmax.f32 %v1471_v11, %v1950_v45  ;;  %v3142_v23 = vpop.f32.mrb[173].mxu0  ;;  %v3244_v2 = vpop.f32.mrb[173].mxu1 }
 0x235   :  { %v1474_v9 = vpop.f32.mrb[174].mxu0  ;;  %v1953_v31 = vpop.f32.mrb[174].mxu1 }
 0x236   :  { %2439 = vst.msk [vmem:[%s4716_s6 + $0x88] sm:$0xf] %vm2404_vm4, %v2743_v46  ;;  %v2744_v32 = vpack.c.bf16 %v2193_v51, %v2193_v51  ;;  %v2089_v50 = vmax.f32 %v4891_v49, %v2040_v1  ;;  %v2041_v10 = vmax.f32 %v1474_v9, %v1953_v31  ;;  %v3143_v14 = vpop.f32.mrb[175].mxu0  ;;  %v3245_v52 = vpop.f32.mrb[175].mxu1  ;;  %v4904_v51 = vld [vmem:[#allocation39_spill] sm:$0xff]  ;;  %v4905_v1 = vld [vmem:[#allocation40_spill] sm:$0xff] }
 0x237   :  { %v4906_v23 = vmax.f32 %v4904_v51, %v4905_v1  ;;  %v4919_v1 = vld [vmem:[#allocation49_spill] sm:$0xff] }
 0x238   :  { %2440 = vst.msk [vmem:[%s4716_s6 + $0x8c] sm:$0xf] %vm2404_vm4, %v2744_v32  ;;  %v2145_v53 = vadd.f32 %v4316_v42, %v2089_v50  ;;  %v2090_v39 = vmax.f32 %v4894_v36, %v2041_v10  ;;  %v4908_v36 = vld [vmem:[#allocation42_spill] sm:$0xff] }
 0x23a   :  { %v2194_v43 = vmax.f32 %v2145_v53, 0.0  ;;  %v2146_v24 = vadd.f32 %v4316_v42, %v2090_v39  ;;  %v4909_v39 = vmax.f32 %v4907_v26, %v4908_v36 }
 0x23b   :  { %v1479_v25 = vpop.f32.mrb[176].mxu0  ;;  %v1958_v20 = vpop.f32.mrb[176].mxu1 }
 0x23c   :  { %v2745_v62 = vpack.c.bf16 %v2194_v43, %v2194_v43  ;;  %v2195_v60 = vmax.f32 %v2146_v24, 0.0  ;;  %v2042_v16 = vmax.f32 %v1479_v25, %v1958_v20  ;;  %v3146_v33 = vpop.f32.mrb[177].mxu0  ;;  %v3248_v34 = vpop.f32.mrb[177].mxu1 }
 0x23d   :  { %v1482_v57 = vpop.f32.mrb[178].mxu0  ;;  %v1961_v44 = vpop.f32.mrb[178].mxu1 }
 0x23e   :  { %2441 = vst.msk [vmem:[%s4716_s6 + $0x90] sm:$0xf] %vm2404_vm4, %v2745_v62  ;;  %v2746_v27 = vpack.c.bf16 %v2195_v60, %v2195_v60  ;;  %v2091_v17 = vmax.f32 %v4897_v58, %v2042_v16  ;;  %v2043_v61 = vmax.f32 %v1482_v57, %v1961_v44  ;;  %v3147_v59 = vpop.f32.mrb[179].mxu0  ;;  %v3249_v63 = vpop.f32.mrb[179].mxu1  ;;  %v4910_v60 = vld [vmem:[#allocation43_spill] sm:$0xff]  ;;  %v4911_v16 = vld [vmem:[#allocation44_spill] sm:$0xff] }
 0x23f   :  { %v4912_v33 = vmax.f32 %v4910_v60, %v4911_v16  ;;  %v4925_v16 = vld [vmem:[#allocation53_spill] sm:$0xff] }
 0x240   :  { %2442 = vst.msk [vmem:[%s4716_s6 + $0x94] sm:$0xf] %vm2404_vm4, %v2746_v27  ;;  %v2147_v4 = vadd.f32 %v4316_v42, %v2091_v17  ;;  %v2092_v3 = vmax.f32 %v4900_v7, %v2043_v61  ;;  %v4914_v7 = vld [vmem:[#allocation46_spill] sm:$0xff] }
 0x242   :  { %v2196_v48 = vmax.f32 %v2147_v4, 0.0  ;;  %v2148_v13 = vadd.f32 %v4316_v42, %v2092_v3  ;;  %v4915_v3 = vmax.f32 %v4913_v35, %v4914_v7 }
 0x243   :  { %v1487_v8 = vpop.f32.mrb[180].mxu0  ;;  %v1966_v40 = vpop.f32.mrb[180].mxu1 }
 0x244   :  { %v2747_v41 = vpack.c.bf16 %v2196_v48, %v2196_v48  ;;  %v2197_v18 = vmax.f32 %v2148_v13, 0.0  ;;  %v2044_v47 = vmax.f32 %v1487_v8, %v1966_v40  ;;  %v3150_v54 = vpop.f32.mrb[181].mxu0  ;;  %v3252_v21 = vpop.f32.mrb[181].mxu1 }
 0x245   :  { %v1490_v37 = vpop.f32.mrb[182].mxu0  ;;  %v1969_v38 = vpop.f32.mrb[182].mxu1 }
 0x246   :  { %2443 = vst.msk [vmem:[%s4716_s6 + $0x98] sm:$0xf] %vm2404_vm4, %v2747_v41  ;;  %v2748_v22 = vpack.c.bf16 %v2197_v18, %v2197_v18  ;;  %v2093_v19 = vmax.f32 %v4903_v15, %v2044_v47  ;;  %v2045_v6 = vmax.f32 %v1490_v37, %v1969_v38  ;;  %v3151_v11 = vpop.f32.mrb[183].mxu0  ;;  %v3253_v45 = vpop.f32.mrb[183].mxu1  ;;  %v4916_v18 = vld [vmem:[#allocation47_spill] sm:$0xff]  ;;  %v4917_v47 = vld [vmem:[#allocation48_spill] sm:$0xff] }
 0x247   :  { %v4918_v54 = vmax.f32 %v4916_v18, %v4917_v47 }
 0x248   :  { %2444 = vst.msk [vmem:[%s4716_s6 + $0x9c] sm:$0xf] %vm2404_vm4, %v2748_v22  ;;  %v2149_v46 = vadd.f32 %v4316_v42, %v2093_v19  ;;  %v2094_v2 = vmax.f32 %v4906_v23, %v2045_v6  ;;  %v4920_v23 = vld [vmem:[#allocation50_spill] sm:$0xff] }
 0x24a   :  { %v2198_v9 = vmax.f32 %v2149_v46, 0.0  ;;  %v2150_v31 = vadd.f32 %v4316_v42, %v2094_v2  ;;  %v4921_v2 = vmax.f32 %v4919_v1, %v4920_v23 }
 0x24b   :  { %v1495_v32 = vpop.f32.mrb[184].mxu0  ;;  %v1974_v28 = vpop.f32.mrb[184].mxu1 }
 0x24c   :  { %v2749_v29 = vpack.c.bf16 %v2198_v9, %v2198_v9  ;;  %v2199_v49 = vmax.f32 %v2150_v31, 0.0  ;;  %v2046_v50 = vmax.f32 %v1495_v32, %v1974_v28  ;;  %v3154_v10 = vpop.f32.mrb[185].mxu0  ;;  %v3256_v14 = vpop.f32.mrb[185].mxu1 }
 0x24d   :  { %v1498_v52 = vpop.f32.mrb[186].mxu0  ;;  %v1977_v53 = vpop.f32.mrb[186].mxu1 }
 0x24e   :  { %2445 = vst.msk [vmem:[%s4716_s6 + $0xa0] sm:$0xf] %vm2404_vm4, %v2749_v29  ;;  %v2750_v12 = vpack.c.bf16 %v2199_v49, %v2199_v49  ;;  %v2095_v43 = vmax.f32 %v4909_v39, %v2046_v50  ;;  %v2047_v24 = vmax.f32 %v1498_v52, %v1977_v53  ;;  %v3155_v25 = vpop.f32.mrb[187].mxu0  ;;  %v3257_v20 = vpop.f32.mrb[187].mxu1  ;;  %v4922_v49 = vld [vmem:[#allocation51_spill] sm:$0xff]  ;;  %v4923_v50 = vld [vmem:[#allocation52_spill] sm:$0xff] }
 0x24f   :  { %v4924_v10 = vmax.f32 %v4922_v49, %v4923_v50 }
 0x250   :  { %2446 = vst.msk [vmem:[%s4716_s6 + $0xa4] sm:$0xf] %vm2404_vm4, %v2750_v12  ;;  %v2151_v62 = vadd.f32 %v4316_v42, %v2095_v43  ;;  %v2096_v34 = vmax.f32 %v4912_v33, %v2047_v24  ;;  %v4926_v33 = vld [vmem:[#allocation54_spill] sm:$0xff] }
 0x252   :  { %v2200_v57 = vmax.f32 %v2151_v62, 0.0  ;;  %v2152_v44 = vadd.f32 %v4316_v42, %v2096_v34  ;;  %v4927_v34 = vmax.f32 %v4925_v16, %v4926_v33 }
 0x253   :  { %v1503_v27 = vpop.f32.mrb[188].mxu0  ;;  %v1982_v55 = vpop.f32.mrb[188].mxu1 }
 0x254   :  { %v2751_v56 = vpack.c.bf16 %v2200_v57, %v2200_v57  ;;  %v2201_v58 = vmax.f32 %v2152_v44, 0.0  ;;  %v2048_v17 = vmax.f32 %v1503_v27, %v1982_v55  ;;  %v3158_v61 = vpop.f32.mrb[189].mxu0  ;;  %v3260_v59 = vpop.f32.mrb[189].mxu1 }
 0x255   :  { %v1506_v63 = vpop.f32.mrb[190].mxu0  ;;  %v1985_v4 = vpop.f32.mrb[190].mxu1 }
 0x256   :  { %2447 = vst.msk [vmem:[%s4716_s6 + $0xa8] sm:$0xf] %vm2404_vm4, %v2751_v56  ;;  %v2752_v5 = vpack.c.bf16 %v2201_v58, %v2201_v58  ;;  %v2097_v48 = vmax.f32 %v4915_v3, %v2048_v17  ;;  %v2049_v13 = vmax.f32 %v1506_v63, %v1985_v4  ;;  %v3159_v8 = vpop.f32.mrb[191].mxu0  ;;  %v3261_v40 = vpop.f32.mrb[191].mxu1 }
 0x258   :  { %2448 = vst.msk [vmem:[%s4716_s6 + $0xac] sm:$0xf] %vm2404_vm4, %v2752_v5  ;;  %v2153_v41 = vadd.f32 %v4316_v42, %v2097_v48  ;;  %v2098_v21 = vmax.f32 %v4918_v54, %v2049_v13 }
 0x25a   :  { %v2202_v37 = vmax.f32 %v2153_v41, 0.0  ;;  %v2154_v38 = vadd.f32 %v4316_v42, %v2098_v21 }
 0x25b   :  { %v1511_v22 = vpop.f32.mrb[192].mxu0  ;;  %v1990_v30 = vpop.f32.mrb[192].mxu1 }
 0x25c   :  { %v2753_v0 = vpack.c.bf16 %v2202_v37, %v2202_v37  ;;  %v2203_v15 = vmax.f32 %v2154_v38, 0.0  ;;  %v2050_v19 = vmax.f32 %v1511_v22, %v1990_v30  ;;  %v3162_v6 = vpop.f32.mrb[193].mxu0  ;;  %v3264_v11 = vpop.f32.mrb[193].mxu1 }
 0x25d   :  { %v1514_v45 = vpop.f32.mrb[194].mxu0  ;;  %v1993_v46 = vpop.f32.mrb[194].mxu1 }
 0x25e   :  { %2449 = vst.msk [vmem:[%s4716_s6 + $0xb0] sm:$0xf] %vm2404_vm4, %v2753_v0  ;;  %v2754_v51 = vpack.c.bf16 %v2203_v15, %v2203_v15  ;;  %v2099_v9 = vmax.f32 %v4921_v2, %v2050_v19  ;;  %v2051_v31 = vmax.f32 %v1514_v45, %v1993_v46  ;;  %v3163_v32 = vpop.f32.mrb[195].mxu0  ;;  %v3265_v28 = vpop.f32.mrb[195].mxu1 }
 0x260   :  { %2450 = vst.msk [vmem:[%s4716_s6 + $0xb4] sm:$0xf] %vm2404_vm4, %v2754_v51  ;;  %v2155_v29 = vadd.f32 %v4316_v42, %v2099_v9  ;;  %v2100_v14 = vmax.f32 %v4924_v10, %v2051_v31 }
 0x262   :  { %v2204_v52 = vmax.f32 %v2155_v29, 0.0  ;;  %v2156_v53 = vadd.f32 %v4316_v42, %v2100_v14 }
 0x263   :  { %v1519_v12 = vpop.f32.mrb[196].mxu0  ;;  %v1998_v26 = vpop.f32.mrb[196].mxu1 }
 0x264   :  { %v2755_v36 = vpack.c.bf16 %v2204_v52, %v2204_v52  ;;  %v2205_v39 = vmax.f32 %v2156_v53, 0.0  ;;  %v2052_v43 = vmax.f32 %v1519_v12, %v1998_v26  ;;  %v3166_v24 = vpop.f32.mrb[197].mxu0  ;;  %v3268_v25 = vpop.f32.mrb[197].mxu1 }
 0x265   :  { %v1522_v20 = vpop.f32.mrb[198].mxu0  ;;  %v2001_v62 = vpop.f32.mrb[198].mxu1 }
 0x266   :  { %2451 = vst.msk [vmem:[%s4716_s6 + $0xb8] sm:$0xf] %vm2404_vm4, %v2755_v36  ;;  %v2756_v60 = vpack.c.bf16 %v2205_v39, %v2205_v39  ;;  %v2101_v57 = vmax.f32 %v4927_v34, %v2052_v43  ;;  %v3167_v44 = vpop.f32.mrb[199].mxu0  ;;  %v3269_v27 = vpop.f32.mrb[199].mxu1 }
 0x268   :  { %2452 = vst.msk [vmem:[%s4716_s6 + $0xbc] sm:$0xf] %vm2404_vm4, %v2756_v60  ;;  %v2157_v55 = vadd.f32 %v4316_v42, %v2101_v57 }
 0x26a   :  { %v2206_v56 = vmax.f32 %v2157_v55, 0.0 }
 0x26c   :  { %v2757_v58 = vpack.c.bf16 %v2206_v56, %v2206_v56 }
 0x26e   :  { %2453 = vst.msk [vmem:[%s4716_s6 + $0xc0] sm:$0xf] %vm2404_vm4, %v2757_v58 }

// kernel: simclr_forward.5
= control target key start
LH: loop header
LB: loop body
LE: loop exit
PB: predicated region body
PF: predicated region fallthrough
CT: control target
= control target key end

     0   :  { %v1152_v0 = vmov 0.0   ;;  %vm1153_vm0 = vmmov 0   ;;  %vm128_vm1 = vcmask 1043456   ;;  %vm106_vm2 = vcmask 588800   ;;  %s1578_s4 = inlined_call_operand.vmem [shape: bf16[72,16], index: 4, kind: input, shape index: {}]   ;;  %s1579_s0 = inlined_call_operand.vmem [shape: bf16[98,72], index: 0, kind: input, shape index: {}]   ;;  %s1580_s1 = inlined_call_operand.vmem [shape: bf16[98,72], index: 1, kind: input, shape index: {}]   ;;  %s1581_s2 = inlined_call_operand.vmem [shape: bf16[98,72], index: 2, kind: input, shape index: {}]   ;;  %s1582_s3 = inlined_call_operand.vmem [shape: bf16[98,72], index: 3, kind: input, shape index: {}]   ;;  %s1583_s5 = inlined_call_operand.vmem [shape: f32[1,16], index: 5, kind: input, shape index: {}]   ;;  %s1584_s6 = inlined_call_operand.vmem [shape: bf16[98,16], index: 6, kind: output, shape index: {}]  }
   0x1   :  { %965 = vmatprep.subr.bf16.mxu0 %v1152_v0  ;;  %1003 = vmatprep.subr.bf16.mxu1 %v1152_v0  ;;  %v1119_v1 = vld [vmem:[%s1578_s4] sm:$0xff]   ;;  %v1120_v2 = vld [vmem:[%s1578_s4 + $0x8] sm:$0xff]   ;;  %v1121_v3 = vld [vmem:[%s1578_s4 + $0x10] sm:$0xff]   ;;  %vm810_vm3 = vcmask 125952   ;;  %vm823_vm4 = vcmask 122880  }
   0x2   :  { %975 = vmatprep.mubr.msk.bf16.mxu0 %vm1153_vm0, %v1152_v0  ;;  %1013 = vmatprep.mubr.msk.bf16.mxu1 %vm1153_vm0, %v1152_v0  ;;  %v1122_v4 = vld [vmem:[%s1578_s4 + $0x18] sm:$0xff]   ;;  %v1123_v5 = vld [vmem:[%s1578_s4 + $0x20] ss:$0 sps:$4 sm:$0xff]   ;;  %v1126_v9 = vld [vmem:[%s1579_s0 + $0x8] sm:$0xff]  }
   0x3   :  { %966 = vmatpush3.bf16.msra.mxu0 %v1119_v1  ;;  %1004 = vmatpush3.bf16.msra.mxu1 %v1119_v1  ;;  %v130_v6 = vsel %vm128_vm1, %v1123_v5, 0  ;;  %v1124_v7 = vld [vmem:[%s1579_s0] sm:$0xff]   ;;  %v1127_v10 = vld [vmem:[%s1580_s1 + $0x8] sm:$0xff]   ;;  %v1128_v11 = vld [vmem:[%s1579_s0 + $0x10] sm:$0xff]  }
   0x4   :  { %967 = vmatprep.subr.bf16.mxu0 %v1152_v0  ;;  %1005 = vmatprep.subr.bf16.mxu1 %v1152_v0  ;;  %v1125_v8 = vld [vmem:[%s1580_s1] sm:$0xff]   ;;  %v1129_v12 = vld [vmem:[%s1580_s1 + $0x10] sm:$0xff]   ;;  %v1130_v13 = vld [vmem:[%s1579_s0 + $0x18] sm:$0xff]  }
   0x5   :  { %v1131_v14 = vld [vmem:[%s1580_s1 + $0x18] sm:$0xff]   ;;  %v1132_v15 = vld [vmem:[%s1579_s0 + $0x20] sm:$0xff]   ;;  %v1134_v17 = vld [vmem:[%s1579_s0 + $0x28] sm:$0xff]  }
   0x6   :  { %v1133_v16 = vld [vmem:[%s1580_s1 + $0x20] sm:$0xff]   ;;  %v1135_v18 = vld [vmem:[%s1580_s1 + $0x28] sm:$0xff]   ;;  %v1136_v19 = vld [vmem:[%s1579_s0 + $0x30] ss:$0 sps:$4 sm:$0x11]  }
   0x7   :  { %968 = vmatpush3.bf16.msra.mxu0 %v1120_v2  ;;  %1006 = vmatpush3.bf16.msra.mxu1 %v1120_v2  ;;  %v1137_v20 = vld [vmem:[%s1580_s1 + $0x30] ss:$0 sps:$4 sm:$0x11]   ;;  %v1138_v21 = vld [vmem:[%s1581_s2] sm:$0xff]   ;;  %v1140_v23 = vld [vmem:[%s1581_s2 + $0x8] sm:$0xff]  }
   0x8   :  { %969 = vmatprep.subr.bf16.mxu0 %v1152_v0  ;;  %1007 = vmatprep.subr.bf16.mxu1 %v1152_v0  ;;  %v1139_v22 = vld [vmem:[%s1582_s3] sm:$0xff]   ;;  %v1141_v24 = vld [vmem:[%s1582_s3 + $0x8] sm:$0xff]   ;;  %v1142_v25 = vld [vmem:[%s1581_s2 + $0x10] sm:$0xff]  }
   0x9   :  { %v1143_v26 = vld [vmem:[%s1582_s3 + $0x10] sm:$0xff]   ;;  %v1144_v27 = vld [vmem:[%s1581_s2 + $0x18] sm:$0xff]   ;;  %v1146_v29 = vld [vmem:[%s1581_s2 + $0x20] sm:$0xff]  }
   0xa   :  { %v1145_v28 = vld [vmem:[%s1582_s3 + $0x18] sm:$0xff]   ;;  %v1147_v30 = vld [vmem:[%s1582_s3 + $0x20] sm:$0xff]   ;;  %v1148_v31 = vld [vmem:[%s1581_s2 + $0x28] sm:$0xff]  }
   0xb   :  { %970 = vmatpush3.bf16.msra.mxu0 %v1121_v3  ;;  %1008 = vmatpush3.bf16.msra.mxu1 %v1121_v3  ;;  %v1149_v32 = vld [vmem:[%s1582_s3 + $0x28] sm:$0xff]   ;;  %v1150_v33 = vld [vmem:[%s1581_s2 + $0x30] ss:$0 sps:$4 sm:$0x11]  }
   0xc   :  { %971 = vmatprep.subr.bf16.mxu0 %v1152_v0  ;;  %1009 = vmatprep.subr.bf16.mxu1 %v1152_v0  ;;  %v1151_v34 = vld [vmem:[%s1582_s3 + $0x30] ss:$0 sps:$4 sm:$0x11]  }
   0xf   :  { %972 = vmatpush3.bf16.msra.mxu0 %v1122_v4  ;;  %1010 = vmatpush3.bf16.msra.mxu1 %v1122_v4 }
  0x10   :  { %973 = vmatprep.subr.bf16.mxu0 %v1152_v0  ;;  %1011 = vmatprep.subr.bf16.mxu1 %v1152_v0 }
  0x13   :  { %974 = vmatpush3.bf16.msra.mxu0 %v130_v6  ;;  %1012 = vmatpush3.bf16.msra.mxu1 %v130_v6 }
  0x14   :  { %1041 = vmatprep.subr.bf16.mxu0 %v1152_v0  ;;  %1079 = vmatprep.subr.bf16.mxu1 %v1152_v0 }
  0x16   :  { %976 = vmatmul.mubr.msk.bf16.vlgmr.msra.gmra.mrb[0].mxu0 %vm106_vm2, %v1124_v7  ;;  %1014 = vmatmul.mubr.msk.bf16.vlgmr.msra.gmra.mrb[0].mxu1 %vm106_vm2, %v1125_v8 }
  0x17   :  { %1042 = vmatpush3.bf16.msra.mxu0 %v1119_v1  ;;  %1080 = vmatpush3.bf16.msra.mxu1 %v1119_v1 }
  0x18   :  { %979 = vmatprep.mubr.msk.bf16.mxu0 %vm1153_vm0, %v1152_v0  ;;  %1017 = vmatprep.mubr.msk.bf16.mxu1 %vm1153_vm0, %v1152_v0 }
  0x19   :  { %1043 = vmatprep.subr.bf16.mxu0 %v1152_v0  ;;  %1081 = vmatprep.subr.bf16.mxu1 %v1152_v0 }
  0x1b   :  { %1044 = vmatpush3.bf16.msra.mxu0 %v1120_v2  ;;  %1082 = vmatpush3.bf16.msra.mxu1 %v1120_v2 }
  0x1c   :  { %1045 = vmatprep.subr.bf16.mxu0 %v1152_v0  ;;  %1083 = vmatprep.subr.bf16.mxu1 %v1152_v0 }
  0x1e   :  { %980 = vmatmul.mubr.msk.bf16.gmra.mrb[4].mxu0 %vm106_vm2, %v1126_v9  ;;  %1018 = vmatmul.mubr.msk.bf16.gmra.mrb[4].mxu1 %vm106_vm2, %v1127_v10 }
  0x1f   :  { %983 = vmatprep.mubr.msk.bf16.mxu0 %vm1153_vm0, %v1152_v0  ;;  %1021 = vmatprep.mubr.msk.bf16.mxu1 %vm1153_vm0, %v1152_v0 }
  0x20   :  { %1046 = vmatpush3.bf16.msra.mxu0 %v1121_v3  ;;  %1084 = vmatpush3.bf16.msra.mxu1 %v1121_v3 }
  0x21   :  { %1047 = vmatprep.subr.bf16.mxu0 %v1152_v0  ;;  %1085 = vmatprep.subr.bf16.mxu1 %v1152_v0 }
  0x24   :  { %1048 = vmatpush3.bf16.msra.mxu0 %v1122_v4  ;;  %1086 = vmatpush3.bf16.msra.mxu1 %v1122_v4 }
  0x25   :  { %1049 = vmatprep.subr.bf16.mxu0 %v1152_v0  ;;  %1087 = vmatprep.subr.bf16.mxu1 %v1152_v0 }
  0x26   :  { %984 = vmatmul.mubr.msk.bf16.gmra.mrb[8].mxu0 %vm106_vm2, %v1128_v11  ;;  %1022 = vmatmul.mubr.msk.bf16.gmra.mrb[8].mxu1 %vm106_vm2, %v1129_v12 }
  0x27   :  { %987 = vmatprep.mubr.msk.bf16.mxu0 %vm1153_vm0, %v1152_v0  ;;  %1025 = vmatprep.mubr.msk.bf16.mxu1 %vm1153_vm0, %v1152_v0 }
  0x28   :  { %1050 = vmatpush3.bf16.msra.mxu0 %v130_v6  ;;  %1088 = vmatpush3.bf16.msra.mxu1 %v130_v6 }
  0x2e   :  { %988 = vmatmul.mubr.msk.bf16.gmra.mrb[12].mxu0 %vm106_vm2, %v1130_v13  ;;  %1026 = vmatmul.mubr.msk.bf16.gmra.mrb[12].mxu1 %vm106_vm2, %v1131_v14 }
  0x2f   :  { %991 = vmatprep.mubr.msk.bf16.mxu0 %vm1153_vm0, %v1152_v0  ;;  %1029 = vmatprep.mubr.msk.bf16.mxu1 %vm1153_vm0, %v1152_v0 }
  0x36   :  { %992 = vmatmul.mubr.msk.bf16.gmra.mrb[16].mxu0 %vm106_vm2, %v1132_v15  ;;  %1030 = vmatmul.mubr.msk.bf16.gmra.mrb[16].mxu1 %vm106_vm2, %v1133_v16 }
  0x37   :  { %995 = vmatprep.mubr.msk.bf16.mxu0 %vm1153_vm0, %v1152_v0  ;;  %1033 = vmatprep.mubr.msk.bf16.mxu1 %vm1153_vm0, %v1152_v0 }
  0x3e   :  { %996 = vmatmul.mubr.msk.bf16.gmra.mrb[20].mxu0 %vm106_vm2, %v1134_v17  ;;  %1034 = vmatmul.mubr.msk.bf16.gmra.mrb[20].mxu1 %vm106_vm2, %v1135_v18 }
  0x3f   :  { %999 = vmatprep.mubr.msk.bf16.mxu0 %vm1153_vm0, %v1152_v0  ;;  %1037 = vmatprep.mubr.msk.bf16.mxu1 %vm1153_vm0, %v1152_v0 }
  0x46   :  { %1000 = vmatmul.mubr.msk.bf16.gmra.mrb[24].mxu0 %vm106_vm2, %v1136_v19  ;;  %1038 = vmatmul.mubr.msk.bf16.gmra.mrb[24].mxu1 %vm106_vm2, %v1137_v20 }
  0x47   :  { %1051 = vmatprep.mubr.msk.bf16.mxu0 %vm1153_vm0, %v1152_v0  ;;  %1089 = vmatprep.mubr.msk.bf16.mxu1 %vm1153_vm0, %v1152_v0 }
  0x4e   :  { %1052 = vmatmul.mubr.msk.bf16.vlgmr.msra.gmra.mrb[28].mxu0 %vm106_vm2, %v1138_v21  ;;  %1090 = vmatmul.mubr.msk.bf16.vlgmr.msra.gmra.mrb[28].mxu1 %vm106_vm2, %v1139_v22 }
  0x4f   :  { %1055 = vmatprep.mubr.msk.bf16.mxu0 %vm1153_vm0, %v1152_v0  ;;  %1093 = vmatprep.mubr.msk.bf16.mxu1 %vm1153_vm0, %v1152_v0 }
  0x56   :  { %1056 = vmatmul.mubr.msk.bf16.gmra.mrb[32].mxu0 %vm106_vm2, %v1140_v23  ;;  %1094 = vmatmul.mubr.msk.bf16.gmra.mrb[32].mxu1 %vm106_vm2, %v1141_v24 }
  0x57   :  { %1059 = vmatprep.mubr.msk.bf16.mxu0 %vm1153_vm0, %v1152_v0  ;;  %1097 = vmatprep.mubr.msk.bf16.mxu1 %vm1153_vm0, %v1152_v0 }
  0x5e   :  { %1060 = vmatmul.mubr.msk.bf16.gmra.mrb[36].mxu0 %vm106_vm2, %v1142_v25  ;;  %1098 = vmatmul.mubr.msk.bf16.gmra.mrb[36].mxu1 %vm106_vm2, %v1143_v26 }
  0x5f   :  { %1063 = vmatprep.mubr.msk.bf16.mxu0 %vm1153_vm0, %v1152_v0  ;;  %1101 = vmatprep.mubr.msk.bf16.mxu1 %vm1153_vm0, %v1152_v0 }
  0x66   :  { %1064 = vmatmul.mubr.msk.bf16.gmra.mrb[40].mxu0 %vm106_vm2, %v1144_v27  ;;  %1102 = vmatmul.mubr.msk.bf16.gmra.mrb[40].mxu1 %vm106_vm2, %v1145_v28 }
  0x67   :  { %1067 = vmatprep.mubr.msk.bf16.mxu0 %vm1153_vm0, %v1152_v0  ;;  %1105 = vmatprep.mubr.msk.bf16.mxu1 %vm1153_vm0, %v1152_v0 }
  0x6e   :  { %1068 = vmatmul.mubr.msk.bf16.gmra.mrb[44].mxu0 %vm106_vm2, %v1146_v29  ;;  %1106 = vmatmul.mubr.msk.bf16.gmra.mrb[44].mxu1 %vm106_vm2, %v1147_v30 }
  0x6f   :  { %1071 = vmatprep.mubr.msk.bf16.mxu0 %vm1153_vm0, %v1152_v0  ;;  %1109 = vmatprep.mubr.msk.bf16.mxu1 %vm1153_vm0, %v1152_v0 }
  0x76   :  { %1072 = vmatmul.mubr.msk.bf16.gmra.mrb[48].mxu0 %vm106_vm2, %v1148_v31  ;;  %1110 = vmatmul.mubr.msk.bf16.gmra.mrb[48].mxu1 %vm106_vm2, %v1149_v32 }
  0x77   :  { %1075 = vmatprep.mubr.msk.bf16.mxu0 %vm1153_vm0, %v1152_v0  ;;  %1113 = vmatprep.mubr.msk.bf16.mxu1 %vm1153_vm0, %v1152_v0 }
  0x7e   :  { %1076 = vmatmul.mubr.msk.bf16.gmra.mrb[52].mxu0 %vm106_vm2, %v1150_v33  ;;  %1114 = vmatmul.mubr.msk.bf16.gmra.mrb[52].mxu1 %vm106_vm2, %v1151_v34 }
  0xe9   :  { %v1392_v35 = vpop.f32.mrb[0].mxu0  ;;  %v1394_v36 = vpop.f32.mrb[0].mxu1 }
  0xea   :  { %v375_v37 = vmax.f32 %v1392_v35, %v1394_v36  ;;  %v977_v38 = vpop.f32.mrb[1].mxu0  ;;  %v1015_v39 = vpop.f32.mrb[1].mxu1 }
  0xeb   :  { %v1398_v40 = vpop.f32.mrb[2].mxu0  ;;  %v1400_v41 = vpop.f32.mrb[2].mxu1 }
  0xec   :  { %v376_v42 = vmax.f32 %v1398_v40, %v1400_v41  ;;  %v978_v43 = vpop.f32.mrb[3].mxu0  ;;  %v1016_v44 = vpop.f32.mrb[3].mxu1 }
  0xf1   :  { %v1404_v45 = vpop.f32.mrb[4].mxu0  ;;  %v1406_v46 = vpop.f32.mrb[4].mxu1 }
  0xf2   :  { %v377_v47 = vmax.f32 %v1404_v45, %v1406_v46  ;;  %v981_v48 = vpop.f32.mrb[5].mxu0  ;;  %v1019_v49 = vpop.f32.mrb[5].mxu1 }
  0xf3   :  { %v1410_v50 = vpop.f32.mrb[6].mxu0  ;;  %v1412_v51 = vpop.f32.mrb[6].mxu1 }
  0xf4   :  { %v378_v52 = vmax.f32 %v1410_v50, %v1412_v51  ;;  %v982_v53 = vpop.f32.mrb[7].mxu0  ;;  %v1020_v54 = vpop.f32.mrb[7].mxu1 }
  0xf9   :  { %v1416_v55 = vpop.f32.mrb[8].mxu0  ;;  %v1418_v56 = vpop.f32.mrb[8].mxu1 }
  0xfa   :  { %v379_v57 = vmax.f32 %v1416_v55, %v1418_v56  ;;  %v985_v58 = vpop.f32.mrb[9].mxu0  ;;  %v1023_v59 = vpop.f32.mrb[9].mxu1 }
  0xfb   :  { %v1422_v60 = vpop.f32.mrb[10].mxu0  ;;  %v1424_v61 = vpop.f32.mrb[10].mxu1 }
  0xfc   :  { %v380_v62 = vmax.f32 %v1422_v60, %v1424_v61  ;;  %v986_v63 = vpop.f32.mrb[11].mxu0  ;;  %v1024_v0 = vpop.f32.mrb[11].mxu1 }
  0xfd   :  { %v1473_v63 = vld [vmem:[%s1583_s5] ss:$0 sm:$0xff] }
 0x101   :  { %v1428_v1 = vpop.f32.mrb[12].mxu0  ;;  %v1430_v2 = vpop.f32.mrb[12].mxu1 }
 0x102   :  { %v381_v3 = vmax.f32 %v1428_v1, %v1430_v2  ;;  %v989_v4 = vpop.f32.mrb[13].mxu0  ;;  %v1027_v5 = vpop.f32.mrb[13].mxu1 }
 0x103   :  { %v1434_v6 = vpop.f32.mrb[14].mxu0  ;;  %v1436_v7 = vpop.f32.mrb[14].mxu1 }
 0x104   :  { %v382_v8 = vmax.f32 %v1434_v6, %v1436_v7  ;;  %v990_v9 = vpop.f32.mrb[15].mxu0  ;;  %v1028_v10 = vpop.f32.mrb[15].mxu1 }
 0x109   :  { %v1440_v11 = vpop.f32.mrb[16].mxu0  ;;  %v1442_v12 = vpop.f32.mrb[16].mxu1 }
 0x10a   :  { %v383_v13 = vmax.f32 %v1440_v11, %v1442_v12  ;;  %v993_v14 = vpop.f32.mrb[17].mxu0  ;;  %v1031_v15 = vpop.f32.mrb[17].mxu1 }
 0x10b   :  { %v1446_v16 = vpop.f32.mrb[18].mxu0  ;;  %v1448_v17 = vpop.f32.mrb[18].mxu1 }
 0x10c   :  { %v384_v18 = vmax.f32 %v1446_v16, %v1448_v17  ;;  %v994_v19 = vpop.f32.mrb[19].mxu0  ;;  %v1032_v20 = vpop.f32.mrb[19].mxu1 }
 0x111   :  { %v1452_v21 = vpop.f32.mrb[20].mxu0  ;;  %v1454_v22 = vpop.f32.mrb[20].mxu1 }
 0x112   :  { %v385_v23 = vmax.f32 %v1452_v21, %v1454_v22  ;;  %v997_v24 = vpop.f32.mrb[21].mxu0  ;;  %v1035_v25 = vpop.f32.mrb[21].mxu1 }
 0x113   :  { %v1458_v26 = vpop.f32.mrb[22].mxu0  ;;  %v1460_v27 = vpop.f32.mrb[22].mxu1 }
 0x114   :  { %v386_v28 = vmax.f32 %v1458_v26, %v1460_v27  ;;  %v998_v29 = vpop.f32.mrb[23].mxu0  ;;  %v1036_v30 = vpop.f32.mrb[23].mxu1 }
 0x119   :  { %v1464_v31 = vpop.f32.mrb[24].mxu0  ;;  %v1466_v32 = vpop.f32.mrb[24].mxu1 }
 0x11a   :  { %v387_v33 = vmax.f32 %v1464_v31, %v1466_v32  ;;  %v1001_v34 = vpop.f32.mrb[25].mxu0  ;;  %v1039_v38 = vpop.f32.mrb[25].mxu1 }
 0x11b   :  { %v217_v39 = vpop.f32.mrb[26].mxu0  ;;  %v372_v43 = vpop.f32.mrb[26].mxu1 }
 0x11c   :  { %v1002_v44 = vpop.f32.mrb[27].mxu0  ;;  %v1040_v48 = vpop.f32.mrb[27].mxu1 }
 0x121   :  { %v489_v49 = vpop.f32.mrb[28].mxu0  ;;  %v644_v53 = vpop.f32.mrb[28].mxu1 }
 0x122   :  { %v698_v54 = vmax.f32 %v489_v49, %v644_v53  ;;  %v1053_v58 = vpop.f32.mrb[29].mxu0  ;;  %v1091_v59 = vpop.f32.mrb[29].mxu1 }
 0x123   :  { %v492_v0 = vpop.f32.mrb[30].mxu0  ;;  %v647_v4 = vpop.f32.mrb[30].mxu1 }
 0x124   :  { %v711_v5 = vmax.f32 %v375_v37, %v698_v54  ;;  %v699_v9 = vmax.f32 %v492_v0, %v647_v4  ;;  %v1054_v10 = vpop.f32.mrb[31].mxu0  ;;  %v1092_v14 = vpop.f32.mrb[31].mxu1 }
 0x126   :  { %v731_v15 = vadd.f32 %v1473_v63, %v711_v5  ;;  %v712_v19 = vmax.f32 %v376_v42, %v699_v9 }
 0x128   :  { %v744_v20 = vmax.f32 %v731_v15, 0.0  ;;  %v732_v24 = vadd.f32 %v1473_v63, %v712_v19 }
 0x129   :  { %v497_v25 = vpop.f32.mrb[32].mxu0  ;;  %v652_v29 = vpop.f32.mrb[32].mxu1 }
 0x12a   :  { %v904_v30 = vpack.c.bf16 %v744_v20, %v744_v20  ;;  %v745_v34 = vmax.f32 %v732_v24, 0.0  ;;  %v700_v38 = vmax.f32 %v497_v25, %v652_v29  ;;  %v1057_v35 = vpop.f32.mrb[33].mxu0  ;;  %v1095_v36 = vpop.f32.mrb[33].mxu1 }
 0x12b   :  { %v500_v37 = vpop.f32.mrb[34].mxu0  ;;  %v655_v39 = vpop.f32.mrb[34].mxu1 }
 0x12c   :  { %811 = vst.msk [vmem:[%s1584_s6] sm:$0xf] %vm810_vm3, %v904_v30  ;;  %v905_v40 = vpack.c.bf16 %v745_v34, %v745_v34  ;;  %v713_v41 = vmax.f32 %v377_v47, %v700_v38  ;;  %v701_v42 = vmax.f32 %v500_v37, %v655_v39  ;;  %v1058_v43 = vpop.f32.mrb[35].mxu0  ;;  %v1096_v44 = vpop.f32.mrb[35].mxu1 }
 0x12e   :  { %812 = vst.msk [vmem:[%s1584_s6 + $0x4] sm:$0xf] %vm810_vm3, %v905_v40  ;;  %v733_v48 = vadd.f32 %v1473_v63, %v713_v41  ;;  %v714_v49 = vmax.f32 %v378_v52, %v701_v42 }
 0x130   :  { %v746_v53 = vmax.f32 %v733_v48, 0.0  ;;  %v734_v54 = vadd.f32 %v1473_v63, %v714_v49 }
 0x131   :  { %v505_v58 = vpop.f32.mrb[36].mxu0  ;;  %v660_v45 = vpop.f32.mrb[36].mxu1 }
 0x132   :  { %v906_v46 = vpack.c.bf16 %v746_v53, %v746_v53  ;;  %v747_v47 = vmax.f32 %v734_v54, 0.0  ;;  %v702_v59 = vmax.f32 %v505_v58, %v660_v45  ;;  %v1061_v0 = vpop.f32.mrb[37].mxu0  ;;  %v1099_v4 = vpop.f32.mrb[37].mxu1 }
 0x133   :  { %v508_v5 = vpop.f32.mrb[38].mxu0  ;;  %v663_v9 = vpop.f32.mrb[38].mxu1 }
 0x134   :  { %813 = vst.msk [vmem:[%s1584_s6 + $0x8] sm:$0xf] %vm810_vm3, %v906_v46  ;;  %v907_v10 = vpack.c.bf16 %v747_v47, %v747_v47  ;;  %v715_v50 = vmax.f32 %v379_v57, %v702_v59  ;;  %v703_v51 = vmax.f32 %v508_v5, %v663_v9  ;;  %v1062_v52 = vpop.f32.mrb[39].mxu0  ;;  %v1100_v14 = vpop.f32.mrb[39].mxu1 }
 0x136   :  { %814 = vst.msk [vmem:[%s1584_s6 + $0xc] sm:$0xf] %vm810_vm3, %v907_v10  ;;  %v735_v15 = vadd.f32 %v1473_v63, %v715_v50  ;;  %v716_v19 = vmax.f32 %v380_v62, %v703_v51 }
 0x138   :  { %v748_v20 = vmax.f32 %v735_v15, 0.0  ;;  %v736_v24 = vadd.f32 %v1473_v63, %v716_v19 }
 0x139   :  { %v513_v25 = vpop.f32.mrb[40].mxu0  ;;  %v668_v55 = vpop.f32.mrb[40].mxu1 }
 0x13a   :  { %v908_v56 = vpack.c.bf16 %v748_v20, %v748_v20  ;;  %v749_v57 = vmax.f32 %v736_v24, 0.0  ;;  %v704_v29 = vmax.f32 %v513_v25, %v668_v55  ;;  %v1065_v30 = vpop.f32.mrb[41].mxu0  ;;  %v1103_v34 = vpop.f32.mrb[41].mxu1 }
 0x13b   :  { %v516_v38 = vpop.f32.mrb[42].mxu0  ;;  %v671_v35 = vpop.f32.mrb[42].mxu1 }
 0x13c   :  { %815 = vst.msk [vmem:[%s1584_s6 + $0x10] sm:$0xf] %vm810_vm3, %v908_v56  ;;  %v909_v36 = vpack.c.bf16 %v749_v57, %v749_v57  ;;  %v717_v60 = vmax.f32 %v381_v3, %v704_v29  ;;  %v705_v61 = vmax.f32 %v516_v38, %v671_v35  ;;  %v1066_v62 = vpop.f32.mrb[43].mxu0  ;;  %v1104_v37 = vpop.f32.mrb[43].mxu1 }
 0x13e   :  { %816 = vst.msk [vmem:[%s1584_s6 + $0x14] sm:$0xf] %vm810_vm3, %v909_v36  ;;  %v737_v39 = vadd.f32 %v1473_v63, %v717_v60  ;;  %v718_v40 = vmax.f32 %v382_v8, %v705_v61 }
 0x140   :  { %v750_v41 = vmax.f32 %v737_v39, 0.0  ;;  %v738_v42 = vadd.f32 %v1473_v63, %v718_v40 }
 0x141   :  { %v521_v43 = vpop.f32.mrb[44].mxu0  ;;  %v676_v1 = vpop.f32.mrb[44].mxu1 }
 0x142   :  { %v910_v2 = vpack.c.bf16 %v750_v41, %v750_v41  ;;  %v751_v3 = vmax.f32 %v738_v42, 0.0  ;;  %v706_v44 = vmax.f32 %v521_v43, %v676_v1  ;;  %v1069_v48 = vpop.f32.mrb[45].mxu0  ;;  %v1107_v49 = vpop.f32.mrb[45].mxu1 }
 0x143   :  { %v524_v53 = vpop.f32.mrb[46].mxu0  ;;  %v679_v54 = vpop.f32.mrb[46].mxu1 }
 0x144   :  { %817 = vst.msk [vmem:[%s1584_s6 + $0x18] sm:$0xf] %vm810_vm3, %v910_v2  ;;  %v911_v58 = vpack.c.bf16 %v751_v3, %v751_v3  ;;  %v719_v6 = vmax.f32 %v383_v13, %v706_v44  ;;  %v707_v7 = vmax.f32 %v524_v53, %v679_v54  ;;  %v1070_v8 = vpop.f32.mrb[47].mxu0  ;;  %v1108_v45 = vpop.f32.mrb[47].mxu1 }
 0x146   :  { %818 = vst.msk [vmem:[%s1584_s6 + $0x1c] sm:$0xf] %vm810_vm3, %v911_v58  ;;  %v739_v46 = vadd.f32 %v1473_v63, %v719_v6  ;;  %v720_v47 = vmax.f32 %v384_v18, %v707_v7 }
 0x148   :  { %v752_v59 = vmax.f32 %v739_v46, 0.0  ;;  %v740_v0 = vadd.f32 %v1473_v63, %v720_v47 }
 0x149   :  { %v529_v4 = vpop.f32.mrb[48].mxu0  ;;  %v684_v11 = vpop.f32.mrb[48].mxu1 }
 0x14a   :  { %v912_v12 = vpack.c.bf16 %v752_v59, %v752_v59  ;;  %v753_v13 = vmax.f32 %v740_v0, 0.0  ;;  %v708_v5 = vmax.f32 %v529_v4, %v684_v11  ;;  %v1073_v9 = vpop.f32.mrb[49].mxu0  ;;  %v1111_v10 = vpop.f32.mrb[49].mxu1 }
 0x14b   :  { %v532_v50 = vpop.f32.mrb[50].mxu0  ;;  %v687_v51 = vpop.f32.mrb[50].mxu1 }
 0x14c   :  { %819 = vst.msk [vmem:[%s1584_s6 + $0x20] sm:$0xf] %vm810_vm3, %v912_v12  ;;  %v913_v52 = vpack.c.bf16 %v753_v13, %v753_v13  ;;  %v721_v16 = vmax.f32 %v385_v23, %v708_v5  ;;  %v709_v17 = vmax.f32 %v532_v50, %v687_v51  ;;  %v1074_v18 = vpop.f32.mrb[51].mxu0  ;;  %v1112_v14 = vpop.f32.mrb[51].mxu1 }
 0x14e   :  { %820 = vst.msk [vmem:[%s1584_s6 + $0x24] sm:$0xf] %vm810_vm3, %v913_v52  ;;  %v741_v15 = vadd.f32 %v1473_v63, %v721_v16  ;;  %v722_v19 = vmax.f32 %v386_v28, %v709_v17 }
 0x150   :  { %v754_v20 = vmax.f32 %v741_v15, 0.0  ;;  %v742_v24 = vadd.f32 %v1473_v63, %v722_v19 }
 0x151   :  { %v537_v25 = vpop.f32.mrb[52].mxu0  ;;  %v692_v21 = vpop.f32.mrb[52].mxu1 }
 0x152   :  { %v914_v22 = vpack.c.bf16 %v754_v20, %v754_v20  ;;  %v755_v23 = vmax.f32 %v742_v24, 0.0  ;;  %v710_v55 = vmax.f32 %v537_v25, %v692_v21  ;;  %v1077_v56 = vpop.f32.mrb[53].mxu0  ;;  %v1115_v57 = vpop.f32.mrb[53].mxu1 }
 0x153   :  { %v540_v29 = vpop.f32.mrb[54].mxu0  ;;  %v695_v30 = vpop.f32.mrb[54].mxu1 }
 0x154   :  { %821 = vst.msk [vmem:[%s1584_s6 + $0x28] sm:$0xf] %vm810_vm3, %v914_v22  ;;  %v915_v34 = vpack.c.bf16 %v755_v23, %v755_v23  ;;  %v723_v26 = vmax.f32 %v387_v33, %v710_v55  ;;  %v1078_v27 = vpop.f32.mrb[55].mxu0  ;;  %v1116_v28 = vpop.f32.mrb[55].mxu1 }
 0x156   :  { %822 = vst.msk [vmem:[%s1584_s6 + $0x2c] sm:$0xf] %vm810_vm3, %v915_v34  ;;  %v743_v38 = vadd.f32 %v1473_v63, %v723_v26 }
 0x158   :  { %v756_v35 = vmax.f32 %v743_v38, 0.0 }
 0x15a   :  { %v916_v36 = vpack.c.bf16 %v756_v35, %v756_v35 }
 0x15c   :  { %824 = vst.msk [vmem:[%s1584_s6 + $0x30] sm:$0x1] %vm823_vm4, %v916_v36 }

// kernel: simclr_forward.6
= control target key start
LH: loop header
LB: loop body
LE: loop exit
PB: predicated region body
PF: predicated region fallthrough
CT: control target
= control target key end

     0   :  { %v499_v0 = vmov 0   ;;  %vm114_vm0 = vcmask 130048   ;;  %vm420_vm1 = vcmask 519168   ;;  %vm423_vm2 = vcmask 516096   ;;  %s672_s4 = inlined_call_operand.vmem [shape: bf16[144,64], index: 4, kind: input, shape index: {}]   ;;  %s673_s0 = inlined_call_operand.vmem [shape: bf16[18,144], index: 0, kind: input, shape index: {}]   ;;  %s674_s1 = inlined_call_operand.vmem [shape: bf16[18,144], index: 1, kind: input, shape index: {}]   ;;  %s675_s2 = inlined_call_operand.vmem [shape: bf16[18,144], index: 2, kind: input, shape index: {}]   ;;  %s676_s3 = inlined_call_operand.vmem [shape: bf16[18,144], index: 3, kind: input, shape index: {}]   ;;  %s677_s5 = inlined_call_operand.vmem [shape: f32[1,64], index: 5, kind: input, shape index: {}]   ;;  %s678_s6 = inlined_call_operand.vmem [shape: bf16[18,64], index: 6, kind: output, shape index: {}]  }
   0x1   :  { %121 = vmatprep.subr.bf16.mxu0 %v499_v0  ;;  %193 = vmatprep.subr.bf16.mxu1 %v499_v0  ;;  %v470_v1 = vld [vmem:[%s672_s4] sm:$0xff]   ;;  %v543_v2 = vld [vmem:[%s672_s4 + $0x8] sm:$0xff]   ;;  %v552_v3 = vld [vmem:[%s672_s4 + $0x10] sm:$0xff]  }
   0x2   :  { %122 = vmatpush1.bf16.msra.mxu0 %v470_v1  ;;  %194 = vmatpush1.bf16.msra.mxu1 %v470_v1  ;;  %v561_v4 = vld [vmem:[%s672_s4 + $0x18] sm:$0xff]   ;;  %v481_v5 = vld [vmem:[%s673_s0 + $0x4] ss:$8 sps:$4 sm:$0xff]   ;;  %v476_v9 = vld [vmem:[%s672_s4 + $0x30] sm:$0xff]  }
   0x3   :  { %123 = vmatprep.subr.bf16.mxu0 %v499_v0  ;;  %195 = vmatprep.subr.bf16.mxu1 %v499_v0  ;;  %v484_v6 = vld [vmem:[%s674_s1 + $0x4] ss:$8 sps:$4 sm:$0xff]   ;;  %v477_v10 = vld [vmem:[%s672_s4 + $0x38] sm:$0xff]   ;;  %v44_v12 = vld [vmem:[%s673_s0 + $0x10] sm:$0x11] }
   0x4   :  { %442 = vmatprep.mubr.msk.bf16.mxu0 %vm114_vm0, %v481_v5  ;;  %v474_v7 = vld [vmem:[%s672_s4 + $0x20] sm:$0xff]   ;;  %448 = vmatprep.mubr.msk.bf16.mxu1 %vm114_vm0, %v484_v6  ;;  %v475_v8 = vld [vmem:[%s672_s4 + $0x28] sm:$0xff]   ;;  %v171_v14 = vld [vmem:[%s674_s1 + $0x10] sm:$0x11]  ;;  %v432_v16 = vcombine.high %v44_v12, %v44_v12  ;;  %v431_v18 = vcombine.low %v44_v12, %v44_v12 }
   0x5   :  { %v478_v11 = vld [vmem:[%s672_s4 + $0x40] sm:$0xff]   ;;  %v447_v17 = vcombine.high %v171_v14, %v171_v14  ;;  %v446_v19 = vcombine.low %v171_v14, %v171_v14  ;;  %v246_v22 = vld [vmem:[%s675_s2 + $0x10] sm:$0x11] }
   0x6   :  { %124 = vmatpush1.bf16.msra.mxu0 %v543_v2  ;;  %196 = vmatpush1.bf16.msra.mxu1 %v543_v2  ;;  %v479_v13 = vld [vmem:[%s673_s0] ss:$8 sps:$4 sm:$0xff]   ;;  %v491_v20 = vld [vmem:[%s675_s2 + $0x4] ss:$8 sps:$4 sm:$0xff]   ;;  %v318_v23 = vld [vmem:[%s676_s3 + $0x10] sm:$0x11]  ;;  %v453_v26 = vcombine.high %v246_v22, %v246_v22  ;;  %v452_v28 = vcombine.low %v246_v22, %v246_v22 }
   0x7   :  { %125 = vmatprep.subr.bf16.mxu0 %v499_v0  ;;  %197 = vmatprep.subr.bf16.mxu1 %v499_v0  ;;  %v482_v15 = vld [vmem:[%s674_s1] ss:$8 sps:$4 sm:$0xff]   ;;  %v494_v21 = vld [vmem:[%s676_s3 + $0x4] ss:$8 sps:$4 sm:$0xff]   ;;  %v459_v27 = vcombine.high %v318_v23, %v318_v23  ;;  %v458_v29 = vcombine.low %v318_v23, %v318_v23 }
   0x8   :  { %v489_v24 = vld [vmem:[%s675_s2] ss:$8 sps:$4 sm:$0xff]  }
   0x9   :  { %v492_v25 = vld [vmem:[%s676_s3] ss:$8 sps:$4 sm:$0xff]  }
   0xa   :  { %126 = vmatpush1.bf16.msra.mxu0 %v552_v3  ;;  %198 = vmatpush1.bf16.msra.mxu1 %v552_v3  ;;  %v462_v54 = vld [vmem:[%s677_s5] ss:$0 sm:$0xff] }
   0xb   :  { %127 = vmatprep.subr.bf16.mxu0 %v499_v0  ;;  %199 = vmatprep.subr.bf16.mxu1 %v499_v0 }
   0xe   :  { %128 = vmatpush1.bf16.msra.mxu0 %v561_v4  ;;  %200 = vmatpush1.bf16.msra.mxu1 %v561_v4 }
   0xf   :  { %129 = vmatprep.subr.bf16.mxu0 %v499_v0  ;;  %201 = vmatprep.subr.bf16.mxu1 %v499_v0 }
  0x12   :  { %130 = vmatpush1.bf16.msra.mxu0 %v474_v7  ;;  %202 = vmatpush1.bf16.msra.mxu1 %v474_v7 }
  0x13   :  { %131 = vmatprep.subr.bf16.mxu0 %v499_v0  ;;  %203 = vmatprep.subr.bf16.mxu1 %v499_v0 }
  0x16   :  { %132 = vmatpush1.bf16.msra.mxu0 %v475_v8  ;;  %204 = vmatpush1.bf16.msra.mxu1 %v475_v8 }
  0x17   :  { %133 = vmatprep.subr.bf16.mxu0 %v499_v0  ;;  %205 = vmatprep.subr.bf16.mxu1 %v499_v0 }
  0x1a   :  { %134 = vmatpush1.bf16.msra.mxu0 %v476_v9  ;;  %206 = vmatpush1.bf16.msra.mxu1 %v476_v9 }
  0x1b   :  { %135 = vmatprep.subr.bf16.mxu0 %v499_v0  ;;  %207 = vmatprep.subr.bf16.mxu1 %v499_v0 }
  0x1e   :  { %136 = vmatpush1.bf16.msra.mxu0 %v477_v10  ;;  %208 = vmatpush1.bf16.msra.mxu1 %v477_v10 }
  0x1f   :  { %137 = vmatprep.subr.bf16.mxu0 %v499_v0  ;;  %209 = vmatprep.subr.bf16.mxu1 %v499_v0 }
  0x22   :  { %138 = vmatpush1.bf16.msra.mxu0 %v478_v11  ;;  %210 = vmatpush1.bf16.msra.mxu1 %v478_v11 }
  0x23   :  { %268 = vmatprep.subr.bf16.mxu0 %v499_v0  ;;  %340 = vmatprep.subr.bf16.mxu1 %v499_v0 }
  0x25   :  { %154 = vmatmul.mubr.bf16.vlgmr.msra.gmra.mrb[0].mxu0 %v479_v13  ;;  %226 = vmatmul.mubr.bf16.vlgmr.msra.gmra.mrb[0].mxu1 %v482_v15 }
  0x26   :  { %269 = vmatpush1.bf16.msra.mxu0 %v470_v1  ;;  %341 = vmatpush1.bf16.msra.mxu1 %v470_v1 }
  0x27   :  { %270 = vmatprep.subr.bf16.mxu0 %v499_v0  ;;  %342 = vmatprep.subr.bf16.mxu1 %v499_v0 }
  0x28   :  { %443 = vmatprep.mubr.msk.bf16.mxu0 %vm114_vm0, %v432_v16  ;;  %449 = vmatprep.mubr.msk.bf16.mxu1 %vm114_vm0, %v447_v17 }
  0x2a   :  { %271 = vmatpush1.bf16.msra.mxu0 %v543_v2  ;;  %343 = vmatpush1.bf16.msra.mxu1 %v543_v2 }
  0x2b   :  { %272 = vmatprep.subr.bf16.mxu0 %v499_v0  ;;  %344 = vmatprep.subr.bf16.mxu1 %v499_v0 }
  0x2d   :  { %162 = vmatmul.mubr.bf16.gmra.mrb[4].mxu0 %v431_v18  ;;  %234 = vmatmul.mubr.bf16.gmra.mrb[4].mxu1 %v446_v19 }
  0x2e   :  { %273 = vmatpush1.bf16.msra.mxu0 %v552_v3  ;;  %345 = vmatpush1.bf16.msra.mxu1 %v552_v3 }
  0x2f   :  { %274 = vmatprep.subr.bf16.mxu0 %v499_v0  ;;  %346 = vmatprep.subr.bf16.mxu1 %v499_v0 }
  0x30   :  { %454 = vmatprep.mubr.msk.bf16.mxu0 %vm114_vm0, %v491_v20  ;;  %460 = vmatprep.mubr.msk.bf16.mxu1 %vm114_vm0, %v494_v21 }
  0x32   :  { %275 = vmatpush1.bf16.msra.mxu0 %v561_v4  ;;  %347 = vmatpush1.bf16.msra.mxu1 %v561_v4 }
  0x33   :  { %276 = vmatprep.subr.bf16.mxu0 %v499_v0  ;;  %348 = vmatprep.subr.bf16.mxu1 %v499_v0 }
  0x36   :  { %277 = vmatpush1.bf16.msra.mxu0 %v474_v7  ;;  %349 = vmatpush1.bf16.msra.mxu1 %v474_v7 }
  0x37   :  { %278 = vmatprep.subr.bf16.mxu0 %v499_v0  ;;  %350 = vmatprep.subr.bf16.mxu1 %v499_v0 }
  0x3a   :  { %279 = vmatpush1.bf16.msra.mxu0 %v475_v8  ;;  %351 = vmatpush1.bf16.msra.mxu1 %v475_v8 }
  0x3b   :  { %280 = vmatprep.subr.bf16.mxu0 %v499_v0  ;;  %352 = vmatprep.subr.bf16.mxu1 %v499_v0 }
  0x3e   :  { %281 = vmatpush1.bf16.msra.mxu0 %v476_v9  ;;  %353 = vmatpush1.bf16.msra.mxu1 %v476_v9 }
  0x3f   :  { %282 = vmatprep.subr.bf16.mxu0 %v499_v0  ;;  %354 = vmatprep.subr.bf16.mxu1 %v499_v0 }
  0x42   :  { %283 = vmatpush1.bf16.msra.mxu0 %v477_v10  ;;  %355 = vmatpush1.bf16.msra.mxu1 %v477_v10 }
  0x43   :  { %284 = vmatprep.subr.bf16.mxu0 %v499_v0  ;;  %356 = vmatprep.subr.bf16.mxu1 %v499_v0 }
  0x46   :  { %285 = vmatpush1.bf16.msra.mxu0 %v478_v11  ;;  %357 = vmatpush1.bf16.msra.mxu1 %v478_v11 }
  0x49   :  { %301 = vmatmul.mubr.bf16.vlgmr.msra.gmra.mrb[8].mxu0 %v489_v24  ;;  %373 = vmatmul.mubr.bf16.vlgmr.msra.gmra.mrb[8].mxu1 %v492_v25 }
  0x4a   :  { %455 = vmatprep.mubr.msk.bf16.mxu0 %vm114_vm0, %v453_v26  ;;  %461 = vmatprep.mubr.msk.bf16.mxu1 %vm114_vm0, %v459_v27 }
  0x51   :  { %309 = vmatmul.mubr.bf16.gmra.mrb[12].mxu0 %v452_v28  ;;  %381 = vmatmul.mubr.bf16.gmra.mrb[12].mxu1 %v458_v29 }
  0xf8   :  { %v155_v30 = vpop.f32.mrb[0].mxu0  ;;  %v227_v31 = vpop.f32.mrb[0].mxu1 }
  0xf9   :  { %v241_v32 = vmax.f32 %v155_v30, %v227_v31  ;;  %v157_v33 = vpop.f32.mrb[1].mxu0  ;;  %v229_v34 = vpop.f32.mrb[1].mxu1 }
  0xfa   :  { %v158_v35 = vpop.f32.mrb[2].mxu0  ;;  %v230_v36 = vpop.f32.mrb[2].mxu1 }
  0xfb   :  { %v242_v37 = vmax.f32 %v158_v35, %v230_v36  ;;  %v160_v38 = vpop.f32.mrb[3].mxu0  ;;  %v232_v39 = vpop.f32.mrb[3].mxu1 }
 0x100   :  { %v163_v40 = vpop.f32.mrb[4].mxu0  ;;  %v235_v41 = vpop.f32.mrb[4].mxu1 }
 0x101   :  { %v243_v42 = vmax.f32 %v163_v40, %v235_v41  ;;  %v165_v43 = vpop.f32.mrb[5].mxu0  ;;  %v237_v44 = vpop.f32.mrb[5].mxu1 }
 0x102   :  { %v166_v45 = vpop.f32.mrb[6].mxu0  ;;  %v238_v46 = vpop.f32.mrb[6].mxu1 }
 0x103   :  { %v167_v47 = vpop.f32.mrb[7].mxu0  ;;  %v239_v48 = vpop.f32.mrb[7].mxu1 }
 0x11c   :  { %v302_v49 = vpop.f32.mrb[8].mxu0  ;;  %v374_v50 = vpop.f32.mrb[8].mxu1 }
 0x11d   :  { %v388_v51 = vmax.f32 %v302_v49, %v374_v50  ;;  %v304_v52 = vpop.f32.mrb[9].mxu0  ;;  %v376_v53 = vpop.f32.mrb[9].mxu1 }
 0x11e   :  { %v305_v55 = vpop.f32.mrb[10].mxu0  ;;  %v377_v56 = vpop.f32.mrb[10].mxu1 }
 0x11f   :  { %v391_v57 = vmax.f32 %v241_v32, %v388_v51  ;;  %v389_v58 = vmax.f32 %v305_v55, %v377_v56  ;;  %v307_v59 = vpop.f32.mrb[11].mxu0  ;;  %v379_v60 = vpop.f32.mrb[11].mxu1 }
 0x121   :  { %v401_v61 = vadd.f32 %v462_v54, %v391_v57  ;;  %v392_v62 = vmax.f32 %v242_v37, %v389_v58 }
 0x123   :  { %v404_v63 = vmax.f32 %v401_v61, 0.0  ;;  %v402_v0 = vadd.f32 %v462_v54, %v392_v62 }
 0x124   :  { %v310_v1 = vpop.f32.mrb[12].mxu0  ;;  %v382_v2 = vpop.f32.mrb[12].mxu1 }
 0x125   :  { %v466_v3 = vpack.c.bf16 %v404_v63, %v404_v63  ;;  %v405_v4 = vmax.f32 %v402_v0, 0.0  ;;  %v390_v5 = vmax.f32 %v310_v1, %v382_v2  ;;  %v312_v6 = vpop.f32.mrb[13].mxu0  ;;  %v384_v7 = vpop.f32.mrb[13].mxu1 }
 0x126   :  { %v313_v8 = vpop.f32.mrb[14].mxu0  ;;  %v385_v9 = vpop.f32.mrb[14].mxu1 }
 0x127   :  { %421 = vst.msk [vmem:[%s678_s6] sm:$0xf] %vm420_vm1, %v466_v3  ;;  %v467_v10 = vpack.c.bf16 %v405_v4, %v405_v4  ;;  %v393_v11 = vmax.f32 %v243_v42, %v390_v5  ;;  %v314_v12 = vpop.f32.mrb[15].mxu0  ;;  %v386_v13 = vpop.f32.mrb[15].mxu1 }
 0x129   :  { %422 = vst.msk [vmem:[%s678_s6 + $0x4] sm:$0xf] %vm420_vm1, %v467_v10  ;;  %v403_v14 = vadd.f32 %v462_v54, %v393_v11 }
 0x12b   :  { %v406_v15 = vmax.f32 %v403_v14, 0.0 }
 0x12d   :  { %v468_v16 = vpack.c.bf16 %v406_v15, %v406_v15 }
 0x12f   :  { %424 = vst.msk [vmem:[%s678_s6 + $0x8] sm:$0x1] %vm423_vm2, %v468_v16 }

// kernel: simclr_forward.7
= control target key start
LH: loop header
LB: loop body
LE: loop exit
PB: predicated region body
PF: predicated region fallthrough
CT: control target
= control target key end

     0   :  { %14 = vsyncpa [#allocation3], 0  ;;  %v116_v29 = vlaneseq  ;;  %v956_v32 = vmov 1966171168   ;;  %v957_v36 = vmov 0.0   ;;  %s1199_s0 = inlined_call_operand.vmem [shape: bf16[2,576], index: 0, kind: input, shape index: {}]   ;;  %s1200_s1 = inlined_call_operand.vmem [shape: bf16[576,64], index: 1, kind: input, shape index: {}]   ;;  %s1201_s2 = inlined_call_operand.vmem [shape: f32[1,64], index: 2, kind: input, shape index: {}]   ;;  %s1202_s3 = inlined_call_operand.vmem [shape: bf16[64,64], index: 3, kind: input, shape index: {}]   ;;  %s1203_s4 = inlined_call_operand.vmem [shape: f32[1,64], index: 4, kind: input, shape index: {}]   ;;  %s1204_s5 = inlined_call_operand.vmem [shape: bf16[64,32], index: 5, kind: input, shape index: {}]   ;;  %s1205_s6 = inlined_call_operand.vmem [shape: f32[1,32], index: 6, kind: input, shape index: {}]   ;;  %s1206_s7 = inlined_call_operand.hbm [shape: f32[2,64], index: 7, kind: output, shape index: {0}]   ;;  %s1207_s8 = inlined_call_operand.hbm [shape: f32[2,32], index: 8, kind: output, shape index: {1}]  }
   0x1   :  { %v859_v0 = vld [vmem:[%s1200_s1 + $0x40] sm:$0xff]   ;;  %v863_v4 = vld [vmem:[%s1200_s1 + $0x48] sm:$0xff]   ;;  %v867_v8 = vld [vmem:[%s1200_s1 + $0x50] sm:$0xff]   ;;  %v114_v33 = vunpack.c.l.s4 %v956_v32 }
   0x2   :  { %v860_v1 = vld [vmem:[%s1200_s1] sm:$0xff]   ;;  %759 = vmatprep.subr.bf16.mxu0 %v859_v0  ;;  %v864_v5 = vld [vmem:[%s1200_s1 + $0x8] sm:$0xff]   ;;  %v868_v9 = vld [vmem:[%s1200_s1 + $0x10] sm:$0xff]   ;;  %v117_v34 = vshrl.u32 %v116_v29, 7 }
   0x3   :  { %v861_v2 = vld [vmem:[%s1200_s1 + $0xc0] sm:$0xff]   ;;  %760 = vmatpush3.bf16.msra.mxu0 %v860_v1  ;;  %v865_v6 = vld [vmem:[%s1200_s1 + $0xc8] sm:$0xff]   ;;  %v869_v10 = vld [vmem:[%s1200_s1 + $0xd0] sm:$0xff]   ;;  %v115_v37 = vunpack.c.0.s8 %v114_v33 }
   0x4   :  { %v862_v3 = vld [vmem:[%s1200_s1 + $0x80] sm:$0xff]   ;;  %781 = vmatprep.subr.bf16.mxu1 %v861_v2  ;;  %761 = vmatprep.subr.bf16.mxu0 %v863_v4  ;;  %v866_v7 = vld [vmem:[%s1200_s1 + $0x88] sm:$0xff]   ;;  %v870_v11 = vld [vmem:[%s1200_s1 + $0x90] sm:$0xff]  }
   0x5   :  { %782 = vmatpush3.bf16.msra.mxu1 %v862_v3  ;;  %v871_v12 = vld [vmem:[%s1200_s1 + $0x58] sm:$0xff]   ;;  %v875_v16 = vld [vmem:[%s1200_s1 + $0x60] sm:$0xff]   ;;  %v879_v20 = vld [vmem:[%s1200_s1 + $0x68] sm:$0xff]   ;;  %v118_v39 = vsub.s32 %v115_v37, %v117_v34 }
   0x6   :  { %783 = vmatprep.subr.bf16.mxu1 %v865_v6  ;;  %v872_v13 = vld [vmem:[%s1200_s1 + $0x18] sm:$0xff]   ;;  %v876_v17 = vld [vmem:[%s1200_s1 + $0x20] sm:$0xff]   ;;  %v880_v21 = vld [vmem:[%s1200_s1 + $0x28] sm:$0xff]  }
   0x7   :  { %762 = vmatpush3.bf16.msra.mxu0 %v864_v5  ;;  %v873_v14 = vld [vmem:[%s1200_s1 + $0xd8] sm:$0xff]   ;;  %v877_v18 = vld [vmem:[%s1200_s1 + $0xe0] sm:$0xff]   ;;  %v881_v22 = vld [vmem:[%s1200_s1 + $0xe8] sm:$0xff]  }
   0x8   :  { %763 = vmatprep.subr.bf16.mxu0 %v867_v8  ;;  %v874_v15 = vld [vmem:[%s1200_s1 + $0x98] sm:$0xff]   ;;  %v878_v19 = vld [vmem:[%s1200_s1 + $0xa0] sm:$0xff]   ;;  %v882_v23 = vld [vmem:[%s1200_s1 + $0xa8] sm:$0xff]  }
   0x9   :  { %784 = vmatpush3.bf16.msra.mxu1 %v866_v7  ;;  %v883_v24 = vld [vmem:[%s1200_s1 + $0x70] sm:$0xff]   ;;  %v887_v28 = vld [vmem:[%s1200_s1 + $0x78] sm:$0xff]   ;;  %v31_v38 = vld [vmem:[%s1199_s0] sm:$0x1f] }
   0xa   :  { %785 = vmatprep.subr.bf16.mxu1 %v869_v10  ;;  %v884_v25 = vld [vmem:[%s1200_s1 + $0x30] sm:$0xff]   ;;  %v888_v30 = vld [vmem:[%s1200_s1 + $0x38] sm:$0xff]   ;;  %v119_v40 = vrot.slane %v31_v38, %v118_v39  ;;  %v892_v44 = vld [vmem:[%s1200_s1 + $0x100] sm:$0xff]  }
   0xb   :  { %764 = vmatpush3.bf16.msra.mxu0 %v868_v9  ;;  %v885_v26 = vld [vmem:[%s1200_s1 + $0xf0] sm:$0xff]   ;;  %v889_v31 = vld [vmem:[%s1200_s1 + $0xf8] sm:$0xff]  }
   0xc   :  { %765 = vmatprep.subr.bf16.mxu0 %v871_v12  ;;  %v886_v27 = vld [vmem:[%s1200_s1 + $0xb0] sm:$0xff]   ;;  %v891_v35 = vld [vmem:[%s1200_s1 + $0xb8] sm:$0xff]   ;;  %v127_v41 = vcombine.high %v119_v40, %v119_v40  ;;  %v134_v42 = vrot.slane %v119_v40, %v118_v39 }
   0xd   :  { %786 = vmatpush3.bf16.msra.mxu1 %v870_v11 }
   0xe   :  { %787 = vmatprep.subr.bf16.mxu1 %v873_v14  ;;  %v148_v43 = vrot.slane %v127_v41, %v118_v39 }
   0xf   :  { %766 = vmatpush3.bf16.msra.mxu0 %v872_v13 }
  0x10   :  { %767 = vmatprep.subr.bf16.mxu0 %v875_v16 }
  0x11   :  { %788 = vmatpush3.bf16.msra.mxu1 %v874_v15 }
  0x12   :  { %789 = vmatprep.subr.bf16.mxu1 %v877_v18 }
  0x13   :  { %768 = vmatpush3.bf16.msra.mxu0 %v876_v17 }
  0x14   :  { %769 = vmatprep.subr.bf16.mxu0 %v879_v20 }
  0x15   :  { %790 = vmatpush3.bf16.msra.mxu1 %v878_v19 }
  0x16   :  { %791 = vmatprep.subr.bf16.mxu1 %v881_v22 }
  0x17   :  { %770 = vmatpush3.bf16.msra.mxu0 %v880_v21 }
  0x18   :  { %771 = vmatprep.subr.bf16.mxu0 %v883_v24 }
  0x19   :  { %792 = vmatpush3.bf16.msra.mxu1 %v882_v23 }
  0x1a   :  { %793 = vmatprep.subr.bf16.mxu1 %v885_v26 }
  0x1b   :  { %772 = vmatpush3.bf16.msra.mxu0 %v884_v25 }
  0x1c   :  { %773 = vmatprep.subr.bf16.mxu0 %v887_v28 }
  0x1d   :  { %794 = vmatpush3.bf16.msra.mxu1 %v886_v27 }
  0x1e   :  { %795 = vmatprep.subr.bf16.mxu1 %v889_v31 }
  0x1f   :  { %774 = vmatpush3.bf16.msra.mxu0 %v888_v30 }
  0x20   :  { %818 = vmatprep.subr.bf16.mxu0 %v957_v36 }
  0x21   :  { %796 = vmatpush3.bf16.msra.mxu1 %v891_v35 }
  0x22   :  { %830 = vmatprep.subr.bf16.mxu1 %v957_v36 }
  0x23   :  { %15 = vsyncpa [#allocation5], 0  ;;  %v149_v45 = vcombine.high %v134_v42, %v134_v42  ;;  %407 = vmatprep.mubr.bf16.mxu0 %v148_v43  ;;  %v150_v46 = vcombine.high %v148_v43, %v148_v43  ;;  %v893_v47 = vld [vmem:[%s1200_s1 + $0x108] sm:$0xff]   ;;  %vm958_vm0 = vmmov 0   ;;  %v112_v48 = vcombine.high %v31_v38, %v31_v38  ;;  %v894_v49 = vld [vmem:[%s1200_s1 + $0x110] sm:$0xff]  }
  0x24   :  { %408 = vmatmul.mubr.bf16.vlgmr.msra.gmra.mrb[0].mxu0 %v134_v42  ;;  %v895_v51 = vld [vmem:[%s1200_s1 + $0x118] sm:$0xff]   ;;  %vm371_vm1 = vcmask 523264   ;;  %v896_v53 = vld [vmem:[%s1202_s3] sm:$0xff]   ;;  %v897_v54 = vld [vmem:[%s1202_s3 + $0x8] sm:$0xff]   ;;  %vm664_vm2 = vcmask 517120   ;;  %vm670_vm3 = vcmask 254976  }
  0x25   :  { %447 = vmatprep.mubr.bf16.mxu1 %v150_v46  ;;  %819 = vmatpush3.bf16.msra.mxu0 %v892_v44  ;;  %v126_v50 = vrot.slane %v112_v48, %v118_v39  ;;  %v898_v55 = vld [vmem:[%s1202_s3 + $0x10] sm:$0xff]   ;;  %v899_v56 = vld [vmem:[%s1202_s3 + $0x18] sm:$0xff]   ;;  %v709_v58 = vld [vmem:[%s1201_s2] ss:$0 sm:$0xff] }
  0x26   :  { %448 = vmatmul.mubr.bf16.vlgmr.msra.gmra.mrb[0].mxu1 %v149_v45  ;;  %820 = vmatprep.subr.bf16.mxu0 %v957_v36  ;;  %v900_v15 = vld [vmem:[%s1204_s5] sm:$0xff]   ;;  %v901_v16 = vld [vmem:[%s1204_s5 + $0x8] sm:$0xff]   ;;  %v902_v17 = vld [vmem:[%s1204_s5 + $0x10] sm:$0xff]  }
  0x27   :  { %826 = vmatprep.mubr.msk.bf16.mxu0 %vm958_vm0, %v957_v36  ;;  %838 = vmatprep.mubr.msk.bf16.mxu1 %vm958_vm0, %v957_v36  ;;  %v141_v52 = vrot.slane %v126_v50, %v118_v39  ;;  %v903_v18 = vld [vmem:[%s1204_s5 + $0x18] sm:$0xff]   ;;  %v747_v23 = vld [vmem:[%s1203_s4] ss:$0 sm:$0xff]  ;;  %s959_s4 = smov [#allocation2]  }
  0x28   :  { %831 = vmatpush3.bf16.msra.mxu1 %v896_v53  ;;  %v753_v31 = vld [vmem:[%s1205_s6] ss:$0 sm:$0xff]  ;;  %s687_s0 = sshll.u32 %s959_s4, 4  ;;  %s688_s0 = int_to_ptr.vmem [resolvable:$true] %s687_s0 }
  0x29   :  { %821 = vmatpush3.bf16.msra.mxu0 %v893_v47  ;;  %832 = vmatprep.subr.bf16.mxu1 %v957_v36  ;;  %s908_s30 = scalar_lea.vmem %s688_s0, 32  ;;  %p913_p1 = scmp.lt.s32.totalorder %s688_s0, %s688_s0 }
  0x2a   :  { %822 = vmatprep.subr.bf16.mxu0 %v957_v36  ;;  %p909_p0 = scmp.ne.s32.totalorder %s688_s0, %s908_s30  ;;  %p914_p2 = scmp.lt.s32.totalorder %s908_s30, %s908_s30 }
  0x2c   :  { %833 = vmatpush3.bf16.msra.mxu1 %v897_v54  ;;  %p915_p3 = por %p914_p2, %p913_p1 }
  0x2d   :  { %823 = vmatpush3.bf16.msra.mxu0 %v894_v49  ;;  %834 = vmatprep.subr.bf16.mxu1 %v957_v36 }
  0x2e   :  { %824 = vmatprep.subr.bf16.mxu0 %v957_v36  ;;  %p916_p4 = pnand %p915_p3, %p909_p0 }
  0x30   :  { %835 = vmatpush3.bf16.msra.mxu1 %v898_v55 }
  0x31   :  { %825 = vmatpush3.bf16.msra.mxu0 %v895_v51  ;;  %836 = vmatprep.subr.bf16.mxu1 %v957_v36 }
  0x32   :  { %842 = vmatprep.subr.bf16.mxu0 %v957_v36 }
  0x34   :  { %827 = vmatmul.mubr.msk.bf16.vlgmr.msra.gmra.mrb[4].mxu0 %vm371_vm1, %v141_v52  ;;  %837 = vmatpush3.bf16.msra.mxu1 %v899_v56 }
  0x35   :  { %850 = vmatprep.mubr.msk.bf16.mxu0 %vm958_vm0, %v957_v36  ;;  %843 = vmatpush3.bf16.msra.mxu0 %v900_v15 }
  0x36   :  { %844 = vmatprep.subr.bf16.mxu0 %v957_v36 }
  0x39   :  { %845 = vmatpush3.bf16.msra.mxu0 %v901_v16 }
  0x3a   :  { %846 = vmatprep.subr.bf16.mxu0 %v957_v36 }
  0x3d   :  { %847 = vmatpush3.bf16.msra.mxu0 %v902_v17 }
  0x3e   :  { %848 = vmatprep.subr.bf16.mxu0 %v957_v36 }
  0x41   :  { %849 = vmatpush3.bf16.msra.mxu0 %v903_v18 }
  0xf7   :  { %v775_v57 = vpop.f32.mrb[0].mxu0 }
  0xf8   :  { %v776_v59 = vpop.f32.mrb[1].mxu0 }
  0xf9   :  { %v777_v60 = vadd.f32 %v776_v59, %v775_v57  ;;  %v778_v61 = vpop.f32.mrb[2].mxu0  ;;  %v797_v62 = vpop.f32.mrb[0].mxu1 }
  0xfa   :  { %v779_v63 = vpop.f32.mrb[3].mxu0  ;;  %v798_v0 = vpop.f32.mrb[1].mxu1 }
  0xfb   :  { %v410_v1 = vadd.f32 %v777_v60, %v709_v58  ;;  %v799_v2 = vadd.f32 %v798_v0, %v797_v62  ;;  %v800_v3 = vpop.f32.mrb[2].mxu1 }
  0xfc   :  { %v801_v4 = vpop.f32.mrb[3].mxu1 }
  0xfd   :  { %v450_v5 = vadd.f32 %v799_v2, %v410_v1 }
 0x107   :  { %v489_v6 = vpop.f32.mrb[4].mxu0 }
 0x108   :  { %v490_v7 = vadd.f32 %v489_v6, %v450_v5  ;;  %v828_v8 = vpop.f32.mrb[5].mxu0 }
 0x109   :  { %v492_v9 = vpop.f32.mrb[6].mxu0 }
 0x10a   :  { %v495_v10 = vmax.f32 %v490_v7, 0.0  ;;  %v829_v11 = vpop.f32.mrb[7].mxu0 }
 0x10c   :  { %v496_v12 = vpack.c.bf16 %v495_v10, %v495_v10  ;;  %v663_v13 = vmul.f32 %v495_v10, %v495_v10 }
 0x10e   :  { %839 = vmatmul.mubr.msk.bf16.vlgmr.msra.gmra.mrb[4].mxu1 %vm371_vm1, %v496_v12  ;;  %v665_v14 = vsel %vm664_vm2, %v663_v13, 0.0 }
 0x10f   :  { %666 = vadd.xlane.f32.xlu0 %v665_v14 }
 0x19c   :  { %v667_v19 = vpop.xlane.xlu0 %666 }
 0x19d   :  { %v668_v20 = vmax.f32 %v667_v19, 1e-24 }
 0x19f   :  { %904 = vrsqrt.f32 %v668_v20 }
 0x1a9   :  { %v905_v21 = vpop.eup %904 }
 0x1aa   :  { %v676_v22 = vmul.f32 %v905_v21, %v495_v10 }
 0x1ac   :  { %677 = vst.msk [vmem:[#allocation2] sm:$0x3] %vm664_vm2, %v676_v22 }
 0x1e1   :  { %v573_v24 = vpop.f32.mrb[4].mxu1 }
 0x1e2   :  { %v574_v25 = vadd.f32 %v747_v23, %v573_v24  ;;  %v840_v26 = vpop.f32.mrb[5].mxu1 }
 0x1e3   :  { %v576_v27 = vpop.f32.mrb[6].mxu1 }
 0x1e4   :  { %v579_v28 = vmax.f32 %v574_v25, 0.0  ;;  %v841_v29 = vpop.f32.mrb[7].mxu1 }
 0x1e6   :  { %v580_v30 = vpack.c.bf16 %v579_v28, %v579_v28 }
 0x1e8   :  { %851 = vmatmul.mubr.msk.bf16.vlgmr.msra.gmra.mrb[8].mxu0 %vm371_vm1, %v580_v30 }
 0x2bb   :  { %v657_v32 = vpop.f32.mrb[8].mxu0 }
 0x2bc   :  { %v658_v33 = vadd.f32 %v753_v31, %v657_v32  ;;  %v852_v34 = vpop.f32.mrb[9].mxu0 }
 0x2bd   :  { %v660_v35 = vpop.f32.mrb[10].mxu0 }
 0x2be   :  { %v853_v36 = vpop.f32.mrb[11].mxu0  ;;  %v669_v37 = vmul.f32 %v658_v33, %v658_v33 }
 0x2c0   :  { %v671_v38 = vsel %vm670_vm3, %v669_v37, 0.0 }
 0x2c1   :  { %672 = vadd.xlane.f32.xlu0 %v671_v38 }
 0x2c2   :  { %919 = shalt.err (!%p916_p4)
}
 0x2c3   :  { %s920_s10 = scalar_lea.hbm %s1206_s7, 32 }
 0x2c4   :  { %p921_p5 = scmp.ne.s32.totalorder %s1206_s7, %s920_s10  ;;  %p924_p6 = scmp.lt.u32.totalorder %s920_s10, %s1206_s7 }
 0x2c6   :  { %p926_p7 = pnand %p924_p6, %p921_p5 }
 0x2c8   :  { %929 = shalt.err (!%p926_p7)
}
 0x2c9   :  { %690 = dma.vmem_to_hbm [thread:$0]  %s688_s0, 32, %s1206_s7, [#allocation3]  }
 0x2ca   :  { %s960_s16 = smov [#allocation4]  }
 0x2cb   :  { %s697_s17 = sshll.u32 %s960_s16, 4  ;;  %s698_s17 = int_to_ptr.vmem [resolvable:$true] %s697_s17 }
 0x2cc   :  { %s930_s18 = scalar_lea.vmem %s698_s17, 32  ;;  %p935_p9 = scmp.lt.s32.totalorder %s698_s17, %s698_s17 }
 0x2cd   :  { %p931_p8 = scmp.ne.s32.totalorder %s698_s17, %s930_s18  ;;  %p936_p10 = scmp.lt.s32.totalorder %s930_s18, %s930_s18 }
 0x2cf   :  { %p937_p11 = por %p936_p10, %p935_p9 }
 0x2d1   :  { %p938_p12 = pnand %p937_p11, %p931_p8 }
 0x34e   :  { %v673_v39 = vpop.xlane.xlu0 %672 }
 0x34f   :  { %v674_v40 = vmax.f32 %v673_v39, 1e-24 }
 0x351   :  { %906 = vrsqrt.f32 %v674_v40 }
 0x35b   :  { %v907_v41 = vpop.eup %906 }
 0x35c   :  { %v679_v42 = vmul.f32 %v907_v41, %v658_v33 }
 0x35e   :  { %680 = vst.msk [vmem:[#allocation4] sm:$0x3] %vm670_vm3, %v679_v42 }
 0x35f   :  { %941 = shalt.err (!%p938_p12)
}
 0x360   :  { %s942_s7 = scalar_lea.hbm %s1207_s8, 32 }
 0x361   :  { %p943_p13 = scmp.ne.s32.totalorder %s1207_s8, %s942_s7  ;;  %p946_p0 = scmp.lt.u32.totalorder %s942_s7, %s1207_s8 }
 0x363   :  { %p948_p1 = pnand %p946_p0, %p943_p13 }
 0x365   :  { %951 = shalt.err (!%p948_p1)
}
 0x366   :  { %700 = dma.vmem_to_hbm [thread:$0]  %s698_s17, 32, %s1207_s8, [#allocation5]  }
 0x367   :  { %952 = dma.done.wait [#allocation3], 32  }
 0x368   :  { %953 = vsyncadd [#allocation3], 4294967264 }
 0x369   :  { %954 = dma.done.wait [#allocation5], 32  }
 0x36a   :  { %955 = vsyncadd [#allocation5], 4294967264 }
 0x36b   :  { %707 = vsyncpa [#allocation3], 1 }
 0x36c   :  { %708 = vsyncpa [#allocation5], 1 }

</bundles_post_ra>
